<compile_context>
chip_gen: v7x
topology: tpu7x:2x2x1
jax: 0.10.0
libtpu: 0.0.40
codegen_flags: <defaults>
</compile_context>

<pallas_src>
import functools

import jax
import jax.numpy as jnp
from jax.experimental import pallas as pl
from jax.experimental.pallas import tpu as pltpu


# Matmul operands go to the MXU in this dtype (accumulation is always f32).
# Set to jnp.float32 to reproduce the PyTorch fp32 numerics exactly (slower on v6e/v7x).
MXU_DTYPE = jnp.bfloat16

ROW_TILE = 256                       # row tile for linear / layernorm / MLP grids
VMEM_LIMIT_BYTES = 48 * 1024 * 1024  # explicit scoped-VMEM budget (fits v7x 64 MiB/TC)


def _cparams(n_parallel_axes):
    return pltpu.CompilerParams(
        dimension_semantics=("parallel",) * n_parallel_axes,
        vmem_limit_bytes=VMEM_LIMIT_BYTES)


def _row_tile(m):
    # Full-slab block when small (block == full dim is always legal); otherwise a
    # 256-row tile (multiple of 8); the partial last block is masked on store and
    # every output row depends only on its own input rows.
    return m if m <= ROW_TILE else ROW_TILE


# ----------------------------- Pallas kernels ------------------------------

def _linear_kernel(x_ref, wt_ref, b_ref, o_ref):
    # x: (TM, K), wt: (K, N) pre-transposed, b: (1, N) -> o: (TM, N)
    x = x_ref[...].astype(MXU_DTYPE)
    w = wt_ref[...].astype(MXU_DTYPE)
    y = jnp.dot(x, w, preferred_element_type=jnp.float32)
    o_ref[...] = (y + b_ref[...].astype(jnp.float32)).astype(o_ref.dtype)


def _layernorm_kernel(x_ref, w_ref, b_ref, o_ref, *, eps):
    x = x_ref[...].astype(jnp.float32)
    mean = jnp.mean(x, axis=-1, keepdims=True)
    xc = x - mean
    var = jnp.mean(xc * xc, axis=-1, keepdims=True)
    y = xc * jax.lax.rsqrt(var + eps)
    y = y * w_ref[...].astype(jnp.float32) + b_ref[...].astype(jnp.float32)
    o_ref[...] = y.astype(o_ref.dtype)


def _attn_kernel(q_ref, k_ref, v_ref, wot_ref, bo_ref, o_ref, am_ref,
                 *, num_heads, scale):
    # Blocks: q (1, Sq, D), k/v (1, Sk, D), wot (D, D), bo (1, D).
    # Heads are kept merged on the lane axis and sliced per head inside the kernel,
    # so the stored output is a lane-dense (Sq, D) slab.
    q = q_ref[0].astype(jnp.float32) * scale          # (Sq, D)
    k = k_ref[0].astype(jnp.float32)                  # (Sk, D)
    v = v_ref[0].astype(jnp.float32)                  # (Sk, D)
    sq, d = q.shape
    sk = k.shape[0]
    hd = d // num_heads

    o_heads = []
    am = jnp.zeros((sq, sk), jnp.float32)
    for h in range(num_heads):                        # static unroll over heads
        lo, hi = h * hd, (h + 1) * hd
        qh = q[:, lo:hi].astype(MXU_DTYPE)            # (Sq, hd)
        kh = k[:, lo:hi].astype(MXU_DTYPE)            # (Sk, hd)
        vh = v[:, lo:hi].astype(MXU_DTYPE)            # (Sk, hd)
        s = jax.lax.dot_general(qh, kh, (((1,), (1,)), ((), ())),
                                preferred_element_type=jnp.float32)    # (Sq, Sk)
        s = s - jnp.max(s, axis=-1, keepdims=True)
        p = jnp.exp(s)                                # (Sq, Sk) f32
        inv = pl.reciprocal(jnp.sum(p, axis=-1, keepdims=True), approx=True)
        # Deferred softmax normalization: scale the p@v result instead of dividing p.
        o_h = jnp.dot(p.astype(MXU_DTYPE), vh,
                      preferred_element_type=jnp.float32) * inv        # (Sq, hd)
        o_heads.append(o_h)
        am = am + p * inv                             # per-head normalized attention

    o = jnp.concatenate(o_heads, axis=-1)             # (Sq, D) lane-dense
    # Fused out_proj epilogue (no HBM round-trip / transpose of the attention output).
    y = jnp.dot(o.astype(MXU_DTYPE), wot_ref[...].astype(MXU_DTYPE),
                preferred_element_type=jnp.float32) + bo_ref[...].astype(jnp.float32)
    o_ref[0] = y.astype(o_ref.dtype)
    am_ref[0] = (am * (1.0 / num_heads)).astype(am_ref.dtype)


def _mlp_kernel(x_ref, w1t_ref, b1_ref, w2t_ref, b2_ref, o_ref):
    x = x_ref[...].astype(MXU_DTYPE)
    h = jnp.dot(x, w1t_ref[...].astype(MXU_DTYPE),
                preferred_element_type=jnp.float32) + b1_ref[...].astype(jnp.float32)
    h = h * jax.nn.sigmoid(1.702 * h)                 # QuickGELU (f32)
    y = jnp.dot(h.astype(MXU_DTYPE), w2t_ref[...].astype(MXU_DTYPE),
                preferred_element_type=jnp.float32) + b2_ref[...].astype(jnp.float32)
    o_ref[...] = y.astype(o_ref.dtype)


# ----------------------------- wrappers -------------------------------------

def pallas_linear(x2d, wt, b=None):
    """x2d: (M, K); wt: (K, N) pre-transposed; b: (N,) or None -> (M, N)."""
    M, K = x2d.shape
    N = wt.shape[1]
    b2 = jnp.zeros((1, N), jnp.float32) if b is None else b.reshape(1, N)
    tm = _row_tile(M)
    return pl.pallas_call(
        _linear_kernel,
        out_shape=jax.ShapeDtypeStruct((M, N), x2d.dtype),
        grid=(pl.cdiv(M, tm),),
        in_specs=[pl.BlockSpec((tm, K), lambda i: (i, 0)),
                  pl.BlockSpec((K, N), lambda i: (0, 0)),   # weight stays resident
                  pl.BlockSpec((1, N), lambda i: (0, 0))],
        out_specs=pl.BlockSpec((tm, N), lambda i: (i, 0)),
        compiler_params=_cparams(1),
    )(x2d, wt, b2)


def pallas_layer_norm(x, w, b, eps=1e-5):
    shp = x.shape
    D = shp[-1]
    x2 = x.reshape(-1, D)
    M = x2.shape[0]
    tm = _row_tile(M)
    out = pl.pallas_call(
        functools.partial(_layernorm_kernel, eps=eps),
        out_shape=jax.ShapeDtypeStruct((M, D), x.dtype),
        grid=(pl.cdiv(M, tm),),
        in_specs=[pl.BlockSpec((tm, D), lambda i: (i, 0)),
                  pl.BlockSpec((1, D), lambda i: (0, 0)),
                  pl.BlockSpec((1, D), lambda i: (0, 0))],
        out_specs=pl.BlockSpec((tm, D), lambda i: (i, 0)),
        compiler_params=_cparams(1),
    )(x2, w.reshape(1, D), b.reshape(1, D))
    return out.reshape(shp)


def pallas_attn_core(q, k, v, w_out_t, b_out, *, num_heads, scale):
    """q: (B, Sq, D); k, v: (B, Sk, D); out_proj fused.
    Returns (out (B, Sq, D), head-averaged attention (B, Sq, Sk))."""
    B, Sq, D = q.shape
    Sk = k.shape[1]
    return pl.pallas_call(
        functools.partial(_attn_kernel, num_heads=num_heads, scale=scale),
        out_shape=(jax.ShapeDtypeStruct((B, Sq, D), q.dtype),
                   jax.ShapeDtypeStruct((B, Sq, Sk), q.dtype)),
        grid=(B,),
        in_specs=[pl.BlockSpec((1, Sq, D), lambda b: (b, 0, 0)),
                  pl.BlockSpec((1, Sk, D), lambda b: (b, 0, 0)),
                  pl.BlockSpec((1, Sk, D), lambda b: (b, 0, 0)),
                  pl.BlockSpec((D, D), lambda b: (0, 0)),    # out_proj weight resident
                  pl.BlockSpec((1, D), lambda b: (0, 0))],
        out_specs=(pl.BlockSpec((1, Sq, D), lambda b: (b, 0, 0)),
                   pl.BlockSpec((1, Sq, Sk), lambda b: (b, 0, 0))),
        compiler_params=_cparams(1),
    )(q, k, v, w_out_t, b_out.reshape(1, D))


def pallas_mlp(x2d, w1t, b1, w2t, b2):
    """QuickGELU MLP: x2d (M, D), w1t (D, 4D), w2t (4D, D), weights resident."""
    M, D = x2d.shape
    Hdim = w1t.shape[1]
    tm = _row_tile(M)
    return pl.pallas_call(
        _mlp_kernel,
        out_shape=jax.ShapeDtypeStruct((M, D), x2d.dtype),
        grid=(pl.cdiv(M, tm),),
        in_specs=[pl.BlockSpec((tm, D), lambda i: (i, 0)),
                  pl.BlockSpec((D, Hdim), lambda i: (0, 0)),
                  pl.BlockSpec((1, Hdim), lambda i: (0, 0)),
                  pl.BlockSpec((Hdim, D), lambda i: (0, 0)),
                  pl.BlockSpec((1, D), lambda i: (0, 0))],
        out_specs=pl.BlockSpec((tm, D), lambda i: (i, 0)),
        compiler_params=_cparams(1),
    )(x2d, w1t, b1.reshape(1, Hdim), w2t, b2.reshape(1, D))


# --------------------- Attention module (q, k, v forward) -------------------

def attention_forward(lp, q, kv, *, num_heads, self_attention, need_metric=False):
    """Mirrors Attention.forward(q, k, v) with k == v (both call sites).
    LoRA is already folded into the projection weights (exact; bias-free LoRA path).
    Returns (out (B, Sq, D), metric (B, Sk, hd) or None, attn_mean (B, Sq, Sk))."""
    B, Sq, D = q.shape
    Sk = kv.shape[1]
    hd = D // num_heads

    if self_attention:
        # One fused (D -> 3D) projection: single HBM pass over x, lane-dense output.
        y = pallas_linear(q.reshape(B * Sq, D), lp['w_qkv_t'], lp['b_qkv'])
        y = y.reshape(B, Sq, 3 * D)
        q_p, k_p, v_p = y[..., :D], y[..., D:2 * D], y[..., 2 * D:]
    else:
        q_p = pallas_linear(q.reshape(B * Sq, D), lp['w_q_t'], lp['b_q']).reshape(B, Sq, D)
        ykv = pallas_linear(kv.reshape(B * Sk, D), lp['w_kv_t'], lp['b_kv']).reshape(B, Sk, 2 * D)
        k_p, v_p = ykv[..., :D], ykv[..., D:]

    scale = float(hd) ** (-0.5)
    out, attn_mean = pallas_attn_core(q_p, k_p, v_p, lp['w_out_t'], lp['b_out'],
                                      num_heads=num_heads, scale=scale)
    metric = None
    if need_metric:
        # k.mean over heads -> (B, Sk, head_dim); tiny reduction, left to XLA glue.
        metric = jnp.mean(k_p.reshape(B, Sk, num_heads, hd), axis=2)
    return out, metric, attn_mean


# ------------------ ResidualAttentionBlock.forward (visual=True) ------------

def residual_attention_block_forward(lp, x, *, video_frame, num_heads, prompt_len):
    L, B, D = x.shape
    T = video_frame
    TB = T * B

    # ln_1 once over the full sequence (row-wise -> exact), then slice.
    x_ln1 = pallas_layer_norm(x, lp['ln1_w'], lp['ln1_b'])
    visual_prompt = x_ln1[:prompt_len]                      # (vpl, B, D)
    frame_token = x_ln1[prompt_len:].reshape(-1, TB, D)     # (N, T*B, D)

    # --- local (per-frame) self-attention ---
    q1 = frame_token.transpose(1, 0, 2)                     # (T*B, N, D)
    out_f, metric, local_attn = attention_forward(
        lp, q1, q1, num_heads=num_heads, self_attention=True, need_metric=True)
    attention_output_frames = out_f.transpose(1, 0, 2).reshape(-1, B, D)   # (N*T, B, D)

    # --- global attention: prompt tokens attend to prompt + all frame tokens ---
    q2 = visual_prompt.transpose(1, 0, 2)                   # (B, vpl, D)
    key2 = jnp.concatenate([visual_prompt, frame_token.reshape(-1, B, D)], axis=0)
    k2 = key2.transpose(1, 0, 2)                            # (B, vpl + N*T, D)
    out_p, _, global_attn = attention_forward(
        lp, q2, k2, num_heads=num_heads, self_attention=False)
    attention_output_prompt = out_p.transpose(1, 0, 2)      # (vpl, B, D)

    x = x + jnp.concatenate([attention_output_prompt, attention_output_frames], axis=0)

    # --- MLP (QuickGELU) with residual ---
    x_ln2 = pallas_layer_norm(x, lp['ln2_w'], lp['ln2_b'])
    mlp_out = pallas_mlp(x_ln2.reshape(L * B, D), lp['w_fc_t'], lp['b_fc'],
                         lp['w_proj_t'], lp['b_proj']).reshape(L, B, D)
    x = x + mlp_out

    return x, metric, global_attn, local_attn, video_frame, True


# ------------------------- VisualTransformer.forward -------------------------

def visual_transformer_forward(params, x, *, cfg, video_frame):
    """Patch-embed (conv1) -> class token -> positional embedding -> ln_pre ->
    global-prompt insertion -> Transformer (ResidualAttentionBlock stack, visual=True)
    -> permute back.  (ln_post / proj / frame_positional_embedding are not used by the
    reference forward.)"""
    conv_wt = params['conv1_wt']                            # (3*ps*ps, width)
    width = conv_wt.shape[1]
    ps = cfg['patch_size']
    BT, C, Hres, Wres = x.shape
    gh, gw = Hres // ps, Wres // ps

    # conv1 (kernel == stride == patch_size, no bias) as a patch-embedding matmul.
    patches = x.reshape(BT, C, gh, ps, gw, ps).transpose(0, 2, 4, 1, 3, 5)
    patches = patches.reshape(BT * gh * gw, C * ps * ps)
    x = pallas_linear(patches, conv_wt, None).reshape(BT, gh * gw, width)

    cls = jnp.broadcast_to(params['class_embedding'], (BT, 1, width))
    x = jnp.concatenate([cls, x], axis=1)                   # (BT, N, width)
    x = x + params['positional_embedding'][None]
    x = pallas_layer_norm(x, params['ln_pre_w'], params['ln_pre_b'])

    # incorporate_global_token
    B = BT // video_frame
    N = x.shape[1]
    prompt_len = params['prompt_embeddings'].shape[1]
    prompt = jnp.broadcast_to(params['prompt_embeddings'], (B, prompt_len, width))
    x = x.reshape(B, video_frame, N, width).transpose(0, 2, 1, 3).reshape(B, N * video_frame, width)
    x = jnp.concatenate([prompt, x], axis=1)                # (B, vpl + N*T, width)
    x = x.transpose(1, 0, 2)                                # (L, B, width)

    # Transformer, visual=True; sel_layer / seg_layer selection branches disabled.
    hidden = x
    for lp in params['layers']:
        hidden, metric, video_prompt_attn, local_attn = residual_attention_block_forward(
            lp, hidden, video_frame=video_frame,
            num_heads=cfg['num_heads'], prompt_len=prompt_len)[:4]

    x = hidden.transpose(1, 0, 2)                           # (B, L, width)
    return x, video_frame


# ----------------------------- parameter init --------------------------------

def init_layer_params(key, d_model, n_head, lora_dim):
    del n_head
    ks = jax.random.split(key, 9)
    s = 0.02
    return {
        'in_proj_weight': s * jax.random.normal(ks[0], (3 * d_model, d_model), jnp.float32),
        'in_proj_bias':   s * jax.random.normal(ks[1], (3 * d_model,), jnp.float32),
        'out_proj_w':     s * jax.random.normal(ks[2], (d_model, d_model), jnp.float32),
        'out_proj_b':     jnp.zeros((d_model,), jnp.float32),
        'lora_a':         s * jax.random.normal(ks[3], (lora_dim, d_model), jnp.float32),
        'lora_b':         s * jax.random.normal(ks[4], (3 * d_model, lora_dim), jnp.float32),
        'ln1_w': jnp.ones((d_model,), jnp.float32), 'ln1_b': jnp.zeros((d_model,), jnp.float32),
        'ln2_w': jnp.ones((d_model,), jnp.float32), 'ln2_b': jnp.zeros((d_model,), jnp.float32),
        'fc_w':   s * jax.random.normal(ks[5], (4 * d_model, d_model), jnp.float32),
        'fc_b':   s * jax.random.normal(ks[6], (4 * d_model,), jnp.float32),
        'proj_w': s * jax.random.normal(ks[7], (d_model, 4 * d_model), jnp.float32),
        'proj_b': s * jax.random.normal(ks[8], (d_model,), jnp.float32),
    }


def init_visual_transformer_params(key, resolution, patch_size, width, layers,
                                   heads, lora_dim, num_tokens):
    n_patches = (resolution // patch_size) ** 2
    k_conv, k_cls, k_pos, k_prompt, k_layers = jax.random.split(key, 5)
    scale = width ** (-0.5)
    layer_keys = jax.random.split(k_layers, layers)
    return {
        'conv1_w': scale * jax.random.normal(k_conv, (width, 3, patch_size, patch_size), jnp.float32),
        'class_embedding': scale * jax.random.normal(k_cls, (width,), jnp.float32),
        'positional_embedding': scale * jax.random.normal(k_pos, (n_patches + 1, width), jnp.float32),
        'ln_pre_w': jnp.ones((width,), jnp.float32),
        'ln_pre_b': jnp.zeros((width,), jnp.float32),
        'prompt_embeddings': 0.1 * jax.random.normal(k_prompt, (1, num_tokens, width), jnp.float32),
        'layers': [init_layer_params(k, width, heads, lora_dim) for k in layer_keys],
    }


def prepare_params(raw):
    """One-time preprocessing outside the kernels: fold the (bias-free) LoRA path into
    the in-projection weights (W_eff = W + B @ A, exact) and pre-transpose every weight
    into (K, N) layout so no transposes happen per call."""
    width = raw['conv1_w'].shape[0]
    out = {
        'conv1_wt': raw['conv1_w'].reshape(width, -1).T,
        'class_embedding': raw['class_embedding'],
        'positional_embedding': raw['positional_embedding'],
        'ln_pre_w': raw['ln_pre_w'], 'ln_pre_b': raw['ln_pre_b'],
        'prompt_embeddings': raw['prompt_embeddings'],
        'layers': [],
    }
    for lp in raw['layers']:
        D = lp['in_proj_weight'].shape[1]
        w_eff = lp['in_proj_weight'] + lp['lora_b'] @ lp['lora_a']     # (3D, D)
        out['layers'].append({
            'w_qkv_t': w_eff.T,                    # (D, 3D)  fused q/k/v projection
            'b_qkv':   lp['in_proj_bias'],
            'w_q_t':   w_eff[:D].T,                # (D, D)   q-only projection
            'b_q':     lp['in_proj_bias'][:D],
            'w_kv_t':  w_eff[D:].T,                # (D, 2D)  fused k/v projection
            'b_kv':    lp['in_proj_bias'][D:],
            'w_out_t': lp['out_proj_w'].T,         # (D, D)
            'b_out':   lp['out_proj_b'],
            'ln1_w': lp['ln1_w'], 'ln1_b': lp['ln1_b'],
            'ln2_w': lp['ln2_w'], 'ln2_b': lp['ln2_b'],
            'w_fc_t':   lp['fc_w'].T,   'b_fc':   lp['fc_b'],
            'w_proj_t': lp['proj_w'].T, 'b_proj': lp['proj_b'],
        })
    return out


# ----------------------------------- main ------------------------------------

if __name__ == "__main__":
    # Small shapes consistent with the module.
    resolution, patch_size = 16, 4     # 4x4 = 16 patches + class token = 17 tokens/frame
    width, heads, lora_dim = 32, 4, 8
    layers = 2
    video_frames = 2
    B = 2
    num_tokens = 2                     # global_visual_prompt_length

    key = jax.random.PRNGKey(0)
    k_params, k_x = jax.random.split(key)
    raw_params = init_visual_transformer_params(
        k_params, resolution, patch_size, width, layers, heads, lora_dim, num_tokens)
    params = prepare_params(raw_params)

    x = jax.random.normal(k_x, (B * video_frames, 3, resolution, resolution), jnp.float32)

    cfg = {'num_heads': heads, 'patch_size': patch_size}
    fwd = jax.jit(functools.partial(visual_transformer_forward, cfg=cfg,
                                    video_frame=video_frames))
    out, vf = fwd(params, x)
    out = jax.block_until_ready(out)

    tokens_per_frame = (resolution // patch_size) ** 2 + 1
    L = num_tokens + tokens_per_frame * video_frames       # 2 + 17*2 = 36
    assert out.shape == (B, L, width), out.shape
    assert out.dtype == jnp.float32
    assert bool(jnp.all(jnp.isfinite(out)))
    print("KERNEL_OK")
</pallas_src>

<mosaic_0001>
module attributes {stable_mosaic.version = 11 : i64} {
  func.func @_linear_kernel(%arg0: i32, %arg1: memref<64x48xf32, #tpu.memory_space<vmem>>, %arg2: memref<48x32xf32, #tpu.memory_space<vmem>>, %arg3: memref<1x32xf32, #tpu.memory_space<vmem>>, %arg4: memref<64x32xf32, #tpu.memory_space<vmem>>) attributes {dimension_semantics = [#tpu.dimension_semantics<parallel>], iteration_bounds = array<i64: 1>, scalar_prefetch = 0 : i64, scratch_operands = 0 : i64, tpu.core_type = #tpu.core_type<tc>, window_params = [{transform_indices = @transform_0, window_bounds = array<i64: 64, 48>}, {pipeline_mode = #tpu.pipeline_mode<synchronous>, transform_indices = @transform_1, window_bounds = array<i64: 48, 32>}, {pipeline_mode = #tpu.pipeline_mode<synchronous>, transform_indices = @transform_2, window_bounds = array<i64: 1, 32>}, {transform_indices = @transform_3, window_bounds = array<i64: 64, 32>}]} {
    %c0 = arith.constant 0 : index
    %c0_0 = arith.constant 0 : index
    %0 = vector.load %arg1[%c0, %c0_0] : memref<64x48xf32, #tpu.memory_space<vmem>>, vector<64x48xf32>
    %1 = arith.truncf %0 : vector<64x48xf32> to vector<64x48xbf16>
    %c0_1 = arith.constant 0 : index
    %c0_2 = arith.constant 0 : index
    %2 = vector.load %arg2[%c0_1, %c0_2] : memref<48x32xf32, #tpu.memory_space<vmem>>, vector<48x32xf32>
    %3 = arith.truncf %2 : vector<48x32xf32> to vector<48x32xbf16>
    %cst = arith.constant dense<0.000000e+00> : vector<64x32xf32>
    %4 = tpu.matmul %1, %3, %cst {dimension_numbers = #tpu.dot_dimension_numbers<[1], [0], [0], [1], [0, 0, 1, 1], [], []>} : vector<64x48xbf16>, vector<48x32xbf16>, vector<64x32xf32> -> vector<64x32xf32>
    %c0_3 = arith.constant 0 : index
    %c0_4 = arith.constant 0 : index
    %5 = vector.load %arg3[%c0_3, %c0_4] : memref<1x32xf32, #tpu.memory_space<vmem>>, vector<1x32xf32>
    %6 = vector.broadcast %5 : vector<1x32xf32> to vector<64x32xf32>
    %7 = arith.addf %4, %6 : vector<64x32xf32>
    %c0_5 = arith.constant 0 : index
    %c0_6 = arith.constant 0 : index
    %8 = vector.load %arg4[%c0_5, %c0_6] : memref<64x32xf32, #tpu.memory_space<vmem>>, vector<64x32xf32>
    tpu.vector_store %arg4[%c0_5, %c0_6], %7 {strides = array<i32>} : memref<64x32xf32, #tpu.memory_space<vmem>>, vector<64x32xf32>,
    return
  }
  func.func @transform_0(%arg0: i32) -> (i32, i32) {
    %c0_i32 = arith.constant 0 : i32
    %c0_i32_0 = arith.constant 0 : i32
    return %arg0, %c0_i32 : i32, i32
  }
  func.func @transform_1(%arg0: i32) -> (i32, i32) {
    %c0_i32 = arith.constant 0 : i32
    %c0_i32_0 = arith.constant 0 : i32
    %c0_i32_1 = arith.constant 0 : i32
    return %c0_i32, %c0_i32_0 : i32, i32
  }
  func.func @transform_2(%arg0: i32) -> (i32, i32) {
    %c0_i32 = arith.constant 0 : i32
    %c0_i32_0 = arith.constant 0 : i32
    %c0_i32_1 = arith.constant 0 : i32
    return %c0_i32, %c0_i32_0 : i32, i32
  }
  func.func @transform_3(%arg0: i32) -> (i32, i32) {
    %c0_i32 = arith.constant 0 : i32
    %c0_i32_0 = arith.constant 0 : i32
    return %arg0, %c0_i32 : i32, i32
  }
}

module attributes {stable_mosaic.version = 11 : i64} {
  func.func @_layernorm_kernel(%arg0: i32, %arg1: memref<68x32xf32, #tpu.memory_space<vmem>>, %arg2: memref<1x32xf32, #tpu.memory_space<vmem>>, %arg3: memref<1x32xf32, #tpu.memory_space<vmem>>, %arg4: memref<68x32xf32, #tpu.memory_space<vmem>>) attributes {dimension_semantics = [#tpu.dimension_semantics<parallel>], iteration_bounds = array<i64: 1>, scalar_prefetch = 0 : i64, scratch_operands = 0 : i64, tpu.core_type = #tpu.core_type<tc>, window_params = [{transform_indices = @transform_0, window_bounds = array<i64: 68, 32>}, {pipeline_mode = #tpu.pipeline_mode<synchronous>, transform_indices = @transform_1, window_bounds = array<i64: 1, 32>}, {pipeline_mode = #tpu.pipeline_mode<synchronous>, transform_indices = @transform_2, window_bounds = array<i64: 1, 32>}, {transform_indices = @transform_3, window_bounds = array<i64: 68, 32>}]} {
    %c0 = arith.constant 0 : index
    %c0_0 = arith.constant 0 : index
    %0 = vector.load %arg1[%c0, %c0_0] : memref<68x32xf32, #tpu.memory_space<vmem>>, vector<68x32xf32>
    %cst = arith.constant dense<0.000000e+00> : vector<68xf32>
    %1 = vector.multi_reduction <add>, %0, %cst [1] : vector<68x32xf32> to vector<68xf32>
    %2 = vector.shape_cast %1 : vector<68xf32> to vector<68x1xf32>
    %cst_1 = arith.constant 3.200000e+01 : f32
    %3 = vector.broadcast %cst_1 : f32 to vector<68x1xf32>
    %4 = arith.divf %2, %3 : vector<68x1xf32>
    %5 = vector.broadcast %4 : vector<68x1xf32> to vector<68x32xf32>
    %6 = arith.subf %0, %5 : vector<68x32xf32>
    %7 = arith.mulf %6, %6 : vector<68x32xf32>
    %cst_2 = arith.constant dense<0.000000e+00> : vector<68xf32>
    %8 = vector.multi_reduction <add>, %7, %cst_2 [1] : vector<68x32xf32> to vector<68xf32>
    %9 = vector.shape_cast %8 : vector<68xf32> to vector<68x1xf32>
    %cst_3 = arith.constant 3.200000e+01 : f32
    %10 = vector.broadcast %cst_3 : f32 to vector<68x1xf32>
    %11 = arith.divf %9, %10 : vector<68x1xf32>
    %cst_4 = arith.constant 9.99999974E-6 : f32
    %12 = vector.broadcast %cst_4 : f32 to vector<68x1xf32>
    %13 = arith.addf %11, %12 : vector<68x1xf32>
    %14 = math.rsqrt %13 : vector<68x1xf32>
    %15 = vector.broadcast %14 : vector<68x1xf32> to vector<68x32xf32>
    %16 = arith.mulf %6, %15 : vector<68x32xf32>
    %c0_5 = arith.constant 0 : index
    %c0_6 = arith.constant 0 : index
    %17 = vector.load %arg2[%c0_5, %c0_6] : memref<1x32xf32, #tpu.memory_space<vmem>>, vector<1x32xf32>
    %18 = vector.broadcast %17 : vector<1x32xf32> to vector<68x32xf32>
    %19 = arith.mulf %16, %18 : vector<68x32xf32>
    %c0_7 = arith.constant 0 : index
    %c0_8 = arith.constant 0 : index
    %20 = vector.load %arg3[%c0_7, %c0_8] : memref<1x32xf32, #tpu.memory_space<vmem>>, vector<1x32xf32>
    %21 = vector.broadcast %20 : vector<1x32xf32> to vector<68x32xf32>
    %22 = arith.addf %19, %21 : vector<68x32xf32>
    %c0_9 = arith.constant 0 : index
    %c0_10 = arith.constant 0 : index
    %23 = vector.load %arg4[%c0_9, %c0_10] : memref<68x32xf32, #tpu.memory_space<vmem>>, vector<68x32xf32>
    tpu.vector_store %arg4[%c0_9, %c0_10], %22 {strides = array<i32>} : memref<68x32xf32, #tpu.memory_space<vmem>>, vector<68x32xf32>,
    return
  }
  func.func @transform_0(%arg0: i32) -> (i32, i32) {
    %c0_i32 = arith.constant 0 : i32
    %c0_i32_0 = arith.constant 0 : i32
    return %arg0, %c0_i32 : i32, i32
  }
  func.func @transform_1(%arg0: i32) -> (i32, i32) {
    %c0_i32 = arith.constant 0 : i32
    %c0_i32_0 = arith.constant 0 : i32
    %c0_i32_1 = arith.constant 0 : i32
    return %c0_i32, %c0_i32_0 : i32, i32
  }
  func.func @transform_2(%arg0: i32) -> (i32, i32) {
    %c0_i32 = arith.constant 0 : i32
    %c0_i32_0 = arith.constant 0 : i32
    %c0_i32_1 = arith.constant 0 : i32
    return %c0_i32, %c0_i32_0 : i32, i32
  }
  func.func @transform_3(%arg0: i32) -> (i32, i32) {
    %c0_i32 = arith.constant 0 : i32
    %c0_i32_0 = arith.constant 0 : i32
    return %arg0, %c0_i32 : i32, i32
  }
}

module attributes {stable_mosaic.version = 11 : i64} {
  func.func @_layernorm_kernel(%arg0: i32, %arg1: memref<72x32xf32, #tpu.memory_space<vmem>>, %arg2: memref<1x32xf32, #tpu.memory_space<vmem>>, %arg3: memref<1x32xf32, #tpu.memory_space<vmem>>, %arg4: memref<72x32xf32, #tpu.memory_space<vmem>>) attributes {dimension_semantics = [#tpu.dimension_semantics<parallel>], iteration_bounds = array<i64: 1>, scalar_prefetch = 0 : i64, scratch_operands = 0 : i64, tpu.core_type = #tpu.core_type<tc>, window_params = [{transform_indices = @transform_0, window_bounds = array<i64: 72, 32>}, {pipeline_mode = #tpu.pipeline_mode<synchronous>, transform_indices = @transform_1, window_bounds = array<i64: 1, 32>}, {pipeline_mode = #tpu.pipeline_mode<synchronous>, transform_indices = @transform_2, window_bounds = array<i64: 1, 32>}, {transform_indices = @transform_3, window_bounds = array<i64: 72, 32>}]} {
    %c0 = arith.constant 0 : index
    %c0_0 = arith.constant 0 : index
    %0 = vector.load %arg1[%c0, %c0_0] : memref<72x32xf32, #tpu.memory_space<vmem>>, vector<72x32xf32>
    %cst = arith.constant dense<0.000000e+00> : vector<72xf32>
    %1 = vector.multi_reduction <add>, %0, %cst [1] : vector<72x32xf32> to vector<72xf32>
    %2 = vector.shape_cast %1 : vector<72xf32> to vector<72x1xf32>
    %cst_1 = arith.constant 3.200000e+01 : f32
    %3 = vector.broadcast %cst_1 : f32 to vector<72x1xf32>
    %4 = arith.divf %2, %3 : vector<72x1xf32>
    %5 = vector.broadcast %4 : vector<72x1xf32> to vector<72x32xf32>
    %6 = arith.subf %0, %5 : vector<72x32xf32>
    %7 = arith.mulf %6, %6 : vector<72x32xf32>
    %cst_2 = arith.constant dense<0.000000e+00> : vector<72xf32>
    %8 = vector.multi_reduction <add>, %7, %cst_2 [1] : vector<72x32xf32> to vector<72xf32>
    %9 = vector.shape_cast %8 : vector<72xf32> to vector<72x1xf32>
    %cst_3 = arith.constant 3.200000e+01 : f32
    %10 = vector.broadcast %cst_3 : f32 to vector<72x1xf32>
    %11 = arith.divf %9, %10 : vector<72x1xf32>
    %cst_4 = arith.constant 9.99999974E-6 : f32
    %12 = vector.broadcast %cst_4 : f32 to vector<72x1xf32>
    %13 = arith.addf %11, %12 : vector<72x1xf32>
    %14 = math.rsqrt %13 : vector<72x1xf32>
    %15 = vector.broadcast %14 : vector<72x1xf32> to vector<72x32xf32>
    %16 = arith.mulf %6, %15 : vector<72x32xf32>
    %c0_5 = arith.constant 0 : index
    %c0_6 = arith.constant 0 : index
    %17 = vector.load %arg2[%c0_5, %c0_6] : memref<1x32xf32, #tpu.memory_space<vmem>>, vector<1x32xf32>
    %18 = vector.broadcast %17 : vector<1x32xf32> to vector<72x32xf32>
    %19 = arith.mulf %16, %18 : vector<72x32xf32>
    %c0_7 = arith.constant 0 : index
    %c0_8 = arith.constant 0 : index
    %20 = vector.load %arg3[%c0_7, %c0_8] : memref<1x32xf32, #tpu.memory_space<vmem>>, vector<1x32xf32>
    %21 = vector.broadcast %20 : vector<1x32xf32> to vector<72x32xf32>
    %22 = arith.addf %19, %21 : vector<72x32xf32>
    %c0_9 = arith.constant 0 : index
    %c0_10 = arith.constant 0 : index
    %23 = vector.load %arg4[%c0_9, %c0_10] : memref<72x32xf32, #tpu.memory_space<vmem>>, vector<72x32xf32>
    tpu.vector_store %arg4[%c0_9, %c0_10], %22 {strides = array<i32>} : memref<72x32xf32, #tpu.memory_space<vmem>>, vector<72x32xf32>,
    return
  }
  func.func @transform_0(%arg0: i32) -> (i32, i32) {
    %c0_i32 = arith.constant 0 : i32
    %c0_i32_0 = arith.constant 0 : i32
    return %arg0, %c0_i32 : i32, i32
  }
  func.func @transform_1(%arg0: i32) -> (i32, i32) {
    %c0_i32 = arith.constant 0 : i32
    %c0_i32_0 = arith.constant 0 : i32
    %c0_i32_1 = arith.constant 0 : i32
    return %c0_i32, %c0_i32_0 : i32, i32
  }
  func.func @transform_2(%arg0: i32) -> (i32, i32) {
    %c0_i32 = arith.constant 0 : i32
    %c0_i32_0 = arith.constant 0 : i32
    %c0_i32_1 = arith.constant 0 : i32
    return %c0_i32, %c0_i32_0 : i32, i32
  }
  func.func @transform_3(%arg0: i32) -> (i32, i32) {
    %c0_i32 = arith.constant 0 : i32
    %c0_i32_0 = arith.constant 0 : i32
    return %arg0, %c0_i32 : i32, i32
  }
}

module attributes {stable_mosaic.version = 11 : i64} {
  func.func @_linear_kernel(%arg0: i32, %arg1: memref<72x32xf32, #tpu.memory_space<vmem>>, %arg2: memref<32x64xf32, #tpu.memory_space<vmem>>, %arg3: memref<1x64xf32, #tpu.memory_space<vmem>>, %arg4: memref<72x64xf32, #tpu.memory_space<vmem>>) attributes {dimension_semantics = [#tpu.dimension_semantics<parallel>], iteration_bounds = array<i64: 1>, scalar_prefetch = 0 : i64, scratch_operands = 0 : i64, tpu.core_type = #tpu.core_type<tc>, window_params = [{transform_indices = @transform_0, window_bounds = array<i64: 72, 32>}, {pipeline_mode = #tpu.pipeline_mode<synchronous>, transform_indices = @transform_1, window_bounds = array<i64: 32, 64>}, {pipeline_mode = #tpu.pipeline_mode<synchronous>, transform_indices = @transform_2, window_bounds = array<i64: 1, 64>}, {transform_indices = @transform_3, window_bounds = array<i64: 72, 64>}]} {
    %c0 = arith.constant 0 : index
    %c0_0 = arith.constant 0 : index
    %0 = vector.load %arg1[%c0, %c0_0] : memref<72x32xf32, #tpu.memory_space<vmem>>, vector<72x32xf32>
    %1 = arith.truncf %0 : vector<72x32xf32> to vector<72x32xbf16>
    %c0_1 = arith.constant 0 : index
    %c0_2 = arith.constant 0 : index
    %2 = vector.load %arg2[%c0_1, %c0_2] : memref<32x64xf32, #tpu.memory_space<vmem>>, vector<32x64xf32>
    %3 = arith.truncf %2 : vector<32x64xf32> to vector<32x64xbf16>
    %cst = arith.constant dense<0.000000e+00> : vector<72x64xf32>
    %4 = tpu.matmul %1, %3, %cst {dimension_numbers = #tpu.dot_dimension_numbers<[1], [0], [0], [1], [0, 0, 1, 1], [], []>} : vector<72x32xbf16>, vector<32x64xbf16>, vector<72x64xf32> -> vector<72x64xf32>
    %c0_3 = arith.constant 0 : index
    %c0_4 = arith.constant 0 : index
    %5 = vector.load %arg3[%c0_3, %c0_4] : memref<1x64xf32, #tpu.memory_space<vmem>>, vector<1x64xf32>
    %6 = vector.broadcast %5 : vector<1x64xf32> to vector<72x64xf32>
    %7 = arith.addf %4, %6 : vector<72x64xf32>
    %c0_5 = arith.constant 0 : index
    %c0_6 = arith.constant 0 : index
    %8 = vector.load %arg4[%c0_5, %c0_6] : memref<72x64xf32, #tpu.memory_space<vmem>>, vector<72x64xf32>
    tpu.vector_store %arg4[%c0_5, %c0_6], %7 {strides = array<i32>} : memref<72x64xf32, #tpu.memory_space<vmem>>, vector<72x64xf32>,
    return
  }
  func.func @transform_0(%arg0: i32) -> (i32, i32) {
    %c0_i32 = arith.constant 0 : i32
    %c0_i32_0 = arith.constant 0 : i32
    return %arg0, %c0_i32 : i32, i32
  }
  func.func @transform_1(%arg0: i32) -> (i32, i32) {
    %c0_i32 = arith.constant 0 : i32
    %c0_i32_0 = arith.constant 0 : i32
    %c0_i32_1 = arith.constant 0 : i32
    return %c0_i32, %c0_i32_0 : i32, i32
  }
  func.func @transform_2(%arg0: i32) -> (i32, i32) {
    %c0_i32 = arith.constant 0 : i32
    %c0_i32_0 = arith.constant 0 : i32
    %c0_i32_1 = arith.constant 0 : i32
    return %c0_i32, %c0_i32_0 : i32, i32
  }
  func.func @transform_3(%arg0: i32) -> (i32, i32) {
    %c0_i32 = arith.constant 0 : i32
    %c0_i32_0 = arith.constant 0 : i32
    return %arg0, %c0_i32 : i32, i32
  }
}

module attributes {stable_mosaic.version = 11 : i64} {
  func.func @_linear_kernel(%arg0: i32, %arg1: memref<4x32xf32, #tpu.memory_space<vmem>>, %arg2: memref<32x32xf32, #tpu.memory_space<vmem>>, %arg3: memref<1x32xf32, #tpu.memory_space<vmem>>, %arg4: memref<4x32xf32, #tpu.memory_space<vmem>>) attributes {dimension_semantics = [#tpu.dimension_semantics<parallel>], iteration_bounds = array<i64: 1>, scalar_prefetch = 0 : i64, scratch_operands = 0 : i64, tpu.core_type = #tpu.core_type<tc>, window_params = [{transform_indices = @transform_0, window_bounds = array<i64: 4, 32>}, {pipeline_mode = #tpu.pipeline_mode<synchronous>, transform_indices = @transform_1, window_bounds = array<i64: 32, 32>}, {pipeline_mode = #tpu.pipeline_mode<synchronous>, transform_indices = @transform_2, window_bounds = array<i64: 1, 32>}, {transform_indices = @transform_3, window_bounds = array<i64: 4, 32>}]} {
    %c0 = arith.constant 0 : index
    %c0_0 = arith.constant 0 : index
    %0 = vector.load %arg1[%c0, %c0_0] : memref<4x32xf32, #tpu.memory_space<vmem>>, vector<4x32xf32>
    %1 = arith.truncf %0 : vector<4x32xf32> to vector<4x32xbf16>
    %c0_1 = arith.constant 0 : index
    %c0_2 = arith.constant 0 : index
    %2 = vector.load %arg2[%c0_1, %c0_2] : memref<32x32xf32, #tpu.memory_space<vmem>>, vector<32x32xf32>
    %3 = arith.truncf %2 : vector<32x32xf32> to vector<32x32xbf16>
    %cst = arith.constant dense<0.000000e+00> : vector<4x32xf32>
    %4 = tpu.matmul %1, %3, %cst {dimension_numbers = #tpu.dot_dimension_numbers<[1], [0], [0], [1], [0, 0, 1, 1], [], []>} : vector<4x32xbf16>, vector<32x32xbf16>, vector<4x32xf32> -> vector<4x32xf32>
    %c0_3 = arith.constant 0 : index
    %c0_4 = arith.constant 0 : index
    %5 = vector.load %arg3[%c0_3, %c0_4] : memref<1x32xf32, #tpu.memory_space<vmem>>, vector<1x32xf32>
    %6 = vector.broadcast %5 : vector<1x32xf32> to vector<4x32xf32>
    %7 = arith.addf %4, %6 : vector<4x32xf32>
    %c0_5 = arith.constant 0 : index
    %c0_6 = arith.constant 0 : index
    %8 = vector.load %arg4[%c0_5, %c0_6] : memref<4x32xf32, #tpu.memory_space<vmem>>, vector<4x32xf32>
    tpu.vector_store %arg4[%c0_5, %c0_6], %7 {strides = array<i32>} : memref<4x32xf32, #tpu.memory_space<vmem>>, vector<4x32xf32>,
    return
  }
  func.func @transform_0(%arg0: i32) -> (i32, i32) {
    %c0_i32 = arith.constant 0 : i32
    %c0_i32_0 = arith.constant 0 : i32
    return %arg0, %c0_i32 : i32, i32
  }
  func.func @transform_1(%arg0: i32) -> (i32, i32) {
    %c0_i32 = arith.constant 0 : i32
    %c0_i32_0 = arith.constant 0 : i32
    %c0_i32_1 = arith.constant 0 : i32
    return %c0_i32, %c0_i32_0 : i32, i32
  }
  func.func @transform_2(%arg0: i32) -> (i32, i32) {
    %c0_i32 = arith.constant 0 : i32
    %c0_i32_0 = arith.constant 0 : i32
    %c0_i32_1 = arith.constant 0 : i32
    return %c0_i32, %c0_i32_0 : i32, i32
  }
  func.func @transform_3(%arg0: i32) -> (i32, i32) {
    %c0_i32 = arith.constant 0 : i32
    %c0_i32_0 = arith.constant 0 : i32
    return %arg0, %c0_i32 : i32, i32
  }
}

module attributes {stable_mosaic.version = 11 : i64} {
  func.func @_attn_kernel(%arg0: i32, %arg1: memref<1x2x32xf32, #tpu.memory_space<vmem>>, %arg2: memref<1x36x32xf32, #tpu.memory_space<vmem>>, %arg3: memref<1x36x32xf32, #tpu.memory_space<vmem>>, %arg4: memref<32x32xf32, #tpu.memory_space<vmem>>, %arg5: memref<1x32xf32, #tpu.memory_space<vmem>>, %arg6: memref<1x2x32xf32, #tpu.memory_space<vmem>>, %arg7: memref<1x2x36xf32, #tpu.memory_space<vmem>>) attributes {dimension_semantics = [#tpu.dimension_semantics<parallel>], iteration_bounds = array<i64: 2>, scalar_prefetch = 0 : i64, scratch_operands = 0 : i64, tpu.core_type = #tpu.core_type<tc>, window_params = [{transform_indices = @transform_0, window_bounds = array<i64: 1, 2, 32>}, {transform_indices = @transform_1, window_bounds = array<i64: 1, 36, 32>}, {transform_indices = @transform_2, window_bounds = array<i64: 1, 36, 32>}, {pipeline_mode = #tpu.pipeline_mode<synchronous>, transform_indices = @transform_3, window_bounds = array<i64: 32, 32>}, {pipeline_mode = #tpu.pipeline_mode<synchronous>, transform_indices = @transform_4, window_bounds = array<i64: 1, 32>}, {transform_indices = @transform_5, window_bounds = array<i64: 1, 2, 32>}, {transform_indices = @transform_6, window_bounds = array<i64: 1, 2, 36>}]} {
    %c0 = arith.constant 0 : index
    %c0_0 = arith.constant 0 : index
    %c0_1 = arith.constant 0 : index
    %0 = vector.load %arg1[%c0, %c0_0, %c0_1] : memref<1x2x32xf32, #tpu.memory_space<vmem>>, vector<1x2x32xf32>
    %1 = vector.shape_cast %0 : vector<1x2x32xf32> to vector<2x32xf32>
    %cst = arith.constant 0.353553385 : f32
    %2 = vector.broadcast %cst : f32 to vector<2x32xf32>
    %3 = arith.mulf %1, %2 : vector<2x32xf32>
    %c0_2 = arith.constant 0 : index
    %c0_3 = arith.constant 0 : index
    %c0_4 = arith.constant 0 : index
    %4 = vector.load %arg2[%c0_2, %c0_3, %c0_4] : memref<1x36x32xf32, #tpu.memory_space<vmem>>, vector<1x36x32xf32>
    %5 = vector.shape_cast %4 : vector<1x36x32xf32> to vector<36x32xf32>
    %c0_5 = arith.constant 0 : index
    %c0_6 = arith.constant 0 : index
    %c0_7 = arith.constant 0 : index
    %6 = vector.load %arg3[%c0_5, %c0_6, %c0_7] : memref<1x36x32xf32, #tpu.memory_space<vmem>>, vector<1x36x32xf32>
    %7 = vector.shape_cast %6 : vector<1x36x32xf32> to vector<36x32xf32>
    %cst_8 = arith.constant 0.000000e+00 : f32
    %8 = vector.broadcast %cst_8 : f32 to vector<2x36xf32>
    %9 = vector.extract_strided_slice %3 {offsets = [0, 0], sizes = [2, 8], strides = [1, 1]} : vector<2x32xf32> to vector<2x8xf32>
    %10 = arith.truncf %9 : vector<2x8xf32> to vector<2x8xbf16>
    %11 = vector.extract_strided_slice %5 {offsets = [0, 0], sizes = [36, 8], strides = [1, 1]} : vector<36x32xf32> to vector<36x8xf32>
    %12 = arith.truncf %11 : vector<36x8xf32> to vector<36x8xbf16>
    %13 = vector.extract_strided_slice %7 {offsets = [0, 0], sizes = [36, 8], strides = [1, 1]} : vector<36x32xf32> to vector<36x8xf32>
    %14 = arith.truncf %13 : vector<36x8xf32> to vector<36x8xbf16>
    %cst_9 = arith.constant dense<0.000000e+00> : vector<2x36xf32>
    %15 = tpu.matmul %10, %12, %cst_9 {dimension_numbers = #tpu.dot_dimension_numbers<[1], [1], [0], [0], [0, 0, 1, 0], [], []>} : vector<2x8xbf16>, vector<36x8xbf16>, vector<2x36xf32> -> vector<2x36xf32>
    %cst_10 = arith.constant dense<0xFF800000> : vector<2xf32>
    %16 = vector.multi_reduction <maximumf>, %15, %cst_10 [1] : vector<2x36xf32> to vector<2xf32>
    %17 = vector.shape_cast %16 : vector<2xf32> to vector<2x1xf32>
    %18 = vector.broadcast %17 : vector<2x1xf32> to vector<2x36xf32>
    %19 = arith.subf %15, %18 : vector<2x36xf32>
    %20 = math.exp %19 : vector<2x36xf32>
    %cst_11 = arith.constant dense<0.000000e+00> : vector<2xf32>
    %21 = vector.multi_reduction <add>, %20, %cst_11 [1] : vector<2x36xf32> to vector<2xf32>
    %22 = vector.shape_cast %21 : vector<2xf32> to vector<2x1xf32>
    %23 = tpu.reciprocal %22 {approx = true} : vector<2x1xf32> -> vector<2x1xf32>
    %24 = arith.truncf %20 : vector<2x36xf32> to vector<2x36xbf16>
    %cst_12 = arith.constant dense<0.000000e+00> : vector<2x8xf32>
    %25 = tpu.matmul %24, %14, %cst_12 {dimension_numbers = #tpu.dot_dimension_numbers<[1], [0], [0], [1], [0, 0, 1, 1], [], []>} : vector<2x36xbf16>, vector<36x8xbf16>, vector<2x8xf32> -> vector<2x8xf32>
    %26 = vector.broadcast %23 : vector<2x1xf32> to vector<2x8xf32>
    %27 = arith.mulf %25, %26 : vector<2x8xf32>
    %28 = vector.broadcast %23 : vector<2x1xf32> to vector<2x36xf32>
    %29 = arith.mulf %20, %28 : vector<2x36xf32>
    %30 = arith.addf %8, %29 : vector<2x36xf32>
    %31 = vector.extract_strided_slice %3 {offsets = [0, 8], sizes = [2, 8], strides = [1, 1]} : vector<2x32xf32> to vector<2x8xf32>
    %32 = arith.truncf %31 : vector<2x8xf32> to vector<2x8xbf16>
    %33 = vector.extract_strided_slice %5 {offsets = [0, 8], sizes = [36, 8], strides = [1, 1]} : vector<36x32xf32> to vector<36x8xf32>
    %34 = arith.truncf %33 : vector<36x8xf32> to vector<36x8xbf16>
    %35 = vector.extract_strided_slice %7 {offsets = [0, 8], sizes = [36, 8], strides = [1, 1]} : vector<36x32xf32> to vector<36x8xf32>
    %36 = arith.truncf %35 : vector<36x8xf32> to vector<36x8xbf16>
    %cst_13 = arith.constant dense<0.000000e+00> : vector<2x36xf32>
    %37 = tpu.matmul %32, %34, %cst_13 {dimension_numbers = #tpu.dot_dimension_numbers<[1], [1], [0], [0], [0, 0, 1, 0], [], []>} : vector<2x8xbf16>, vector<36x8xbf16>, vector<2x36xf32> -> vector<2x36xf32>
    %cst_14 = arith.constant dense<0xFF800000> : vector<2xf32>
    %38 = vector.multi_reduction <maximumf>, %37, %cst_14 [1] : vector<2x36xf32> to vector<2xf32>
    %39 = vector.shape_cast %38 : vector<2xf32> to vector<2x1xf32>
    %40 = vector.broadcast %39 : vector<2x1xf32> to vector<2x36xf32>
    %41 = arith.subf %37, %40 : vector<2x36xf32>
    %42 = math.exp %41 : vector<2x36xf32>
    %cst_15 = arith.constant dense<0.000000e+00> : vector<2xf32>
    %43 = vector.multi_reduction <add>, %42, %cst_15 [1] : vector<2x36xf32> to vector<2xf32>
    %44 = vector.shape_cast %43 : vector<2xf32> to vector<2x1xf32>
    %45 = tpu.reciprocal %44 {approx = true} : vector<2x1xf32> -> vector<2x1xf32>
    %46 = arith.truncf %42 : vector<2x36xf32> to vector<2x36xbf16>
    %cst_16 = arith.constant dense<0.000000e+00> : vector<2x8xf32>
    %47 = tpu.matmul %46, %36, %cst_16 {dimension_numbers = #tpu.dot_dimension_numbers<[1], [0], [0], [1], [0, 0, 1, 1], [], []>} : vector<2x36xbf16>, vector<36x8xbf16>, vector<2x8xf32> -> vector<2x8xf32>
    %48 = vector.broadcast %45 : vector<2x1xf32> to vector<2x8xf32>
    %49 = arith.mulf %47, %48 : vector<2x8xf32>
    %50 = vector.broadcast %45 : vector<2x1xf32> to vector<2x36xf32>
    %51 = arith.mulf %42, %50 : vector<2x36xf32>
    %52 = arith.addf %30, %51 : vector<2x36xf32>
    %53 = vector.extract_strided_slice %3 {offsets = [0, 16], sizes = [2, 8], strides = [1, 1]} : vector<2x32xf32> to vector<2x8xf32>
    %54 = arith.truncf %53 : vector<2x8xf32> to vector<2x8xbf16>
    %55 = vector.extract_strided_slice %5 {offsets = [0, 16], sizes = [36, 8], strides = [1, 1]} : vector<36x32xf32> to vector<36x8xf32>
    %56 = arith.truncf %55 : vector<36x8xf32> to vector<36x8xbf16>
    %57 = vector.extract_strided_slice %7 {offsets = [0, 16], sizes = [36, 8], strides = [1, 1]} : vector<36x32xf32> to vector<36x8xf32>
    %58 = arith.truncf %57 : vector<36x8xf32> to vector<36x8xbf16>
    %cst_17 = arith.constant dense<0.000000e+00> : vector<2x36xf32>
    %59 = tpu.matmul %54, %56, %cst_17 {dimension_numbers = #tpu.dot_dimension_numbers<[1], [1], [0], [0], [0, 0, 1, 0], [], []>} : vector<2x8xbf16>, vector<36x8xbf16>, vector<2x36xf32> -> vector<2x36xf32>
    %cst_18 = arith.constant dense<0xFF800000> : vector<2xf32>
    %60 = vector.multi_reduction <maximumf>, %59, %cst_18 [1] : vector<2x36xf32> to vector<2xf32>
    %61 = vector.shape_cast %60 : vector<2xf32> to vector<2x1xf32>
    %62 = vector.broadcast %61 : vector<2x1xf32> to vector<2x36xf32>
    %63 = arith.subf %59, %62 : vector<2x36xf32>
    %64 = math.exp %63 : vector<2x36xf32>
    %cst_19 = arith.constant dense<0.000000e+00> : vector<2xf32>
    %65 = vector.multi_reduction <add>, %64, %cst_19 [1] : vector<2x36xf32> to vector<2xf32>
    %66 = vector.shape_cast %65 : vector<2xf32> to vector<2x1xf32>
    %67 = tpu.reciprocal %66 {approx = true} : vector<2x1xf32> -> vector<2x1xf32>
    %68 = arith.truncf %64 : vector<2x36xf32> to vector<2x36xbf16>
    %cst_20 = arith.constant dense<0.000000e+00> : vector<2x8xf32>
    %69 = tpu.matmul %68, %58, %cst_20 {dimension_numbers = #tpu.dot_dimension_numbers<[1], [0], [0], [1], [0, 0, 1, 1], [], []>} : vector<2x36xbf16>, vector<36x8xbf16>, vector<2x8xf32> -> vector<2x8xf32>
    %70 = vector.broadcast %67 : vector<2x1xf32> to vector<2x8xf32>
    %71 = arith.mulf %69, %70 : vector<2x8xf32>
    %72 = vector.broadcast %67 : vector<2x1xf32> to vector<2x36xf32>
    %73 = arith.mulf %64, %72 : vector<2x36xf32>
    %74 = arith.addf %52, %73 : vector<2x36xf32>
    %75 = vector.extract_strided_slice %3 {offsets = [0, 24], sizes = [2, 8], strides = [1, 1]} : vector<2x32xf32> to vector<2x8xf32>
    %76 = arith.truncf %75 : vector<2x8xf32> to vector<2x8xbf16>
    %77 = vector.extract_strided_slice %5 {offsets = [0, 24], sizes = [36, 8], strides = [1, 1]} : vector<36x32xf32> to vector<36x8xf32>
    %78 = arith.truncf %77 : vector<36x8xf32> to vector<36x8xbf16>
    %79 = vector.extract_strided_slice %7 {offsets = [0, 24], sizes = [36, 8], strides = [1, 1]} : vector<36x32xf32> to vector<36x8xf32>
    %80 = arith.truncf %79 : vector<36x8xf32> to vector<36x8xbf16>
    %cst_21 = arith.constant dense<0.000000e+00> : vector<2x36xf32>
    %81 = tpu.matmul %76, %78, %cst_21 {dimension_numbers = #tpu.dot_dimension_numbers<[1], [1], [0], [0], [0, 0, 1, 0], [], []>} : vector<2x8xbf16>, vector<36x8xbf16>, vector<2x36xf32> -> vector<2x36xf32>
    %cst_22 = arith.constant dense<0xFF800000> : vector<2xf32>
    %82 = vector.multi_reduction <maximumf>, %81, %cst_22 [1] : vector<2x36xf32> to vector<2xf32>
    %83 = vector.shape_cast %82 : vector<2xf32> to vector<2x1xf32>
    %84 = vector.broadcast %83 : vector<2x1xf32> to vector<2x36xf32>
    %85 = arith.subf %81, %84 : vector<2x36xf32>
    %86 = math.exp %85 : vector<2x36xf32>
    %cst_23 = arith.constant dense<0.000000e+00> : vector<2xf32>
    %87 = vector.multi_reduction <add>, %86, %cst_23 [1] : vector<2x36xf32> to vector<2xf32>
    %88 = vector.shape_cast %87 : vector<2xf32> to vector<2x1xf32>
    %89 = tpu.reciprocal %88 {approx = true} : vector<2x1xf32> -> vector<2x1xf32>
    %90 = arith.truncf %86 : vector<2x36xf32> to vector<2x36xbf16>
    %cst_24 = arith.constant dense<0.000000e+00> : vector<2x8xf32>
    %91 = tpu.matmul %90, %80, %cst_24 {dimension_numbers = #tpu.dot_dimension_numbers<[1], [0], [0], [1], [0, 0, 1, 1], [], []>} : vector<2x36xbf16>, vector<36x8xbf16>, vector<2x8xf32> -> vector<2x8xf32>
    %92 = vector.broadcast %89 : vector<2x1xf32> to vector<2x8xf32>
    %93 = arith.mulf %91, %92 : vector<2x8xf32>
    %94 = vector.broadcast %89 : vector<2x1xf32> to vector<2x36xf32>
    %95 = arith.mulf %86, %94 : vector<2x36xf32>
    %96 = arith.addf %74, %95 : vector<2x36xf32>
    %97 = tpu.concatenate %27, %49, %71, %93 in 1 : vector<2x8xf32>, vector<2x8xf32>, vector<2x8xf32>, vector<2x8xf32> -> vector<2x32xf32>
    %98 = arith.truncf %97 : vector<2x32xf32> to vector<2x32xbf16>
    %c0_25 = arith.constant 0 : index
    %c0_26 = arith.constant 0 : index
    %99 = vector.load %arg4[%c0_25, %c0_26] : memref<32x32xf32, #tpu.memory_space<vmem>>, vector<32x32xf32>
    %100 = arith.truncf %99 : vector<32x32xf32> to vector<32x32xbf16>
    %cst_27 = arith.constant dense<0.000000e+00> : vector<2x32xf32>
    %101 = tpu.matmul %98, %100, %cst_27 {dimension_numbers = #tpu.dot_dimension_numbers<[1], [0], [0], [1], [0, 0, 1, 1], [], []>} : vector<2x32xbf16>, vector<32x32xbf16>, vector<2x32xf32> -> vector<2x32xf32>
    %c0_28 = arith.constant 0 : index
    %c0_29 = arith.constant 0 : index
    %102 = vector.load %arg5[%c0_28, %c0_29] : memref<1x32xf32, #tpu.memory_space<vmem>>, vector<1x32xf32>
    %103 = vector.broadcast %102 : vector<1x32xf32> to vector<2x32xf32>
    %104 = arith.addf %101, %103 : vector<2x32xf32>
    %c0_30 = arith.constant 0 : index
    %c0_31 = arith.constant 0 : index
    %c0_32 = arith.constant 0 : index
    %105 = vector.load %arg6[%c0_30, %c0_31, %c0_32] : memref<1x2x32xf32, #tpu.memory_space<vmem>>, vector<1x2x32xf32>
    %106 = vector.shape_cast %105 : vector<1x2x32xf32> to vector<2x32xf32>
    %107 = vector.shape_cast %104 : vector<2x32xf32> to vector<1x2x32xf32>
    tpu.vector_store %arg6[%c0_30, %c0_31, %c0_32], %107 {strides = array<i32>} : memref<1x2x32xf32, #tpu.memory_space<vmem>>, vector<1x2x32xf32>,
    %cst_33 = arith.constant 2.500000e-01 : f32
    %108 = vector.broadcast %cst_33 : f32 to vector<2x36xf32>
    %109 = arith.mulf %96, %108 : vector<2x36xf32>
    %c0_34 = arith.constant 0 : index
    %c0_35 = arith.constant 0 : index
    %c0_36 = arith.constant 0 : index
    %110 = vector.load %arg7[%c0_34, %c0_35, %c0_36] : memref<1x2x36xf32, #tpu.memory_space<vmem>>, vector<1x2x36xf32>
    %111 = vector.shape_cast %110 : vector<1x2x36xf32> to vector<2x36xf32>
    %112 = vector.shape_cast %109 : vector<2x36xf32> to vector<1x2x36xf32>
    tpu.vector_store %arg7[%c0_34, %c0_35, %c0_36], %112 {strides = array<i32>} : memref<1x2x36xf32, #tpu.memory_space<vmem>>, vector<1x2x36xf32>,
    return
  }
  func.func @transform_0(%arg0: i32) -> (i32, i32, i32) {
    %c0_i32 = arith.constant 0 : i32
    %c0_i32_0 = arith.constant 0 : i32
    %c0_i32_1 = arith.constant 0 : i32
    return %arg0, %c0_i32, %c0_i32_0 : i32, i32, i32
  }
  func.func @transform_1(%arg0: i32) -> (i32, i32, i32) {
    %c0_i32 = arith.constant 0 : i32
    %c0_i32_0 = arith.constant 0 : i32
    %c0_i32_1 = arith.constant 0 : i32
    return %arg0, %c0_i32, %c0_i32_0 : i32, i32, i32
  }
  func.func @transform_2(%arg0: i32) -> (i32, i32, i32) {
    %c0_i32 = arith.constant 0 : i32
    %c0_i32_0 = arith.constant 0 : i32
    %c0_i32_1 = arith.constant 0 : i32
    return %arg0, %c0_i32, %c0_i32_0 : i32, i32, i32
  }
  func.func @transform_3(%arg0: i32) -> (i32, i32) {
    %c0_i32 = arith.constant 0 : i32
    %c0_i32_0 = arith.constant 0 : i32
    %c0_i32_1 = arith.constant 0 : i32
    return %c0_i32, %c0_i32_0 : i32, i32
  }
  func.func @transform_4(%arg0: i32) -> (i32, i32) {
    %c0_i32 = arith.constant 0 : i32
    %c0_i32_0 = arith.constant 0 : i32
    %c0_i32_1 = arith.constant 0 : i32
    return %c0_i32, %c0_i32_0 : i32, i32
  }
  func.func @transform_5(%arg0: i32) -> (i32, i32, i32) {
    %c0_i32 = arith.constant 0 : i32
    %c0_i32_0 = arith.constant 0 : i32
    %c0_i32_1 = arith.constant 0 : i32
    return %arg0, %c0_i32, %c0_i32_0 : i32, i32, i32
  }
  func.func @transform_6(%arg0: i32) -> (i32, i32, i32) {
    %c0_i32 = arith.constant 0 : i32
    %c0_i32_0 = arith.constant 0 : i32
    %c0_i32_1 = arith.constant 0 : i32
    return %arg0, %c0_i32, %c0_i32_0 : i32, i32, i32
  }
}

module attributes {stable_mosaic.version = 11 : i64} {
  func.func @_attn_kernel(%arg0: i32, %arg1: memref<1x17x32xf32, #tpu.memory_space<vmem>>, %arg2: memref<1x17x32xf32, #tpu.memory_space<vmem>>, %arg3: memref<1x17x32xf32, #tpu.memory_space<vmem>>, %arg4: memref<32x32xf32, #tpu.memory_space<vmem>>, %arg5: memref<1x32xf32, #tpu.memory_space<vmem>>, %arg6: memref<1x17x32xf32, #tpu.memory_space<vmem>>, %arg7: memref<1x17x17xf32, #tpu.memory_space<vmem>>) attributes {dimension_semantics = [#tpu.dimension_semantics<parallel>], iteration_bounds = array<i64: 4>, scalar_prefetch = 0 : i64, scratch_operands = 0 : i64, tpu.core_type = #tpu.core_type<tc>, window_params = [{transform_indices = @transform_0, window_bounds = array<i64: 1, 17, 32>}, {transform_indices = @transform_1, window_bounds = array<i64: 1, 17, 32>}, {transform_indices = @transform_2, window_bounds = array<i64: 1, 17, 32>}, {pipeline_mode = #tpu.pipeline_mode<synchronous>, transform_indices = @transform_3, window_bounds = array<i64: 32, 32>}, {pipeline_mode = #tpu.pipeline_mode<synchronous>, transform_indices = @transform_4, window_bounds = array<i64: 1, 32>}, {transform_indices = @transform_5, window_bounds = array<i64: 1, 17, 32>}, {transform_indices = @transform_6, window_bounds = array<i64: 1, 17, 17>}]} {
    %c0 = arith.constant 0 : index
    %c0_0 = arith.constant 0 : index
    %c0_1 = arith.constant 0 : index
    %0 = vector.load %arg1[%c0, %c0_0, %c0_1] : memref<1x17x32xf32, #tpu.memory_space<vmem>>, vector<1x17x32xf32>
    %1 = vector.shape_cast %0 : vector<1x17x32xf32> to vector<17x32xf32>
    %cst = arith.constant 0.353553385 : f32
    %2 = vector.broadcast %cst : f32 to vector<17x32xf32>
    %3 = arith.mulf %1, %2 : vector<17x32xf32>
    %c0_2 = arith.constant 0 : index
    %c0_3 = arith.constant 0 : index
    %c0_4 = arith.constant 0 : index
    %4 = vector.load %arg2[%c0_2, %c0_3, %c0_4] : memref<1x17x32xf32, #tpu.memory_space<vmem>>, vector<1x17x32xf32>
    %5 = vector.shape_cast %4 : vector<1x17x32xf32> to vector<17x32xf32>
    %c0_5 = arith.constant 0 : index
    %c0_6 = arith.constant 0 : index
    %c0_7 = arith.constant 0 : index
    %6 = vector.load %arg3[%c0_5, %c0_6, %c0_7] : memref<1x17x32xf32, #tpu.memory_space<vmem>>, vector<1x17x32xf32>
    %7 = vector.shape_cast %6 : vector<1x17x32xf32> to vector<17x32xf32>
    %cst_8 = arith.constant 0.000000e+00 : f32
    %8 = vector.broadcast %cst_8 : f32 to vector<17x17xf32>
    %9 = vector.extract_strided_slice %3 {offsets = [0, 0], sizes = [17, 8], strides = [1, 1]} : vector<17x32xf32> to vector<17x8xf32>
    %10 = arith.truncf %9 : vector<17x8xf32> to vector<17x8xbf16>
    %11 = vector.extract_strided_slice %5 {offsets = [0, 0], sizes = [17, 8], strides = [1, 1]} : vector<17x32xf32> to vector<17x8xf32>
    %12 = arith.truncf %11 : vector<17x8xf32> to vector<17x8xbf16>
    %13 = vector.extract_strided_slice %7 {offsets = [0, 0], sizes = [17, 8], strides = [1, 1]} : vector<17x32xf32> to vector<17x8xf32>
    %14 = arith.truncf %13 : vector<17x8xf32> to vector<17x8xbf16>
    %cst_9 = arith.constant dense<0.000000e+00> : vector<17x17xf32>
    %15 = tpu.matmul %10, %12, %cst_9 {dimension_numbers = #tpu.dot_dimension_numbers<[1], [1], [0], [0], [0, 0, 1, 0], [], []>} : vector<17x8xbf16>, vector<17x8xbf16>, vector<17x17xf32> -> vector<17x17xf32>
    %cst_10 = arith.constant dense<0xFF800000> : vector<17xf32>
    %16 = vector.multi_reduction <maximumf>, %15, %cst_10 [1] : vector<17x17xf32> to vector<17xf32>
    %17 = vector.shape_cast %16 : vector<17xf32> to vector<17x1xf32>
    %18 = vector.broadcast %17 : vector<17x1xf32> to vector<17x17xf32>
    %19 = arith.subf %15, %18 : vector<17x17xf32>
    %20 = math.exp %19 : vector<17x17xf32>
    %cst_11 = arith.constant dense<0.000000e+00> : vector<17xf32>
    %21 = vector.multi_reduction <add>, %20, %cst_11 [1] : vector<17x17xf32> to vector<17xf32>
    %22 = vector.shape_cast %21 : vector<17xf32> to vector<17x1xf32>
    %23 = tpu.reciprocal %22 {approx = true} : vector<17x1xf32> -> vector<17x1xf32>
    %24 = arith.truncf %20 : vector<17x17xf32> to vector<17x17xbf16>
    %cst_12 = arith.constant dense<0.000000e+00> : vector<17x8xf32>
    %25 = tpu.matmul %24, %14, %cst_12 {dimension_numbers = #tpu.dot_dimension_numbers<[1], [0], [0], [1], [0, 0, 1, 1], [], []>} : vector<17x17xbf16>, vector<17x8xbf16>, vector<17x8xf32> -> vector<17x8xf32>
    %26 = vector.broadcast %23 : vector<17x1xf32> to vector<17x8xf32>
    %27 = arith.mulf %25, %26 : vector<17x8xf32>
    %28 = vector.broadcast %23 : vector<17x1xf32> to vector<17x17xf32>
    %29 = arith.mulf %20, %28 : vector<17x17xf32>
    %30 = arith.addf %8, %29 : vector<17x17xf32>
    %31 = vector.extract_strided_slice %3 {offsets = [0, 8], sizes = [17, 8], strides = [1, 1]} : vector<17x32xf32> to vector<17x8xf32>
    %32 = arith.truncf %31 : vector<17x8xf32> to vector<17x8xbf16>
    %33 = vector.extract_strided_slice %5 {offsets = [0, 8], sizes = [17, 8], strides = [1, 1]} : vector<17x32xf32> to vector<17x8xf32>
    %34 = arith.truncf %33 : vector<17x8xf32> to vector<17x8xbf16>
    %35 = vector.extract_strided_slice %7 {offsets = [0, 8], sizes = [17, 8], strides = [1, 1]} : vector<17x32xf32> to vector<17x8xf32>
    %36 = arith.truncf %35 : vector<17x8xf32> to vector<17x8xbf16>
    %cst_13 = arith.constant dense<0.000000e+00> : vector<17x17xf32>
    %37 = tpu.matmul %32, %34, %cst_13 {dimension_numbers = #tpu.dot_dimension_numbers<[1], [1], [0], [0], [0, 0, 1, 0], [], []>} : vector<17x8xbf16>, vector<17x8xbf16>, vector<17x17xf32> -> vector<17x17xf32>
    %cst_14 = arith.constant dense<0xFF800000> : vector<17xf32>
    %38 = vector.multi_reduction <maximumf>, %37, %cst_14 [1] : vector<17x17xf32> to vector<17xf32>
    %39 = vector.shape_cast %38 : vector<17xf32> to vector<17x1xf32>
    %40 = vector.broadcast %39 : vector<17x1xf32> to vector<17x17xf32>
    %41 = arith.subf %37, %40 : vector<17x17xf32>
    %42 = math.exp %41 : vector<17x17xf32>
    %cst_15 = arith.constant dense<0.000000e+00> : vector<17xf32>
    %43 = vector.multi_reduction <add>, %42, %cst_15 [1] : vector<17x17xf32> to vector<17xf32>
    %44 = vector.shape_cast %43 : vector<17xf32> to vector<17x1xf32>
    %45 = tpu.reciprocal %44 {approx = true} : vector<17x1xf32> -> vector<17x1xf32>
    %46 = arith.truncf %42 : vector<17x17xf32> to vector<17x17xbf16>
    %cst_16 = arith.constant dense<0.000000e+00> : vector<17x8xf32>
    %47 = tpu.matmul %46, %36, %cst_16 {dimension_numbers = #tpu.dot_dimension_numbers<[1], [0], [0], [1], [0, 0, 1, 1], [], []>} : vector<17x17xbf16>, vector<17x8xbf16>, vector<17x8xf32> -> vector<17x8xf32>
    %48 = vector.broadcast %45 : vector<17x1xf32> to vector<17x8xf32>
    %49 = arith.mulf %47, %48 : vector<17x8xf32>
    %50 = vector.broadcast %45 : vector<17x1xf32> to vector<17x17xf32>
    %51 = arith.mulf %42, %50 : vector<17x17xf32>
    %52 = arith.addf %30, %51 : vector<17x17xf32>
    %53 = vector.extract_strided_slice %3 {offsets = [0, 16], sizes = [17, 8], strides = [1, 1]} : vector<17x32xf32> to vector<17x8xf32>
    %54 = arith.truncf %53 : vector<17x8xf32> to vector<17x8xbf16>
    %55 = vector.extract_strided_slice %5 {offsets = [0, 16], sizes = [17, 8], strides = [1, 1]} : vector<17x32xf32> to vector<17x8xf32>
    %56 = arith.truncf %55 : vector<17x8xf32> to vector<17x8xbf16>
    %57 = vector.extract_strided_slice %7 {offsets = [0, 16], sizes = [17, 8], strides = [1, 1]} : vector<17x32xf32> to vector<17x8xf32>
    %58 = arith.truncf %57 : vector<17x8xf32> to vector<17x8xbf16>
    %cst_17 = arith.constant dense<0.000000e+00> : vector<17x17xf32>
    %59 = tpu.matmul %54, %56, %cst_17 {dimension_numbers = #tpu.dot_dimension_numbers<[1], [1], [0], [0], [0, 0, 1, 0], [], []>} : vector<17x8xbf16>, vector<17x8xbf16>, vector<17x17xf32> -> vector<17x17xf32>
    %cst_18 = arith.constant dense<0xFF800000> : vector<17xf32>
    %60 = vector.multi_reduction <maximumf>, %59, %cst_18 [1] : vector<17x17xf32> to vector<17xf32>
    %61 = vector.shape_cast %60 : vector<17xf32> to vector<17x1xf32>
    %62 = vector.broadcast %61 : vector<17x1xf32> to vector<17x17xf32>
    %63 = arith.subf %59, %62 : vector<17x17xf32>
    %64 = math.exp %63 : vector<17x17xf32>
    %cst_19 = arith.constant dense<0.000000e+00> : vector<17xf32>
    %65 = vector.multi_reduction <add>, %64, %cst_19 [1] : vector<17x17xf32> to vector<17xf32>
    %66 = vector.shape_cast %65 : vector<17xf32> to vector<17x1xf32>
    %67 = tpu.reciprocal %66 {approx = true} : vector<17x1xf32> -> vector<17x1xf32>
    %68 = arith.truncf %64 : vector<17x17xf32> to vector<17x17xbf16>
    %cst_20 = arith.constant dense<0.000000e+00> : vector<17x8xf32>
    %69 = tpu.matmul %68, %58, %cst_20 {dimension_numbers = #tpu.dot_dimension_numbers<[1], [0], [0], [1], [0, 0, 1, 1], [], []>} : vector<17x17xbf16>, vector<17x8xbf16>, vector<17x8xf32> -> vector<17x8xf32>
    %70 = vector.broadcast %67 : vector<17x1xf32> to vector<17x8xf32>
    %71 = arith.mulf %69, %70 : vector<17x8xf32>
    %72 = vector.broadcast %67 : vector<17x1xf32> to vector<17x17xf32>
    %73 = arith.mulf %64, %72 : vector<17x17xf32>
    %74 = arith.addf %52, %73 : vector<17x17xf32>
    %75 = vector.extract_strided_slice %3 {offsets = [0, 24], sizes = [17, 8], strides = [1, 1]} : vector<17x32xf32> to vector<17x8xf32>
    %76 = arith.truncf %75 : vector<17x8xf32> to vector<17x8xbf16>
    %77 = vector.extract_strided_slice %5 {offsets = [0, 24], sizes = [17, 8], strides = [1, 1]} : vector<17x32xf32> to vector<17x8xf32>
    %78 = arith.truncf %77 : vector<17x8xf32> to vector<17x8xbf16>
    %79 = vector.extract_strided_slice %7 {offsets = [0, 24], sizes = [17, 8], strides = [1, 1]} : vector<17x32xf32> to vector<17x8xf32>
    %80 = arith.truncf %79 : vector<17x8xf32> to vector<17x8xbf16>
    %cst_21 = arith.constant dense<0.000000e+00> : vector<17x17xf32>
    %81 = tpu.matmul %76, %78, %cst_21 {dimension_numbers = #tpu.dot_dimension_numbers<[1], [1], [0], [0], [0, 0, 1, 0], [], []>} : vector<17x8xbf16>, vector<17x8xbf16>, vector<17x17xf32> -> vector<17x17xf32>
    %cst_22 = arith.constant dense<0xFF800000> : vector<17xf32>
    %82 = vector.multi_reduction <maximumf>, %81, %cst_22 [1] : vector<17x17xf32> to vector<17xf32>
    %83 = vector.shape_cast %82 : vector<17xf32> to vector<17x1xf32>
    %84 = vector.broadcast %83 : vector<17x1xf32> to vector<17x17xf32>
    %85 = arith.subf %81, %84 : vector<17x17xf32>
    %86 = math.exp %85 : vector<17x17xf32>
    %cst_23 = arith.constant dense<0.000000e+00> : vector<17xf32>
    %87 = vector.multi_reduction <add>, %86, %cst_23 [1] : vector<17x17xf32> to vector<17xf32>
    %88 = vector.shape_cast %87 : vector<17xf32> to vector<17x1xf32>
    %89 = tpu.reciprocal %88 {approx = true} : vector<17x1xf32> -> vector<17x1xf32>
    %90 = arith.truncf %86 : vector<17x17xf32> to vector<17x17xbf16>
    %cst_24 = arith.constant dense<0.000000e+00> : vector<17x8xf32>
    %91 = tpu.matmul %90, %80, %cst_24 {dimension_numbers = #tpu.dot_dimension_numbers<[1], [0], [0], [1], [0, 0, 1, 1], [], []>} : vector<17x17xbf16>, vector<17x8xbf16>, vector<17x8xf32> -> vector<17x8xf32>
    %92 = vector.broadcast %89 : vector<17x1xf32> to vector<17x8xf32>
    %93 = arith.mulf %91, %92 : vector<17x8xf32>
    %94 = vector.broadcast %89 : vector<17x1xf32> to vector<17x17xf32>
    %95 = arith.mulf %86, %94 : vector<17x17xf32>
    %96 = arith.addf %74, %95 : vector<17x17xf32>
    %97 = tpu.concatenate %27, %49, %71, %93 in 1 : vector<17x8xf32>, vector<17x8xf32>, vector<17x8xf32>, vector<17x8xf32> -> vector<17x32xf32>
    %98 = arith.truncf %97 : vector<17x32xf32> to vector<17x32xbf16>
    %c0_25 = arith.constant 0 : index
    %c0_26 = arith.constant 0 : index
    %99 = vector.load %arg4[%c0_25, %c0_26] : memref<32x32xf32, #tpu.memory_space<vmem>>, vector<32x32xf32>
    %100 = arith.truncf %99 : vector<32x32xf32> to vector<32x32xbf16>
    %cst_27 = arith.constant dense<0.000000e+00> : vector<17x32xf32>
    %101 = tpu.matmul %98, %100, %cst_27 {dimension_numbers = #tpu.dot_dimension_numbers<[1], [0], [0], [1], [0, 0, 1, 1], [], []>} : vector<17x32xbf16>, vector<32x32xbf16>, vector<17x32xf32> -> vector<17x32xf32>
    %c0_28 = arith.constant 0 : index
    %c0_29 = arith.constant 0 : index
    %102 = vector.load %arg5[%c0_28, %c0_29] : memref<1x32xf32, #tpu.memory_space<vmem>>, vector<1x32xf32>
    %103 = vector.broadcast %102 : vector<1x32xf32> to vector<17x32xf32>
    %104 = arith.addf %101, %103 : vector<17x32xf32>
    %c0_30 = arith.constant 0 : index
    %c0_31 = arith.constant 0 : index
    %c0_32 = arith.constant 0 : index
    %105 = vector.load %arg6[%c0_30, %c0_31, %c0_32] : memref<1x17x32xf32, #tpu.memory_space<vmem>>, vector<1x17x32xf32>
    %106 = vector.shape_cast %105 : vector<1x17x32xf32> to vector<17x32xf32>
    %107 = vector.shape_cast %104 : vector<17x32xf32> to vector<1x17x32xf32>
    tpu.vector_store %arg6[%c0_30, %c0_31, %c0_32], %107 {strides = array<i32>} : memref<1x17x32xf32, #tpu.memory_space<vmem>>, vector<1x17x32xf32>,
    %cst_33 = arith.constant 2.500000e-01 : f32
    %108 = vector.broadcast %cst_33 : f32 to vector<17x17xf32>
    %109 = arith.mulf %96, %108 : vector<17x17xf32>
    %c0_34 = arith.constant 0 : index
    %c0_35 = arith.constant 0 : index
    %c0_36 = arith.constant 0 : index
    %110 = vector.load %arg7[%c0_34, %c0_35, %c0_36] : memref<1x17x17xf32, #tpu.memory_space<vmem>>, vector<1x17x17xf32>
    %111 = vector.shape_cast %110 : vector<1x17x17xf32> to vector<17x17xf32>
    %112 = vector.shape_cast %109 : vector<17x17xf32> to vector<1x17x17xf32>
    tpu.vector_store %arg7[%c0_34, %c0_35, %c0_36], %112 {strides = array<i32>} : memref<1x17x17xf32, #tpu.memory_space<vmem>>, vector<1x17x17xf32>,
    return
  }
  func.func @transform_0(%arg0: i32) -> (i32, i32, i32) {
    %c0_i32 = arith.constant 0 : i32
    %c0_i32_0 = arith.constant 0 : i32
    %c0_i32_1 = arith.constant 0 : i32
    return %arg0, %c0_i32, %c0_i32_0 : i32, i32, i32
  }
  func.func @transform_1(%arg0: i32) -> (i32, i32, i32) {
    %c0_i32 = arith.constant 0 : i32
    %c0_i32_0 = arith.constant 0 : i32
    %c0_i32_1 = arith.constant 0 : i32
    return %arg0, %c0_i32, %c0_i32_0 : i32, i32, i32
  }
  func.func @transform_2(%arg0: i32) -> (i32, i32, i32) {
    %c0_i32 = arith.constant 0 : i32
    %c0_i32_0 = arith.constant 0 : i32
    %c0_i32_1 = arith.constant 0 : i32
    return %arg0, %c0_i32, %c0_i32_0 : i32, i32, i32
  }
  func.func @transform_3(%arg0: i32) -> (i32, i32) {
    %c0_i32 = arith.constant 0 : i32
    %c0_i32_0 = arith.constant 0 : i32
    %c0_i32_1 = arith.constant 0 : i32
    return %c0_i32, %c0_i32_0 : i32, i32
  }
  func.func @transform_4(%arg0: i32) -> (i32, i32) {
    %c0_i32 = arith.constant 0 : i32
    %c0_i32_0 = arith.constant 0 : i32
    %c0_i32_1 = arith.constant 0 : i32
    return %c0_i32, %c0_i32_0 : i32, i32
  }
  func.func @transform_5(%arg0: i32) -> (i32, i32, i32) {
    %c0_i32 = arith.constant 0 : i32
    %c0_i32_0 = arith.constant 0 : i32
    %c0_i32_1 = arith.constant 0 : i32
    return %arg0, %c0_i32, %c0_i32_0 : i32, i32, i32
  }
  func.func @transform_6(%arg0: i32) -> (i32, i32, i32) {
    %c0_i32 = arith.constant 0 : i32
    %c0_i32_0 = arith.constant 0 : i32
    %c0_i32_1 = arith.constant 0 : i32
    return %arg0, %c0_i32, %c0_i32_0 : i32, i32, i32
  }
}

module attributes {stable_mosaic.version = 11 : i64} {
  func.func @_linear_kernel(%arg0: i32, %arg1: memref<68x32xf32, #tpu.memory_space<vmem>>, %arg2: memref<32x96xf32, #tpu.memory_space<vmem>>, %arg3: memref<1x96xf32, #tpu.memory_space<vmem>>, %arg4: memref<68x96xf32, #tpu.memory_space<vmem>>) attributes {dimension_semantics = [#tpu.dimension_semantics<parallel>], iteration_bounds = array<i64: 1>, scalar_prefetch = 0 : i64, scratch_operands = 0 : i64, tpu.core_type = #tpu.core_type<tc>, window_params = [{transform_indices = @transform_0, window_bounds = array<i64: 68, 32>}, {pipeline_mode = #tpu.pipeline_mode<synchronous>, transform_indices = @transform_1, window_bounds = array<i64: 32, 96>}, {pipeline_mode = #tpu.pipeline_mode<synchronous>, transform_indices = @transform_2, window_bounds = array<i64: 1, 96>}, {transform_indices = @transform_3, window_bounds = array<i64: 68, 96>}]} {
    %c0 = arith.constant 0 : index
    %c0_0 = arith.constant 0 : index
    %0 = vector.load %arg1[%c0, %c0_0] : memref<68x32xf32, #tpu.memory_space<vmem>>, vector<68x32xf32>
    %1 = arith.truncf %0 : vector<68x32xf32> to vector<68x32xbf16>
    %c0_1 = arith.constant 0 : index
    %c0_2 = arith.constant 0 : index
    %2 = vector.load %arg2[%c0_1, %c0_2] : memref<32x96xf32, #tpu.memory_space<vmem>>, vector<32x96xf32>
    %3 = arith.truncf %2 : vector<32x96xf32> to vector<32x96xbf16>
    %cst = arith.constant dense<0.000000e+00> : vector<68x96xf32>
    %4 = tpu.matmul %1, %3, %cst {dimension_numbers = #tpu.dot_dimension_numbers<[1], [0], [0], [1], [0, 0, 1, 1], [], []>} : vector<68x32xbf16>, vector<32x96xbf16>, vector<68x96xf32> -> vector<68x96xf32>
    %c0_3 = arith.constant 0 : index
    %c0_4 = arith.constant 0 : index
    %5 = vector.load %arg3[%c0_3, %c0_4] : memref<1x96xf32, #tpu.memory_space<vmem>>, vector<1x96xf32>
    %6 = vector.broadcast %5 : vector<1x96xf32> to vector<68x96xf32>
    %7 = arith.addf %4, %6 : vector<68x96xf32>
    %c0_5 = arith.constant 0 : index
    %c0_6 = arith.constant 0 : index
    %8 = vector.load %arg4[%c0_5, %c0_6] : memref<68x96xf32, #tpu.memory_space<vmem>>, vector<68x96xf32>
    tpu.vector_store %arg4[%c0_5, %c0_6], %7 {strides = array<i32>} : memref<68x96xf32, #tpu.memory_space<vmem>>, vector<68x96xf32>,
    return
  }
  func.func @transform_0(%arg0: i32) -> (i32, i32) {
    %c0_i32 = arith.constant 0 : i32
    %c0_i32_0 = arith.constant 0 : i32
    return %arg0, %c0_i32 : i32, i32
  }
  func.func @transform_1(%arg0: i32) -> (i32, i32) {
    %c0_i32 = arith.constant 0 : i32
    %c0_i32_0 = arith.constant 0 : i32
    %c0_i32_1 = arith.constant 0 : i32
    return %c0_i32, %c0_i32_0 : i32, i32
  }
  func.func @transform_2(%arg0: i32) -> (i32, i32) {
    %c0_i32 = arith.constant 0 : i32
    %c0_i32_0 = arith.constant 0 : i32
    %c0_i32_1 = arith.constant 0 : i32
    return %c0_i32, %c0_i32_0 : i32, i32
  }
  func.func @transform_3(%arg0: i32) -> (i32, i32) {
    %c0_i32 = arith.constant 0 : i32
    %c0_i32_0 = arith.constant 0 : i32
    return %arg0, %c0_i32 : i32, i32
  }
}

module attributes {stable_mosaic.version = 11 : i64} {
  func.func @_mlp_kernel(%arg0: i32, %arg1: memref<72x32xf32, #tpu.memory_space<vmem>>, %arg2: memref<32x128xf32, #tpu.memory_space<vmem>>, %arg3: memref<1x128xf32, #tpu.memory_space<vmem>>, %arg4: memref<128x32xf32, #tpu.memory_space<vmem>>, %arg5: memref<1x32xf32, #tpu.memory_space<vmem>>, %arg6: memref<72x32xf32, #tpu.memory_space<vmem>>) attributes {dimension_semantics = [#tpu.dimension_semantics<parallel>], iteration_bounds = array<i64: 1>, scalar_prefetch = 0 : i64, scratch_operands = 0 : i64, tpu.core_type = #tpu.core_type<tc>, window_params = [{transform_indices = @transform_0, window_bounds = array<i64: 72, 32>}, {pipeline_mode = #tpu.pipeline_mode<synchronous>, transform_indices = @transform_1, window_bounds = array<i64: 32, 128>}, {pipeline_mode = #tpu.pipeline_mode<synchronous>, transform_indices = @transform_2, window_bounds = array<i64: 1, 128>}, {pipeline_mode = #tpu.pipeline_mode<synchronous>, transform_indices = @transform_3, window_bounds = array<i64: 128, 32>}, {pipeline_mode = #tpu.pipeline_mode<synchronous>, transform_indices = @transform_4, window_bounds = array<i64: 1, 32>}, {transform_indices = @transform_5, window_bounds = array<i64: 72, 32>}]} {
    %c0 = arith.constant 0 : index
    %c0_0 = arith.constant 0 : index
    %0 = vector.load %arg1[%c0, %c0_0] : memref<72x32xf32, #tpu.memory_space<vmem>>, vector<72x32xf32>
    %1 = arith.truncf %0 : vector<72x32xf32> to vector<72x32xbf16>
    %c0_1 = arith.constant 0 : index
    %c0_2 = arith.constant 0 : index
    %2 = vector.load %arg2[%c0_1, %c0_2] : memref<32x128xf32, #tpu.memory_space<vmem>>, vector<32x128xf32>
    %3 = arith.truncf %2 : vector<32x128xf32> to vector<32x128xbf16>
    %cst = arith.constant dense<0.000000e+00> : vector<72x128xf32>
    %4 = tpu.matmul %1, %3, %cst {dimension_numbers = #tpu.dot_dimension_numbers<[1], [0], [0], [1], [0, 0, 1, 1], [], []>} : vector<72x32xbf16>, vector<32x128xbf16>, vector<72x128xf32> -> vector<72x128xf32>
    %c0_3 = arith.constant 0 : index
    %c0_4 = arith.constant 0 : index
    %5 = vector.load %arg3[%c0_3, %c0_4] : memref<1x128xf32, #tpu.memory_space<vmem>>, vector<1x128xf32>
    %6 = vector.broadcast %5 : vector<1x128xf32> to vector<72x128xf32>
    %7 = arith.addf %4, %6 : vector<72x128xf32>
    %cst_5 = arith.constant 1.702000e+00 : f32
    %8 = vector.broadcast %cst_5 : f32 to vector<72x128xf32>
    %9 = arith.mulf %8, %7 : vector<72x128xf32>
    %10 = arith.negf %9 : vector<72x128xf32>
    %11 = math.exp %10 : vector<72x128xf32>
    %cst_6 = arith.constant 1.000000e+00 : f32
    %12 = vector.broadcast %cst_6 : f32 to vector<72x128xf32>
    %13 = arith.addf %12, %11 : vector<72x128xf32>
    %14 = arith.divf %12, %13 : vector<72x128xf32>
    %15 = arith.mulf %7, %14 : vector<72x128xf32>
    %16 = arith.truncf %15 : vector<72x128xf32> to vector<72x128xbf16>
    %c0_7 = arith.constant 0 : index
    %c0_8 = arith.constant 0 : index
    %17 = vector.load %arg4[%c0_7, %c0_8] : memref<128x32xf32, #tpu.memory_space<vmem>>, vector<128x32xf32>
    %18 = arith.truncf %17 : vector<128x32xf32> to vector<128x32xbf16>
    %cst_9 = arith.constant dense<0.000000e+00> : vector<72x32xf32>
    %19 = tpu.matmul %16, %18, %cst_9 {dimension_numbers = #tpu.dot_dimension_numbers<[1], [0], [0], [1], [0, 0, 1, 1], [], []>} : vector<72x128xbf16>, vector<128x32xbf16>, vector<72x32xf32> -> vector<72x32xf32>
    %c0_10 = arith.constant 0 : index
    %c0_11 = arith.constant 0 : index
    %20 = vector.load %arg5[%c0_10, %c0_11] : memref<1x32xf32, #tpu.memory_space<vmem>>, vector<1x32xf32>
    %21 = vector.broadcast %20 : vector<1x32xf32> to vector<72x32xf32>
    %22 = arith.addf %19, %21 : vector<72x32xf32>
    %c0_12 = arith.constant 0 : index
    %c0_13 = arith.constant 0 : index
    %23 = vector.load %arg6[%c0_12, %c0_13] : memref<72x32xf32, #tpu.memory_space<vmem>>, vector<72x32xf32>
    tpu.vector_store %arg6[%c0_12, %c0_13], %22 {strides = array<i32>} : memref<72x32xf32, #tpu.memory_space<vmem>>, vector<72x32xf32>,
    return
  }
  func.func @transform_0(%arg0: i32) -> (i32, i32) {
    %c0_i32 = arith.constant 0 : i32
    %c0_i32_0 = arith.constant 0 : i32
    return %arg0, %c0_i32 : i32, i32
  }
  func.func @transform_1(%arg0: i32) -> (i32, i32) {
    %c0_i32 = arith.constant 0 : i32
    %c0_i32_0 = arith.constant 0 : i32
    %c0_i32_1 = arith.constant 0 : i32
    return %c0_i32, %c0_i32_0 : i32, i32
  }
  func.func @transform_2(%arg0: i32) -> (i32, i32) {
    %c0_i32 = arith.constant 0 : i32
    %c0_i32_0 = arith.constant 0 : i32
    %c0_i32_1 = arith.constant 0 : i32
    return %c0_i32, %c0_i32_0 : i32, i32
  }
  func.func @transform_3(%arg0: i32) -> (i32, i32) {
    %c0_i32 = arith.constant 0 : i32
    %c0_i32_0 = arith.constant 0 : i32
    %c0_i32_1 = arith.constant 0 : i32
    return %c0_i32, %c0_i32_0 : i32, i32
  }
  func.func @transform_4(%arg0: i32) -> (i32, i32) {
    %c0_i32 = arith.constant 0 : i32
    %c0_i32_0 = arith.constant 0 : i32
    %c0_i32_1 = arith.constant 0 : i32
    return %c0_i32, %c0_i32_0 : i32, i32
  }
  func.func @transform_5(%arg0: i32) -> (i32, i32) {
    %c0_i32 = arith.constant 0 : i32
    %c0_i32_0 = arith.constant 0 : i32
    return %arg0, %c0_i32 : i32, i32
  }
}

</mosaic_0001>

<bundles_post_ra>
// kernel: visual_transformer_forward.18
= control target key start
LH: loop header
LB: loop body
LE: loop exit
PB: predicated region body
PF: predicated region fallthrough
CT: control target
= control target key end

     0   :  { %vm43_vm0 = vcmask 392192   ;;  %vm121_vm1 = vcmask 261120   ;;  %s267_s1 = inlined_call_operand.vmem [shape: f32[48,32], index: 1, kind: input, shape index: {}]   ;;  %s268_s0 = inlined_call_operand.vmem [shape: f32[64,48], index: 0, kind: input, shape index: {}]   ;;  %s269_s2 = inlined_call_operand.vmem [shape: f32[1,32], index: 2, kind: input, shape index: {}]   ;;  %s270_s3 = inlined_call_operand.vmem [shape: f32[64,32], index: 3, kind: output, shape index: {}]  }
   0x1   :  { %v27_v0 = vld [vmem:[%s267_s1] sm:$0xff]  ;;  %v28_v1 = vld [vmem:[%s267_s1 + $0x8] sm:$0xff]  ;;  %v29_v2 = vld [vmem:[%s267_s1 + $0x10] sm:$0xff] }
   0x2   :  { %v33_v3 = vpack.c.bf16 %v28_v1, %v27_v0  ;;  %v30_v4 = vld [vmem:[%s267_s1 + $0x18] sm:$0xff]  ;;  %v31_v5 = vld [vmem:[%s267_s1 + $0x20] sm:$0xff]  ;;  %v32_v6 = vld [vmem:[%s267_s1 + $0x28] sm:$0xff] }
   0x3   :  { %v34_v7 = vpack.c.bf16 %v30_v4, %v29_v2  ;;  %v15_v8 = vld [vmem:[%s268_s0] sm:$0xff]  ;;  %v16_v9 = vld [vmem:[%s268_s0 + $0x8] sm:$0xff]  ;;  %v35_v14 = vpack.c.bf16 %v32_v6, %v31_v5  ;;  %v17_v15 = vld [vmem:[%s268_s0 + $0x10] sm:$0xff] }
   0x4   :  { %v19_v10 = vld [vmem:[%s268_s0 + $0x20] sm:$0xff]  ;;  %146 = vmatprep.subr.bf16.mxu0 %v33_v3  ;;  %160 = vmatprep.subr.bf16.mxu1 %v33_v3  ;;  %v23_v11 = vpack.c.bf16 %v16_v9, %v15_v8  ;;  %v20_v12 = vld [vmem:[%s268_s0 + $0x28] sm:$0xff]  ;;  %v18_v16 = vld [vmem:[%s268_s0 + $0x18] sm:$0xff] }
   0x5   :  { %147 = vmatpush3.bf16.msra.mxu0 %v33_v3  ;;  %163 = vmatpush3.bf16.msra.mxu1 %v33_v3  ;;  %v25_v13 = vpack.c.bf16 %v20_v12, %v19_v10  ;;  %v21_v17 = vld [vmem:[%s268_s0 + $0x30] sm:$0xff]  ;;  %v22_v18 = vld [vmem:[%s268_s0 + $0x38] sm:$0xff]  ;;  %v24_v19 = vpack.c.bf16 %v18_v16, %v17_v15  ;;  %v134_v21 = vld [vmem:[%s269_s2] ss:$0 sm:$0xff] }
   0x6   :  { %148 = vmatprep.subr.bf16.mxu0 %v34_v7  ;;  %161 = vmatprep.subr.bf16.mxu1 %v34_v7  ;;  %v26_v20 = vpack.c.bf16 %v22_v18, %v21_v17 }
   0x7   :  { %152 = vmatprep.mubr.msk.bf16.mxu0 %vm43_vm0, %v23_v11  ;;  %156 = vmatprep.mubr.msk.bf16.mxu1 %vm43_vm0, %v25_v13 }
   0x9   :  { %149 = vmatpush3.bf16.msra.mxu0 %v34_v7  ;;  %164 = vmatpush3.bf16.msra.mxu1 %v34_v7 }
   0xa   :  { %150 = vmatprep.subr.bf16.mxu0 %v35_v14  ;;  %162 = vmatprep.subr.bf16.mxu1 %v35_v14 }
   0xd   :  { %151 = vmatpush3.bf16.msra.mxu0 %v35_v14  ;;  %165 = vmatpush3.bf16.msra.mxu1 %v35_v14 }
  0x10   :  { %153 = vmatmul.mubr.msk.bf16.vlgmr.msra.gmra.mrb[0].mxu0 %vm43_vm0, %v24_v19  ;;  %157 = vmatmul.mubr.msk.bf16.vlgmr.msra.gmra.mrb[0].mxu1 %vm43_vm0, %v26_v20 }
  0xe3   :  { %v154_v22 = vpop.f32.mrb[0].mxu0  ;;  %v158_v23 = vpop.f32.mrb[0].mxu1 }
  0xe4   :  { %v99_v24 = vadd.f32 %v154_v22, %v134_v21  ;;  %v115_v25 = vadd.f32 %v158_v23, %v134_v21  ;;  %v90_v26 = vpop.f32.mrb[1].mxu0  ;;  %v106_v27 = vpop.f32.mrb[1].mxu1 }
  0xe5   :  { %v91_v28 = vadd.f32 %v134_v21, %v90_v26  ;;  %v107_v29 = vadd.f32 %v134_v21, %v106_v27  ;;  %v155_v30 = vpop.f32.mrb[2].mxu0  ;;  %v159_v31 = vpop.f32.mrb[2].mxu1 }
  0xe6   :  { %124 = vst.msk [vmem:[%s270_s3 + $0x10] sm:$0xff] %vm121_vm1, %v99_v24  ;;  %128 = vst.msk [vmem:[%s270_s3 + $0x30] sm:$0xff] %vm121_vm1, %v115_v25  ;;  %v102_v32 = vadd.f32 %v155_v30, %v134_v21  ;;  %v118_v33 = vadd.f32 %v159_v31, %v134_v21  ;;  %v93_v34 = vpop.f32.mrb[3].mxu0  ;;  %v109_v35 = vpop.f32.mrb[3].mxu1 }
  0xe7   :  { %122 = vst.msk [vmem:[%s270_s3] sm:$0xff] %vm121_vm1, %v91_v28  ;;  %126 = vst.msk [vmem:[%s270_s3 + $0x20] sm:$0xff] %vm121_vm1, %v107_v29  ;;  %v94_v36 = vadd.f32 %v134_v21, %v93_v34  ;;  %v110_v37 = vadd.f32 %v134_v21, %v109_v35 }
  0xe8   :  { %125 = vst.msk [vmem:[%s270_s3 + $0x18] sm:$0xff] %vm121_vm1, %v102_v32  ;;  %129 = vst.msk [vmem:[%s270_s3 + $0x38] sm:$0xff] %vm121_vm1, %v118_v33 }
  0xe9   :  { %123 = vst.msk [vmem:[%s270_s3 + $0x8] sm:$0xff] %vm121_vm1, %v94_v36  ;;  %127 = vst.msk [vmem:[%s270_s3 + $0x28] sm:$0xff] %vm121_vm1, %v110_v37 }

// kernel: visual_transformer_forward.19
= control target key start
LH: loop header
LB: loop body
LE: loop exit
PB: predicated region body
PF: predicated region fallthrough
CT: control target
= control target key end

     0   :  { %vm23_vm0 = vcmask 261120   ;;  %vm48_vm1 = vcmask 257024   ;;  %s360_s0 = inlined_call_operand.vmem [shape: f32[68,32], index: 0, kind: input, shape index: {}]   ;;  %s361_s1 = inlined_call_operand.vmem [shape: f32[1,32], index: 1, kind: input, shape index: {}]   ;;  %s362_s2 = inlined_call_operand.vmem [shape: f32[1,32], index: 2, kind: input, shape index: {}]   ;;  %s363_s3 = inlined_call_operand.vmem [shape: f32[68,32], index: 3, kind: output, shape index: {}]  }
   0x1   :  { %v14_v0 = vld [vmem:[%s360_s0] sm:$0xff]  ;;  %v16_v1 = vld [vmem:[%s360_s0 + $0x10] sm:$0xff]  ;;  %v15_v2 = vld [vmem:[%s360_s0 + $0x8] sm:$0xff] }
   0x2   :  { %v24_v3 = vsel %vm23_vm0, %v14_v0, 0.0  ;;  %v30_v4 = vsel %vm23_vm0, %v16_v1, 0.0  ;;  %v17_v5 = vld [vmem:[%s360_s0 + $0x18] sm:$0xff]  ;;  %v27_v6 = vsel %vm23_vm0, %v15_v2, 0.0  ;;  %v18_v8 = vld [vmem:[%s360_s0 + $0x20] sm:$0xff]  ;;  %v19_v9 = vld [vmem:[%s360_s0 + $0x28] sm:$0xff] }
   0x3   :  { %25 = vadd.xlane.f32.xlu0 %v24_v3  ;;  %31 = vadd.xlane.f32.xlu1 %v30_v4  ;;  %v33_v7 = vsel %vm23_vm0, %v17_v5, 0.0  ;;  %v36_v10 = vsel %vm23_vm0, %v18_v8, 0.0  ;;  %v39_v11 = vsel %vm23_vm0, %v19_v9, 0.0  ;;  %v20_v12 = vld [vmem:[%s360_s0 + $0x30] sm:$0xff]  ;;  %v21_v13 = vld [vmem:[%s360_s0 + $0x38] sm:$0xff] }
   0x4   :  { %v42_v14 = vsel %vm23_vm0, %v20_v12, 0.0  ;;  %v45_v15 = vsel %vm23_vm0, %v21_v13, 0.0  ;;  %v22_v16 = vld [vmem:[%s360_s0 + $0x40] sm:$0xf] }
   0x5   :  { %v49_v17 = vsel %vm48_vm1, %v22_v16, 0.0 }
   0x7   :  { %28 = vadd.xlane.f32.xlu0 %v27_v6  ;;  %34 = vadd.xlane.f32.xlu1 %v33_v7 }
   0xb   :  { %37 = vadd.xlane.f32.xlu0 %v36_v10  ;;  %40 = vadd.xlane.f32.xlu1 %v39_v11 }
   0xf   :  { %43 = vadd.xlane.f32.xlu0 %v42_v14  ;;  %46 = vadd.xlane.f32.xlu1 %v45_v15 }
  0x13   :  { %50 = vadd.xlane.f32.xlu0 %v49_v17 }
  0x90   :  { %v26_v18 = vpop.xlane.xlu0 %25  ;;  %v32_v19 = vpop.xlane.xlu1 %31 }
  0x91   :  { %v53_v20 = vmul.f32 0.03125, %v26_v18  ;;  %v55_v21 = vmul.f32 0.03125, %v32_v19  ;;  %v188_v19 = vld [vmem:[%s361_s1] ss:$0 sm:$0xff] }
  0x93   :  { %v264_v22 = vsub.f32 %v14_v0, %v53_v20  ;;  %v266_v23 = vsub.f32 %v16_v1, %v55_v21 }
  0x94   :  { %v29_v24 = vpop.xlane.xlu0 %28  ;;  %v35_v25 = vpop.xlane.xlu1 %34 }
  0x95   :  { %v54_v26 = vmul.f32 0.03125, %v29_v24  ;;  %v56_v27 = vmul.f32 0.03125, %v35_v25  ;;  %v71_v28 = vmul.f32 %v264_v22, %v264_v22  ;;  %v73_v29 = vmul.f32 %v266_v23, %v266_v23 }
  0x97   :  { %v272_v30 = vsub.f32 %v15_v2, %v54_v26  ;;  %v274_v31 = vsub.f32 %v17_v5, %v56_v27  ;;  %v80_v32 = vsel %vm23_vm0, %v71_v28, 0.0  ;;  %v86_v35 = vsel %vm23_vm0, %v73_v29, 0.0  ;;  %v189_v27 = vld [vmem:[%s362_s2] ss:$0 sm:$0xff] }
  0x98   :  { %81 = vadd.xlane.f32.xlu1 %v80_v32  ;;  %v38_v33 = vpop.xlane.xlu0 %37  ;;  %v41_v34 = vpop.xlane.xlu1 %40 }
  0x99   :  { %v57_v36 = vmul.f32 0.03125, %v38_v33  ;;  %v58_v37 = vmul.f32 0.03125, %v41_v34  ;;  %v72_v38 = vmul.f32 %v272_v30, %v272_v30  ;;  %v74_v39 = vmul.f32 %v274_v31, %v274_v31 }
  0x9b   :  { %v282_v40 = vsub.f32 %v18_v8, %v57_v36  ;;  %v284_v41 = vsub.f32 %v19_v9, %v58_v37  ;;  %v83_v42 = vsel %vm23_vm0, %v72_v38, 0.0  ;;  %v89_v45 = vsel %vm23_vm0, %v74_v39, 0.0 }
  0x9c   :  { %87 = vadd.xlane.f32.xlu1 %v86_v35  ;;  %84 = vadd.xlane.f32.xlu0 %v83_v42  ;;  %v44_v43 = vpop.xlane.xlu0 %43  ;;  %v47_v44 = vpop.xlane.xlu1 %46 }
  0x9d   :  { %v59_v46 = vmul.f32 0.03125, %v44_v43  ;;  %v60_v47 = vmul.f32 0.03125, %v47_v44  ;;  %v75_v48 = vmul.f32 %v282_v40, %v282_v40  ;;  %v76_v49 = vmul.f32 %v284_v41, %v284_v41 }
  0x9f   :  { %v292_v50 = vsub.f32 %v20_v12, %v59_v46  ;;  %v294_v51 = vsub.f32 %v21_v13, %v60_v47  ;;  %v92_v52 = vsel %vm23_vm0, %v75_v48, 0.0  ;;  %v95_v55 = vsel %vm23_vm0, %v76_v49, 0.0 }
  0xa0   :  { %90 = vadd.xlane.f32.xlu0 %v89_v45  ;;  %93 = vadd.xlane.f32.xlu1 %v92_v52  ;;  %v51_v53 = vpop.xlane.xlu0 %50 }
  0xa1   :  { %v61_v54 = vmul.f32 0.03125, %v51_v53  ;;  %v77_v56 = vmul.f32 %v292_v50, %v292_v50  ;;  %v78_v57 = vmul.f32 %v294_v51, %v294_v51 }
  0xa3   :  { %v302_v58 = vsub.f32 %v22_v16, %v61_v54  ;;  %v98_v59 = vsel %vm23_vm0, %v77_v56, 0.0  ;;  %v101_v60 = vsel %vm23_vm0, %v78_v57, 0.0 }
  0xa4   :  { %96 = vadd.xlane.f32.xlu0 %v95_v55  ;;  %99 = vadd.xlane.f32.xlu1 %v98_v59 }
  0xa5   :  { %v79_v61 = vmul.f32 %v302_v58, %v302_v58 }
  0xa7   :  { %v104_v62 = vsel %vm48_vm1, %v79_v61, 0.0 }
  0xa8   :  { %102 = vadd.xlane.f32.xlu0 %v101_v60  ;;  %105 = vadd.xlane.f32.xlu1 %v104_v62 }
 0x125   :  { %v82_v63 = vpop.xlane.xlu1 %81 }
 0x126   :  { %v107_v0 = vmul.f32 0.03125, %v82_v63 }
 0x128   :  { %v116_v1 = vadd.f32 1e-05, %v107_v0 }
 0x129   :  { %v88_v2 = vpop.xlane.xlu1 %87  ;;  %v85_v3 = vpop.xlane.xlu0 %84 }
 0x12a   :  { %190 = vrsqrt.f32 %v116_v1  ;;  %v109_v4 = vmul.f32 0.03125, %v88_v2  ;;  %v108_v5 = vmul.f32 0.03125, %v85_v3 }
 0x12c   :  { %v118_v6 = vadd.f32 1e-05, %v109_v4  ;;  %v117_v7 = vadd.f32 1e-05, %v108_v5 }
 0x12d   :  { %v94_v8 = vpop.xlane.xlu1 %93  ;;  %v91_v9 = vpop.xlane.xlu0 %90 }
 0x12e   :  { %192 = vrsqrt.f32 %v118_v6  ;;  %v111_v10 = vmul.f32 0.03125, %v94_v8  ;;  %v110_v11 = vmul.f32 0.03125, %v91_v9 }
 0x12f   :  { %194 = vrsqrt.f32 %v117_v7 }
 0x130   :  { %v120_v12 = vadd.f32 1e-05, %v111_v10  ;;  %v119_v13 = vadd.f32 1e-05, %v110_v11 }
 0x131   :  { %v100_v14 = vpop.xlane.xlu1 %99  ;;  %v97_v15 = vpop.xlane.xlu0 %96 }
 0x132   :  { %196 = vrsqrt.f32 %v120_v12  ;;  %v113_v16 = vmul.f32 0.03125, %v100_v14  ;;  %v112_v17 = vmul.f32 0.03125, %v97_v15 }
 0x133   :  { %198 = vrsqrt.f32 %v119_v13 }
 0x134   :  { %v191_v18 = vpop.eup %190  ;;  %v122_v20 = vadd.f32 1e-05, %v113_v16  ;;  %v121_v21 = vadd.f32 1e-05, %v112_v17 }
 0x135   :  { %v134_v24 = vmul.f32 %v191_v18, %v264_v22  ;;  %v106_v25 = vpop.xlane.xlu1 %105  ;;  %v103_v26 = vpop.xlane.xlu0 %102 }
 0x136   :  { %200 = vrsqrt.f32 %v122_v20  ;;  %v115_v28 = vmul.f32 0.03125, %v106_v25  ;;  %v114_v29 = vmul.f32 0.03125, %v103_v26 }
 0x137   :  { %v150_v32 = vmul.f32 %v188_v19, %v134_v24  ;;  %202 = vrsqrt.f32 %v121_v21 }
 0x138   :  { %v193_v33 = vpop.eup %192  ;;  %v124_v34 = vadd.f32 1e-05, %v115_v28  ;;  %v123_v35 = vadd.f32 1e-05, %v114_v29 }
 0x139   :  { %v195_v36 = vpop.eup %194  ;;  %v166_v37 = vadd.f32 %v189_v27, %v150_v32  ;;  %v136_v38 = vmul.f32 %v193_v33, %v266_v23 }
 0x13a   :  { %v135_v22 = vmul.f32 %v195_v36, %v272_v30  ;;  %204 = vrsqrt.f32 %v124_v34 }
 0x13b   :  { %175 = vst.msk [vmem:[%s363_s3] sm:$0xff] %vm23_vm0, %v166_v37  ;;  %v152_v39 = vmul.f32 %v188_v19, %v136_v38  ;;  %206 = vrsqrt.f32 %v123_v35 }
 0x13c   :  { %v197_v42 = vpop.eup %196  ;;  %v151_v43 = vmul.f32 %v188_v19, %v135_v22 }
 0x13d   :  { %v199_v44 = vpop.eup %198  ;;  %v168_v45 = vadd.f32 %v189_v27, %v152_v39  ;;  %v138_v46 = vmul.f32 %v197_v42, %v282_v40 }
 0x13e   :  { %v167_v47 = vadd.f32 %v189_v27, %v151_v43  ;;  %v137_v48 = vmul.f32 %v199_v44, %v274_v31 }
 0x13f   :  { %177 = vst.msk [vmem:[%s363_s3 + $0x10] sm:$0xff] %vm23_vm0, %v168_v45  ;;  %v154_v23 = vmul.f32 %v188_v19, %v138_v46 }
 0x140   :  { %v201_v30 = vpop.eup %200  ;;  %176 = vst.msk [vmem:[%s363_s3 + $0x8] sm:$0xff] %vm23_vm0, %v167_v47  ;;  %v153_v49 = vmul.f32 %v188_v19, %v137_v48 }
 0x141   :  { %v203_v52 = vpop.eup %202  ;;  %v170_v53 = vadd.f32 %v189_v27, %v154_v23  ;;  %v140_v40 = vmul.f32 %v201_v30, %v292_v50 }
 0x142   :  { %v169_v54 = vadd.f32 %v189_v27, %v153_v49  ;;  %v139_v31 = vmul.f32 %v203_v52, %v284_v41 }
 0x143   :  { %179 = vst.msk [vmem:[%s363_s3 + $0x20] sm:$0xff] %vm23_vm0, %v170_v53  ;;  %v156_v55 = vmul.f32 %v188_v19, %v140_v40 }
 0x144   :  { %v205_v56 = vpop.eup %204  ;;  %178 = vst.msk [vmem:[%s363_s3 + $0x18] sm:$0xff] %vm23_vm0, %v169_v54  ;;  %v155_v57 = vmul.f32 %v188_v19, %v139_v31 }
 0x145   :  { %v207_v59 = vpop.eup %206  ;;  %v172_v60 = vadd.f32 %v189_v27, %v156_v55  ;;  %v142_v50 = vmul.f32 %v205_v56, %v302_v58 }
 0x146   :  { %v171_v61 = vadd.f32 %v189_v27, %v155_v57  ;;  %v141_v41 = vmul.f32 %v207_v59, %v294_v51 }
 0x147   :  { %181 = vst.msk [vmem:[%s363_s3 + $0x30] sm:$0xff] %vm23_vm0, %v172_v60  ;;  %v158_v62 = vmul.f32 %v188_v19, %v142_v50 }
 0x148   :  { %180 = vst.msk [vmem:[%s363_s3 + $0x28] sm:$0xff] %vm23_vm0, %v171_v61  ;;  %v157_v63 = vmul.f32 %v188_v19, %v141_v41 }
 0x149   :  { %v174_v0 = vadd.f32 %v189_v27, %v158_v62 }
 0x14a   :  { %v173_v1 = vadd.f32 %v189_v27, %v157_v63 }
 0x14b   :  { %183 = vst.msk [vmem:[%s363_s3 + $0x40] sm:$0xf] %vm48_vm1, %v174_v0 }
 0x14c   :  { %182 = vst.msk [vmem:[%s363_s3 + $0x38] sm:$0xff] %vm23_vm0, %v173_v1 }

// kernel: visual_transformer_forward.20
= control target key start
LH: loop header
LB: loop body
LE: loop exit
PB: predicated region body
PF: predicated region fallthrough
CT: control target
= control target key end

     0   :  { %vm23_vm0 = vcmask 261120   ;;  %s359_s0 = inlined_call_operand.vmem [shape: f32[72,32], index: 0, kind: input, shape index: {}]   ;;  %s360_s1 = inlined_call_operand.vmem [shape: f32[1,32], index: 1, kind: input, shape index: {}]   ;;  %s361_s2 = inlined_call_operand.vmem [shape: f32[1,32], index: 2, kind: input, shape index: {}]   ;;  %s362_s3 = inlined_call_operand.vmem [shape: f32[72,32], index: 3, kind: output, shape index: {}]  }
   0x1   :  { %v14_v0 = vld [vmem:[%s359_s0] sm:$0xff]  ;;  %v16_v1 = vld [vmem:[%s359_s0 + $0x10] sm:$0xff]  ;;  %v15_v2 = vld [vmem:[%s359_s0 + $0x8] sm:$0xff] }
   0x2   :  { %v24_v3 = vsel %vm23_vm0, %v14_v0, 0.0  ;;  %v30_v4 = vsel %vm23_vm0, %v16_v1, 0.0  ;;  %v17_v5 = vld [vmem:[%s359_s0 + $0x18] sm:$0xff]  ;;  %v27_v6 = vsel %vm23_vm0, %v15_v2, 0.0  ;;  %v18_v8 = vld [vmem:[%s359_s0 + $0x20] sm:$0xff]  ;;  %v19_v9 = vld [vmem:[%s359_s0 + $0x28] sm:$0xff] }
   0x3   :  { %25 = vadd.xlane.f32.xlu0 %v24_v3  ;;  %31 = vadd.xlane.f32.xlu1 %v30_v4  ;;  %v33_v7 = vsel %vm23_vm0, %v17_v5, 0.0  ;;  %v36_v10 = vsel %vm23_vm0, %v18_v8, 0.0  ;;  %v39_v11 = vsel %vm23_vm0, %v19_v9, 0.0  ;;  %v20_v12 = vld [vmem:[%s359_s0 + $0x30] sm:$0xff]  ;;  %v21_v13 = vld [vmem:[%s359_s0 + $0x38] sm:$0xff]  ;;  %v22_v16 = vld [vmem:[%s359_s0 + $0x40] sm:$0xff] }
   0x4   :  { %v42_v14 = vsel %vm23_vm0, %v20_v12, 0.0  ;;  %v45_v15 = vsel %vm23_vm0, %v21_v13, 0.0  ;;  %v48_v17 = vsel %vm23_vm0, %v22_v16, 0.0 }
   0x7   :  { %28 = vadd.xlane.f32.xlu0 %v27_v6  ;;  %34 = vadd.xlane.f32.xlu1 %v33_v7 }
   0xb   :  { %37 = vadd.xlane.f32.xlu0 %v36_v10  ;;  %40 = vadd.xlane.f32.xlu1 %v39_v11 }
   0xf   :  { %43 = vadd.xlane.f32.xlu0 %v42_v14  ;;  %46 = vadd.xlane.f32.xlu1 %v45_v15 }
  0x13   :  { %49 = vadd.xlane.f32.xlu0 %v48_v17 }
  0x90   :  { %v26_v18 = vpop.xlane.xlu0 %25  ;;  %v32_v19 = vpop.xlane.xlu1 %31 }
  0x91   :  { %v52_v20 = vmul.f32 0.03125, %v26_v18  ;;  %v54_v21 = vmul.f32 0.03125, %v32_v19  ;;  %v187_v19 = vld [vmem:[%s360_s1] ss:$0 sm:$0xff] }
  0x93   :  { %v263_v22 = vsub.f32 %v14_v0, %v52_v20  ;;  %v265_v23 = vsub.f32 %v16_v1, %v54_v21 }
  0x94   :  { %v29_v24 = vpop.xlane.xlu0 %28  ;;  %v35_v25 = vpop.xlane.xlu1 %34 }
  0x95   :  { %v53_v26 = vmul.f32 0.03125, %v29_v24  ;;  %v55_v27 = vmul.f32 0.03125, %v35_v25  ;;  %v70_v28 = vmul.f32 %v263_v22, %v263_v22  ;;  %v72_v29 = vmul.f32 %v265_v23, %v265_v23 }
  0x97   :  { %v271_v30 = vsub.f32 %v15_v2, %v53_v26  ;;  %v273_v31 = vsub.f32 %v17_v5, %v55_v27  ;;  %v79_v32 = vsel %vm23_vm0, %v70_v28, 0.0  ;;  %v85_v35 = vsel %vm23_vm0, %v72_v29, 0.0  ;;  %v188_v27 = vld [vmem:[%s361_s2] ss:$0 sm:$0xff] }
  0x98   :  { %80 = vadd.xlane.f32.xlu1 %v79_v32  ;;  %v38_v33 = vpop.xlane.xlu0 %37  ;;  %v41_v34 = vpop.xlane.xlu1 %40 }
  0x99   :  { %v56_v36 = vmul.f32 0.03125, %v38_v33  ;;  %v57_v37 = vmul.f32 0.03125, %v41_v34  ;;  %v71_v38 = vmul.f32 %v271_v30, %v271_v30  ;;  %v73_v39 = vmul.f32 %v273_v31, %v273_v31 }
  0x9b   :  { %v281_v40 = vsub.f32 %v18_v8, %v56_v36  ;;  %v283_v41 = vsub.f32 %v19_v9, %v57_v37  ;;  %v82_v42 = vsel %vm23_vm0, %v71_v38, 0.0  ;;  %v88_v45 = vsel %vm23_vm0, %v73_v39, 0.0 }
  0x9c   :  { %86 = vadd.xlane.f32.xlu1 %v85_v35  ;;  %83 = vadd.xlane.f32.xlu0 %v82_v42  ;;  %v44_v43 = vpop.xlane.xlu0 %43  ;;  %v47_v44 = vpop.xlane.xlu1 %46 }
  0x9d   :  { %v58_v46 = vmul.f32 0.03125, %v44_v43  ;;  %v59_v47 = vmul.f32 0.03125, %v47_v44  ;;  %v74_v48 = vmul.f32 %v281_v40, %v281_v40  ;;  %v75_v49 = vmul.f32 %v283_v41, %v283_v41 }
  0x9f   :  { %v291_v50 = vsub.f32 %v20_v12, %v58_v46  ;;  %v293_v51 = vsub.f32 %v21_v13, %v59_v47  ;;  %v91_v52 = vsel %vm23_vm0, %v74_v48, 0.0  ;;  %v94_v55 = vsel %vm23_vm0, %v75_v49, 0.0 }
  0xa0   :  { %89 = vadd.xlane.f32.xlu0 %v88_v45  ;;  %92 = vadd.xlane.f32.xlu1 %v91_v52  ;;  %v50_v53 = vpop.xlane.xlu0 %49 }
  0xa1   :  { %v60_v54 = vmul.f32 0.03125, %v50_v53  ;;  %v76_v56 = vmul.f32 %v291_v50, %v291_v50  ;;  %v77_v57 = vmul.f32 %v293_v51, %v293_v51 }
  0xa3   :  { %v301_v58 = vsub.f32 %v22_v16, %v60_v54  ;;  %v97_v59 = vsel %vm23_vm0, %v76_v56, 0.0  ;;  %v100_v60 = vsel %vm23_vm0, %v77_v57, 0.0 }
  0xa4   :  { %95 = vadd.xlane.f32.xlu0 %v94_v55  ;;  %98 = vadd.xlane.f32.xlu1 %v97_v59 }
  0xa5   :  { %v78_v61 = vmul.f32 %v301_v58, %v301_v58 }
  0xa7   :  { %v103_v62 = vsel %vm23_vm0, %v78_v61, 0.0 }
  0xa8   :  { %101 = vadd.xlane.f32.xlu0 %v100_v60  ;;  %104 = vadd.xlane.f32.xlu1 %v103_v62 }
 0x125   :  { %v81_v63 = vpop.xlane.xlu1 %80 }
 0x126   :  { %v106_v0 = vmul.f32 0.03125, %v81_v63 }
 0x128   :  { %v115_v1 = vadd.f32 1e-05, %v106_v0 }
 0x129   :  { %v87_v2 = vpop.xlane.xlu1 %86  ;;  %v84_v3 = vpop.xlane.xlu0 %83 }
 0x12a   :  { %189 = vrsqrt.f32 %v115_v1  ;;  %v108_v4 = vmul.f32 0.03125, %v87_v2  ;;  %v107_v5 = vmul.f32 0.03125, %v84_v3 }
 0x12c   :  { %v117_v6 = vadd.f32 1e-05, %v108_v4  ;;  %v116_v7 = vadd.f32 1e-05, %v107_v5 }
 0x12d   :  { %v93_v8 = vpop.xlane.xlu1 %92  ;;  %v90_v9 = vpop.xlane.xlu0 %89 }
 0x12e   :  { %191 = vrsqrt.f32 %v117_v6  ;;  %v110_v10 = vmul.f32 0.03125, %v93_v8  ;;  %v109_v11 = vmul.f32 0.03125, %v90_v9 }
 0x12f   :  { %193 = vrsqrt.f32 %v116_v7 }
 0x130   :  { %v119_v12 = vadd.f32 1e-05, %v110_v10  ;;  %v118_v13 = vadd.f32 1e-05, %v109_v11 }
 0x131   :  { %v99_v14 = vpop.xlane.xlu1 %98  ;;  %v96_v15 = vpop.xlane.xlu0 %95 }
 0x132   :  { %195 = vrsqrt.f32 %v119_v12  ;;  %v112_v16 = vmul.f32 0.03125, %v99_v14  ;;  %v111_v17 = vmul.f32 0.03125, %v96_v15 }
 0x133   :  { %197 = vrsqrt.f32 %v118_v13 }
 0x134   :  { %v190_v18 = vpop.eup %189  ;;  %v121_v20 = vadd.f32 1e-05, %v112_v16  ;;  %v120_v21 = vadd.f32 1e-05, %v111_v17 }
 0x135   :  { %v133_v24 = vmul.f32 %v190_v18, %v263_v22  ;;  %v105_v25 = vpop.xlane.xlu1 %104  ;;  %v102_v26 = vpop.xlane.xlu0 %101 }
 0x136   :  { %199 = vrsqrt.f32 %v121_v20  ;;  %v114_v28 = vmul.f32 0.03125, %v105_v25  ;;  %v113_v29 = vmul.f32 0.03125, %v102_v26 }
 0x137   :  { %v149_v32 = vmul.f32 %v187_v19, %v133_v24  ;;  %201 = vrsqrt.f32 %v120_v21 }
 0x138   :  { %v192_v33 = vpop.eup %191  ;;  %v123_v34 = vadd.f32 1e-05, %v114_v28  ;;  %v122_v35 = vadd.f32 1e-05, %v113_v29 }
 0x139   :  { %v194_v36 = vpop.eup %193  ;;  %v165_v37 = vadd.f32 %v188_v27, %v149_v32  ;;  %v135_v38 = vmul.f32 %v192_v33, %v265_v23 }
 0x13a   :  { %v134_v22 = vmul.f32 %v194_v36, %v271_v30  ;;  %203 = vrsqrt.f32 %v123_v34 }
 0x13b   :  { %174 = vst.msk [vmem:[%s362_s3] sm:$0xff] %vm23_vm0, %v165_v37  ;;  %v151_v39 = vmul.f32 %v187_v19, %v135_v38  ;;  %205 = vrsqrt.f32 %v122_v35 }
 0x13c   :  { %v196_v42 = vpop.eup %195  ;;  %v150_v43 = vmul.f32 %v187_v19, %v134_v22 }
 0x13d   :  { %v198_v44 = vpop.eup %197  ;;  %v167_v45 = vadd.f32 %v188_v27, %v151_v39  ;;  %v137_v46 = vmul.f32 %v196_v42, %v281_v40 }
 0x13e   :  { %v166_v47 = vadd.f32 %v188_v27, %v150_v43  ;;  %v136_v48 = vmul.f32 %v198_v44, %v273_v31 }
 0x13f   :  { %176 = vst.msk [vmem:[%s362_s3 + $0x10] sm:$0xff] %vm23_vm0, %v167_v45  ;;  %v153_v23 = vmul.f32 %v187_v19, %v137_v46 }
 0x140   :  { %v200_v30 = vpop.eup %199  ;;  %175 = vst.msk [vmem:[%s362_s3 + $0x8] sm:$0xff] %vm23_vm0, %v166_v47  ;;  %v152_v49 = vmul.f32 %v187_v19, %v136_v48 }
 0x141   :  { %v202_v52 = vpop.eup %201  ;;  %v169_v53 = vadd.f32 %v188_v27, %v153_v23  ;;  %v139_v40 = vmul.f32 %v200_v30, %v291_v50 }
 0x142   :  { %v168_v54 = vadd.f32 %v188_v27, %v152_v49  ;;  %v138_v31 = vmul.f32 %v202_v52, %v283_v41 }
 0x143   :  { %178 = vst.msk [vmem:[%s362_s3 + $0x20] sm:$0xff] %vm23_vm0, %v169_v53  ;;  %v155_v55 = vmul.f32 %v187_v19, %v139_v40 }
 0x144   :  { %v204_v56 = vpop.eup %203  ;;  %177 = vst.msk [vmem:[%s362_s3 + $0x18] sm:$0xff] %vm23_vm0, %v168_v54  ;;  %v154_v57 = vmul.f32 %v187_v19, %v138_v31 }
 0x145   :  { %v206_v59 = vpop.eup %205  ;;  %v171_v60 = vadd.f32 %v188_v27, %v155_v55  ;;  %v141_v50 = vmul.f32 %v204_v56, %v301_v58 }
 0x146   :  { %v170_v61 = vadd.f32 %v188_v27, %v154_v57  ;;  %v140_v41 = vmul.f32 %v206_v59, %v293_v51 }
 0x147   :  { %180 = vst.msk [vmem:[%s362_s3 + $0x30] sm:$0xff] %vm23_vm0, %v171_v60  ;;  %v157_v62 = vmul.f32 %v187_v19, %v141_v50 }
 0x148   :  { %179 = vst.msk [vmem:[%s362_s3 + $0x28] sm:$0xff] %vm23_vm0, %v170_v61  ;;  %v156_v63 = vmul.f32 %v187_v19, %v140_v41 }
 0x149   :  { %v173_v0 = vadd.f32 %v188_v27, %v157_v62 }
 0x14a   :  { %v172_v1 = vadd.f32 %v188_v27, %v156_v63 }
 0x14b   :  { %182 = vst.msk [vmem:[%s362_s3 + $0x40] sm:$0xff] %vm23_vm0, %v173_v0 }
 0x14c   :  { %181 = vst.msk [vmem:[%s362_s3 + $0x38] sm:$0xff] %vm23_vm0, %v172_v1 }

// kernel: visual_transformer_forward.23
= control target key start
LH: loop header
LB: loop body
LE: loop exit
PB: predicated region body
PF: predicated region fallthrough
CT: control target
= control target key end

     0   :  { %v95_v0 = vmov 0.0   ;;  %vm96_vm0 = vmmov 0   ;;  %vm30_vm1 = vcmask 261120   ;;  %vm74_vm2 = vcmask 257024   ;;  %s138_s1 = inlined_call_operand.vmem [shape: f32[32,32], index: 1, kind: input, shape index: {}]   ;;  %s139_s0 = inlined_call_operand.vmem [shape: f32[4,32], index: 0, kind: input, shape index: {}]   ;;  %s140_s2 = inlined_call_operand.vmem [shape: f32[1,32], index: 2, kind: input, shape index: {}]   ;;  %s141_s3 = inlined_call_operand.vmem [shape: f32[4,32], index: 3, kind: output, shape index: {}]  }
   0x1   :  { %85 = vmatprep.subr.bf16.mxu0 %v95_v0  ;;  %v17_v1 = vld [vmem:[%s138_s1] sm:$0xff]  ;;  %v18_v2 = vld [vmem:[%s138_s1 + $0x8] sm:$0xff]  ;;  %v19_v3 = vld [vmem:[%s138_s1 + $0x10] sm:$0xff]  ;;  %89 = vmatprep.mubr.msk.bf16.mxu0 %vm96_vm0, %v95_v0 }
   0x2   :  { %v21_v4 = vpack.c.bf16 %v18_v2, %v17_v1  ;;  %v20_v5 = vld [vmem:[%s138_s1 + $0x18] sm:$0xff]  ;;  %v15_v7 = vld [vmem:[%s139_s0] sm:$0xf] }
   0x3   :  { %v22_v6 = vpack.c.bf16 %v20_v5, %v19_v3  ;;  %v16_v8 = vpack.c.bf16 %v15_v7, %v15_v7  ;;  %v80_v9 = vld [vmem:[%s140_s2] ss:$0 sm:$0xff] }
   0x4   :  { %86 = vmatpush3.bf16.msra.mxu0 %v21_v4 }
   0x5   :  { %87 = vmatprep.subr.bf16.mxu0 %v95_v0 }
   0x8   :  { %88 = vmatpush3.bf16.msra.mxu0 %v22_v6 }
   0xb   :  { %90 = vmatmul.mubr.msk.bf16.vlgmr.msra.gmra.mrb[0].mxu0 %vm30_vm1, %v16_v8 }
  0xde   :  { %v68_v10 = vpop.f32.mrb[0].mxu0 }
  0xdf   :  { %v69_v11 = vadd.f32 %v80_v9, %v68_v10  ;;  %v91_v12 = vpop.f32.mrb[1].mxu0 }
  0xe0   :  { %v71_v13 = vpop.f32.mrb[2].mxu0 }
  0xe1   :  { %75 = vst.msk [vmem:[%s141_s3] sm:$0xf] %vm74_vm2, %v69_v11  ;;  %v92_v14 = vpop.f32.mrb[3].mxu0 }

// kernel: visual_transformer_forward.24
= control target key start
LH: loop header
LB: loop body
LE: loop exit
PB: predicated region body
PF: predicated region fallthrough
CT: control target
= control target key end

     0   :  { %v187_v0 = vmov 0.0   ;;  %vm188_vm0 = vmmov 0   ;;  %vm42_vm1 = vcmask 261120   ;;  %vm130_vm2 = vcmask 523264   ;;  %s297_s1 = inlined_call_operand.vmem [shape: f32[32,64], index: 1, kind: input, shape index: {}]   ;;  %s298_s0 = inlined_call_operand.vmem [shape: f32[72,32], index: 0, kind: input, shape index: {}]   ;;  %s299_s2 = inlined_call_operand.vmem [shape: f32[1,64], index: 2, kind: input, shape index: {}]   ;;  %s300_s3 = inlined_call_operand.vmem [shape: f32[72,64], index: 3, kind: output, shape index: {}]  }
   0x1   :  { %157 = vmatprep.subr.bf16.mxu0 %v187_v0  ;;  %v29_v1 = vld [vmem:[%s297_s1] sm:$0xff]  ;;  %v30_v2 = vld [vmem:[%s297_s1 + $0x8] sm:$0xff]  ;;  %v31_v3 = vld [vmem:[%s297_s1 + $0x10] sm:$0xff]  ;;  %181 = vmatprep.subr.bf16.mxu1 %v187_v0 }
   0x2   :  { %v33_v4 = vpack.c.bf16 %v30_v2, %v29_v1  ;;  %v32_v5 = vld [vmem:[%s297_s1 + $0x18] sm:$0xff]  ;;  %161 = vmatprep.mubr.msk.bf16.mxu0 %vm188_vm0, %v187_v0  ;;  %173 = vmatprep.mubr.msk.bf16.mxu1 %vm188_vm0, %v187_v0  ;;  %v15_v6 = vld [vmem:[%s298_s0] sm:$0xff]  ;;  %v16_v8 = vld [vmem:[%s298_s0 + $0x8] sm:$0xff] }
   0x3   :  { %v34_v7 = vpack.c.bf16 %v32_v5, %v31_v3  ;;  %v21_v9 = vld [vmem:[%s298_s0 + $0x30] sm:$0xff]  ;;  %v22_v10 = vld [vmem:[%s298_s0 + $0x38] sm:$0xff]  ;;  %v24_v11 = vpack.c.bf16 %v16_v8, %v15_v6  ;;  %v23_v15 = vld [vmem:[%s298_s0 + $0x40] sm:$0xff] }
   0x4   :  { %158 = vmatpush3.bf16.msra.mxu0 %v33_v4  ;;  %183 = vmatpush3.bf16.msra.mxu1 %v33_v4  ;;  %v27_v12 = vpack.c.bf16 %v22_v10, %v21_v9  ;;  %v17_v13 = vld [vmem:[%s298_s0 + $0x10] sm:$0xff]  ;;  %v18_v14 = vld [vmem:[%s298_s0 + $0x18] sm:$0xff]  ;;  %v28_v17 = vpack.c.bf16 %v23_v15, %v23_v15  ;;  %v19_v18 = vld [vmem:[%s298_s0 + $0x20] sm:$0xff] }
   0x5   :  { %159 = vmatprep.subr.bf16.mxu0 %v187_v0  ;;  %182 = vmatprep.subr.bf16.mxu1 %v187_v0  ;;  %v25_v16 = vpack.c.bf16 %v18_v14, %v17_v13  ;;  %v20_v19 = vld [vmem:[%s298_s0 + $0x28] sm:$0xff]  ;;  %v144_v21 = vld [vmem:[%s299_s2] ss:$0 sm:$0xff] }
   0x6   :  { %v26_v20 = vpack.c.bf16 %v20_v19, %v19_v18 }
   0x8   :  { %160 = vmatpush3.bf16.msra.mxu0 %v34_v7  ;;  %184 = vmatpush3.bf16.msra.mxu1 %v34_v7 }
   0xb   :  { %162 = vmatmul.mubr.msk.bf16.vlgmr.msra.gmra.mrb[0].mxu0 %vm42_vm1, %v24_v11  ;;  %174 = vmatmul.mubr.msk.bf16.vlgmr.msra.gmra.mrb[0].mxu1 %vm42_vm1, %v27_v12 }
   0xc   :  { %165 = vmatprep.mubr.msk.bf16.mxu0 %vm188_vm0, %v187_v0  ;;  %177 = vmatprep.mubr.msk.bf16.mxu1 %vm188_vm0, %v187_v0 }
  0x13   :  { %166 = vmatmul.mubr.msk.bf16.gmra.mrb[4].mxu0 %vm42_vm1, %v25_v16  ;;  %178 = vmatmul.mubr.msk.bf16.gmra.mrb[4].mxu1 %vm42_vm1, %v28_v17 }
  0x14   :  { %169 = vmatprep.mubr.msk.bf16.mxu0 %vm188_vm0, %v187_v0 }
  0x1b   :  { %170 = vmatmul.mubr.msk.bf16.gmra.mrb[8].mxu0 %vm42_vm1, %v26_v20 }
  0xde   :  { %v92_v22 = vpop.f32.mrb[0].mxu0  ;;  %v116_v23 = vpop.f32.mrb[0].mxu1 }
  0xdf   :  { %v93_v24 = vadd.f32 %v144_v21, %v92_v22  ;;  %v163_v25 = vpop.f32.mrb[1].mxu0  ;;  %v117_v26 = vadd.f32 %v144_v21, %v116_v23  ;;  %v175_v27 = vpop.f32.mrb[1].mxu1 }
  0xe0   :  { %v95_v28 = vpop.f32.mrb[2].mxu0  ;;  %v119_v29 = vpop.f32.mrb[2].mxu1 }
  0xe1   :  { %131 = vst.msk [vmem:[%s300_s3] sm:$0xff] %vm130_vm2, %v93_v24  ;;  %v96_v30 = vadd.f32 %v144_v21, %v95_v28  ;;  %v164_v31 = vpop.f32.mrb[3].mxu0  ;;  %137 = vst.msk [vmem:[%s300_s3 + $0x30] sm:$0xff] %vm130_vm2, %v117_v26  ;;  %v120_v32 = vadd.f32 %v144_v21, %v119_v29  ;;  %v176_v33 = vpop.f32.mrb[3].mxu1 }
  0xe3   :  { %132 = vst.msk [vmem:[%s300_s3 + $0x8] sm:$0xff] %vm130_vm2, %v96_v30  ;;  %138 = vst.msk [vmem:[%s300_s3 + $0x38] sm:$0xff] %vm130_vm2, %v120_v32 }
  0xe6   :  { %v100_v34 = vpop.f32.mrb[4].mxu0  ;;  %v124_v35 = vpop.f32.mrb[4].mxu1 }
  0xe7   :  { %v101_v36 = vadd.f32 %v144_v21, %v100_v34  ;;  %v167_v37 = vpop.f32.mrb[5].mxu0  ;;  %v125_v38 = vadd.f32 %v144_v21, %v124_v35  ;;  %v179_v39 = vpop.f32.mrb[5].mxu1 }
  0xe8   :  { %v103_v40 = vpop.f32.mrb[6].mxu0  ;;  %v127_v41 = vpop.f32.mrb[6].mxu1 }
  0xe9   :  { %133 = vst.msk [vmem:[%s300_s3 + $0x10] sm:$0xff] %vm130_vm2, %v101_v36  ;;  %v104_v42 = vadd.f32 %v144_v21, %v103_v40  ;;  %v168_v43 = vpop.f32.mrb[7].mxu0  ;;  %139 = vst.msk [vmem:[%s300_s3 + $0x40] sm:$0xff] %vm130_vm2, %v125_v38  ;;  %v180_v44 = vpop.f32.mrb[7].mxu1 }
  0xeb   :  { %134 = vst.msk [vmem:[%s300_s3 + $0x18] sm:$0xff] %vm130_vm2, %v104_v42 }
  0xee   :  { %v108_v45 = vpop.f32.mrb[8].mxu0 }
  0xef   :  { %v109_v46 = vadd.f32 %v144_v21, %v108_v45  ;;  %v171_v47 = vpop.f32.mrb[9].mxu0 }
  0xf0   :  { %v111_v48 = vpop.f32.mrb[10].mxu0 }
  0xf1   :  { %135 = vst.msk [vmem:[%s300_s3 + $0x20] sm:$0xff] %vm130_vm2, %v109_v46  ;;  %v112_v49 = vadd.f32 %v144_v21, %v111_v48  ;;  %v172_v50 = vpop.f32.mrb[11].mxu0 }
  0xf3   :  { %136 = vst.msk [vmem:[%s300_s3 + $0x28] sm:$0xff] %vm130_vm2, %v112_v49 }

// kernel: visual_transformer_forward.25
= control target key start
LH: loop header
LB: loop body
LE: loop exit
PB: predicated region body
PF: predicated region fallthrough
CT: control target
= control target key end

     0   :  { %12 = vsyncpa [#allocation3], 0  ;;  %s1635_s0 = inlined_call_operand.vmem [shape: f32[2,2,32], index: 0, kind: input, shape index: {}]   ;;  %s1636_s1 = inlined_call_operand.vmem [shape: f32[2,36,32], index: 1, kind: input, shape index: {}]   ;;  %s1637_s2 = inlined_call_operand.vmem [shape: f32[2,36,32], index: 2, kind: input, shape index: {}]   ;;  %s1638_s3 = inlined_call_operand.vmem [shape: f32[32,32], index: 3, kind: input, shape index: {}]   ;;  %s1639_s4 = inlined_call_operand.vmem [shape: f32[1,32], index: 4, kind: input, shape index: {}]   ;;  %s1640_s5 = inlined_call_operand.vmem [shape: f32[2,2,32], index: 5, kind: output, shape index: {0}]   ;;  %s1641_s6 = inlined_call_operand.hbm [shape: f32[2,2,36], index: 6, kind: output, shape index: {1}]  }
   0x1   :  { %14 = vsyncpa [#allocation3 + $0x1], 0  ;;  %s1350_s21 = smov 0   ;;  %s1352_s22 = smov 0  }
   0x2   :  { %s1354_s23 = smov 0   ;;  %s1356_s24 = smov 0  }
   0x3 LB: > { %s1371_s25 = sadd.s32 4294967295, %s1304_s24   ;;  %s1032_s26 = sadd.s32 4294967294, %s1304_s24   ;;  %s1304_s24 = sphi %s1356_s24, %s1647_s24   ;;  %s1300_s23 = sphi %s1354_s23, %s1646_s23   ;;  %s1296_s22 = sphi %s1352_s22, %s1645_s22   ;;  %s1292_s21 = sphi %s1350_s21, %s1644_s21  }
   0x4   : > { %s1375_s27 = sadd.s32 1, %s1304_s24   ;;  %s173_s28 = sadd.s32 1, %s1300_s23 }
   0x5   : > { %s170_s29 = ssub.s32 %s1304_s24, %s1375_s27  ;;  %p183_p0 = scmp.ne.s32.totalorder %s1300_s23, %s1296_s22 }
   0x6   : > { %p171_p1 = scmp.eq.s32.totalorder %s170_s29, 0  ;;  %p184_p2 = scmp.eq.s32.totalorder %s1371_s25, 1 }
   0x7   : > { %p189_p3 = scmp.ne.s32.totalorder %s1296_s22, %s1292_s21  ;;  %p190_p4 = scmp.eq.s32.totalorder %s1032_s26, 1 }
   0x8   : > { %s1386_s30 = scalar_select %p171_p1, %s1300_s23, %s173_s28  }
   0x9   : > { %p1388_p5 = por %p184_p2, %p183_p0  ;;  %p1392_p6 = por %p190_p4, %p189_p3 }
   0xa   : > { %p1035_p7 = scmp.ge.s32.totalorder %s1304_s24, 1  ;;  %p237_p8 = scmp.lt.s32.totalorder %s1304_s24, 3 }
   0xc   : > { %p238_p9 = pnand %p1035_p7, %p237_p8 }
   0xd   : > { %p280_p10 = scmp.lt.s32.totalorder (!%p238_p9), %s1371_s25, 1  ;;  %v1306_v0 = vmov (!%p238_p9), 0.0   ;;  %vm1307_vm0 = vmmov (!%p238_p9), 0   ;;  %vm318_vm1 = vcmask (!%p238_p9), 64512   ;;  %s1308_s18 = smov (!%p238_p9), 120   ;;  %vm371_vm2 = vcmask (!%p238_p9), 287744  }
   0xe   : > { %241 = sbr.rel (%p238_p9) target bundleno = 2160 (0x870), region = 40  ;;  %1090 = vmatprep.subr.bf16.mxu0 (!%p238_p9), %v1306_v0  ;;  %1096 = vmatprep.mubr.msk.bf16.mxu0 (!%p238_p9), %vm1307_vm0, %v1306_v0  ;;  %vm387_vm3 = vcmask (!%p238_p9), 1041408   ;;  %vm383_vm4 = vcmask (!%p238_p9), 293888   ;;  %s1309_s28 = smov (!%p238_p9), 112   ;;  %vm838_vm5 = vcmask (!%p238_p9), 130048   ;;  %vm840_vm6 = vcmask (!%p238_p9), 195584  }
   0xf   : > { %1100 = vmatprep.subr.bf16.mxu1 (!%p238_p9), %v1306_v0  ;;  %1106 = vmatprep.mubr.msk.bf16.mxu1 (!%p238_p9), %vm1307_vm0, %v1306_v0  ;;  %s1310_s29 = smov (!%p238_p9), 104   ;;  %s1312_s11 = smov (!%p238_p9), 8   ;;  %vm856_vm7 = vcmask (!%p238_p9), 261120  }
  0x10   : > { %s1314_s19 = smov (!%p238_p9), [#allocation2]  }
  0x11   : > { %s1246_s20 = sshll.u32 (!%p238_p9), %s1314_s19, 4  ;;  %s1247_s20 = int_to_ptr.vmem [resolvable:$false] %s1246_s20 }
  0x15   : > { %s1403_s9 = scalar_select %p280_p10, %s1371_s25, 1 }
  0x17   : > { %s1178_s10 = smul.u32 40, %s1403_s9  ;;  %s1037_s14 = sshll.u32 %s1403_s9, 1 }
  0x18   : > { %s283_s17 = scalar_lea.vmem %s1635_s0, %s1037_s14 }
  0x19   : > { %s288_s13 = scalar_lea.vmem %s1636_s1, %s1178_s10  ;;  %v299_v11 = vld [vmem:[%s283_s17] sm:$0x3]  ;;  %s293_s26 = scalar_lea.vmem %s1637_s2, %s1178_s10 }
  0x1a   : > { %v301_v1 = vld [vmem:[%s288_s13] sm:$0xff]  ;;  %v302_v2 = vld [vmem:[%s288_s13 + $0x8] sm:$0xff]  ;;  %v303_v4 = vld [vmem:[%s288_s13 + $0x10] sm:$0xff]  ;;  %v300_v13 = vmul.f32 0.35355338, %v299_v11  ;;  %s1311_s10 = smov 16  }
  0x1b   : > { %v1414_v3 = vpack.c.bf16 %v302_v2, %v301_v1  ;;  %v304_v5 = vld [vmem:[%s288_s13 + $0x18] sm:$0xff]  ;;  %v305_v9 = vld [vmem:[%s288_s13 + $0x20] sm:$0xf]  ;;  %v307_v21 = vld [vmem:[%s293_s26 + $0x8] sm:$0xff] }
  0x1c   : > { %v1419_v7 = vpack.c.bf16 %v304_v5, %v303_v4  ;;  %v1425_v10 = vpack.c.bf16 %v305_v9, %v305_v9  ;;  %v1435_v14 = vpack.c.bf16 %v300_v13, %v300_v13  ;;  %v306_v20 = vld [vmem:[%s293_s26] sm:$0xff]  ;;  %v308_v23 = vld [vmem:[%s293_s26 + $0x10] sm:$0xff]  ;;  %v309_v24 = vld [vmem:[%s293_s26 + $0x18] sm:$0xff] }
  0x1d   : > { %v323_v6 = vsel %vm318_vm1, %v1414_v3, 0  ;;  %v1453_v22 = vpack.c.bf16 %v307_v21, %v306_v20  ;;  %v1457_v25 = vpack.c.bf16 %v309_v24, %v308_v23  ;;  %v310_v26 = vld [vmem:[%s293_s26 + $0x20] sm:$0xf]  ;;  %s277_s26 = sand.u32 1, %s1296_s22  }
  0x1e   : > { %1091 = vmatpush3.bf16.xpose.msra.mxu0 %v323_v6  ;;  %v326_v8 = vsel %vm318_vm1, %v1419_v7, 0  ;;  %v329_v12 = vsel %vm318_vm1, %v1425_v10, 0  ;;  %442 = vrot.lane.b32.xlu1 %v1419_v7, %s1308_s18  ;;  %v1461_v27 = vpack.c.bf16 %v310_v26, %v310_v26  ;;  %s909_s17 = scalar_lea.sflag [#allocation3], %s277_s26 }
  0x1f   : > { %1092 = vmatprep.subr.bf16.mxu0 %v1306_v0  ;;  %1101 = vmatpush3.bf16.msra.mxu1 %v1453_v22 }
  0x20   : > { %1102 = vmatprep.subr.bf16.mxu1 %v1306_v0  ;;  %v389_v28 = vsel %vm387_vm3, %v1461_v27, 0 }
  0x22   : > { %444 = vrot.lane.b32.xlu1 %v1425_v10, %s1308_s18 }
  0x23   : > { %1103 = vmatpush3.bf16.msra.mxu1 %v1457_v25 }
  0x24   : > { %1104 = vmatprep.subr.bf16.mxu1 %v1306_v0 }
  0x26   : > { %1093 = vmatpush3.bf16.xpose.msra.mxu0 %v326_v8  ;;  %435 = vrot.lane.b32.xlu1 %v1435_v14, %s1308_s18 }
  0x27   : > { %1094 = vmatprep.subr.bf16.mxu0 %v1306_v0  ;;  %1105 = vmatpush3.bf16.msra.mxu1 %v389_v28 }
  0x28   : > { %1110 = vmatprep.subr.bf16.mxu1 %v1306_v0 }
  0x2e   : > { %1095 = vmatpush3.bf16.xpose.msra.mxu0 %v329_v12 }
  0x2f   : > { %1120 = vmatprep.subr.bf16.mxu0 %v1306_v0 }
  0x35   : > { %1097 = vmatmul.mubr.msk.bf16.vlgmr.msra.gmra.mrb[0].mxu0 %vm318_vm1, %v1435_v14 }
  0x36   : > { %1126 = vmatprep.mubr.msk.bf16.mxu0 %vm1307_vm0, %v1306_v0 }
  0x90   : > { %v443_v36 = vpop.permute.xlu1 %442 }
  0x91   : > { %v453_v37 = vsel %vm318_vm1, %v443_v36, 0 }
  0x94   : > { %v445_v38 = vpop.permute.xlu1 %444 }
  0x95   : > { %v456_v39 = vsel %vm318_vm1, %v445_v38, 0 }
  0x98   : > { %v436_v40 = vpop.permute.xlu1 %435 }
 0x108   : > { %v365_v15 = vpop.f32.mrb[0].mxu0 }
 0x109   : > { %v1098_v16 = vpop.f32.mrb[1].mxu0  ;;  %v372_v17 = vsel %vm371_vm2, %v365_v15, -inf }
 0x10a   : > { %373 = vmax.xlane.f32.xlu0 %v372_v17  ;;  %v368_v18 = vpop.f32.mrb[2].mxu0 }
 0x10b   : > { %v1099_v19 = vpop.f32.mrb[3].mxu0 }
 0x120   : > { %440 = vrot.lane.b32.xlu0 %v1414_v3, %s1308_s18 }
 0x124   : > { %512 = vrot.lane.b32.xlu0 %v1453_v22, %s1308_s18 }
 0x128   : > { %514 = vrot.lane.b32.xlu0 %v1457_v25, %s1308_s18 }
 0x12c   : > { %516 = vrot.lane.b32.xlu0 %v1461_v27, %s1308_s18 }
 0x130   : > { %571 = vrot.lane.b32.xlu0 %v1414_v3, %s1309_s28 }
 0x134   : > { %573 = vrot.lane.b32.xlu0 %v1419_v7, %s1309_s28 }
 0x138   : > { %575 = vrot.lane.b32.xlu0 %v1425_v10, %s1309_s28 }
 0x197   : > { %v374_v29 = vpop.xlane.xlu0 %373 }
 0x198   : > { %v375_v30 = vsub.f32 %v365_v15, %v374_v29 }
 0x19a   : > { %v376_v31 = vmul.f32 1.442695, %v375_v30 }
 0x19b   : > { %v441_v32 = vpop.permute.xlu0 %440 }
 0x19c   : > { %1226 = vpow2.f32 %v376_v31  ;;  %v450_v34 = vsel %vm318_vm1, %v441_v32, 0 }
 0x19f   : > { %v513_v41 = vpop.permute.xlu0 %512 }
 0x1a0   : > { %1121 = vmatpush3.bf16.msra.mxu0 %v513_v41 }
 0x1a1   : > { %1122 = vmatprep.subr.bf16.mxu0 %v1306_v0 }
 0x1a3   : > { %v515_v51 = vpop.permute.xlu0 %514 }
 0x1a4   : > { %1123 = vmatpush3.bf16.msra.mxu0 %v515_v51 }
 0x1a5   : > { %1124 = vmatprep.subr.bf16.mxu0 %v1306_v0 }
 0x1a6   : > { %v1474_v33 = vpop.eup %1226 }
 0x1a7   : > { %v382_v35 = vpack.c.bf16 %v1474_v33, %v1474_v33  ;;  %v517_v52 = vpop.permute.xlu0 %516 }
 0x1a8   : > { %v524_v53 = vsel %vm387_vm3, %v517_v52, 0 }
 0x1a9   : > { %1107 = vmatmul.mubr.msk.bf16.vlgmr.msra.gmra.mrb[0].mxu1 %vm383_vm4, %v382_v35  ;;  %1125 = vmatpush3.bf16.msra.mxu0 %v524_v53 }
 0x1aa   : > { %1111 = vmatpush3.bf16.xpose.msra.mxu1 %v450_v34  ;;  %1116 = vmatprep.mubr.msk.bf16.mxu1 %vm1307_vm0, %v1306_v0 }
 0x1ab   : > { %1112 = vmatprep.subr.bf16.mxu1 %v1306_v0  ;;  %1130 = vmatprep.subr.bf16.mxu0 %v1306_v0  ;;  %v572_v57 = vpop.permute.xlu0 %571 }
 0x1ac   : > { %v581_v59 = vsel %vm318_vm1, %v572_v57, 0 }
 0x1af   : > { %v574_v61 = vpop.permute.xlu0 %573 }
 0x1b0   : > { %v584_v62 = vsel %vm318_vm1, %v574_v61, 0  ;;  %v845_v61 = vld [vmem:[%s1638_s3 + $0x10] sm:$0xff] }
 0x1b2   : > { %1113 = vmatpush3.bf16.xpose.msra.mxu1 %v453_v37 }
 0x1b3   : > { %1114 = vmatprep.subr.bf16.mxu1 %v1306_v0  ;;  %v576_v63 = vpop.permute.xlu0 %575 }
 0x1b4   : > { %v587_v1 = vsel %vm318_vm1, %v576_v63, 0  ;;  %v846_v63 = vld [vmem:[%s1638_s3 + $0x18] sm:$0xff] }
 0x1ba   : > { %1115 = vmatpush3.bf16.xpose.msra.mxu1 %v456_v39 }
 0x1bb   : > { %1140 = vmatprep.subr.bf16.mxu1 %v1306_v0 }
 0x1c1   : > { %1117 = vmatmul.mubr.msk.bf16.vlgmr.msra.gmra.mrb[4].mxu1 %vm318_vm1, %v436_v40 }
 0x1c2   : > { %1146 = vmatprep.mubr.msk.bf16.mxu1 %vm1307_vm0, %v1306_v0 }
 0x27c   : > { %v1494_v42 = vpop.f32.mrb[0].mxu1 }
 0x27d   : > { %v1108_v43 = vpop.f32.mrb[1].mxu1 }
 0x27e   : > { %v428_v44 = vpop.f32.mrb[2].mxu1 }
 0x27f   : > { %v1109_v45 = vpop.f32.mrb[3].mxu1 }
 0x294   : > { %v492_v46 = vpop.f32.mrb[4].mxu1 }
 0x295   : > { %v1118_v47 = vpop.f32.mrb[5].mxu1  ;;  %v498_v48 = vsel %vm371_vm2, %v492_v46, -inf }
 0x296   : > { %499 = vmax.xlane.f32.xlu1 %v498_v48  ;;  %v495_v49 = vpop.f32.mrb[6].mxu1 }
 0x297   : > { %v1119_v50 = vpop.f32.mrb[7].mxu1 }
 0x2a7   : > { %569 = vrot.lane.b32.xlu1 %v1435_v14, %s1309_s28 }
 0x2ab   : > { %640 = vrot.lane.b32.xlu1 %v1453_v22, %s1309_s28 }
 0x2af   : > { %642 = vrot.lane.b32.xlu1 %v1457_v25, %s1309_s28 }
 0x2b3   : > { %644 = vrot.lane.b32.xlu1 %v1461_v27, %s1309_s28  ;;  %s1036_s28 = sshll.u32 %s277_s26, 1 }
 0x2b7   : > { %699 = vrot.lane.b32.xlu1 %v1414_v3, %s1310_s29 }
 0x2bb   : > { %703 = vrot.lane.b32.xlu1 %v1425_v10, %s1310_s29 }
 0x2bf   : > { %697 = vrot.lane.b32.xlu1 %v1435_v14, %s1310_s29 }
 0x323   : > { %v500_v54 = vpop.xlane.xlu1 %499 }
 0x324   : > { %v501_v55 = vsub.f32 %v492_v46, %v500_v54 }
 0x326   : > { %v502_v56 = vmul.f32 1.442695, %v501_v55  ;;  %v378_v55 = vsel %vm371_vm2, %v1474_v33, 0.0 }
 0x327   : > { %v570_v2 = vpop.permute.xlu1 %569 }
 0x328   : > { %1228 = vpow2.f32 %v502_v56 }
 0x32b   : > { %v641_v4 = vpop.permute.xlu1 %640 }
 0x32c   : > { %1141 = vmatpush3.bf16.msra.mxu1 %v641_v4 }
 0x32d   : > { %1142 = vmatprep.subr.bf16.mxu1 %v1306_v0 }
 0x32f   : > { %v643_v16 = vpop.permute.xlu1 %642 }
 0x330   : > { %1143 = vmatpush3.bf16.msra.mxu1 %v643_v16 }
 0x331   : > { %1144 = vmatprep.subr.bf16.mxu1 %v1306_v0 }
 0x332   : > { %v1504_v58 = vpop.eup %1228 }
 0x333   : > { %v508_v60 = vpack.c.bf16 %v1504_v58, %v1504_v58  ;;  %v645_v10 = vpop.permute.xlu1 %644  ;;  %v504_v17 = vsel %vm371_vm2, %v1504_v58, 0.0 }
 0x334   : > { %v652_v14 = vsel %vm387_vm3, %v645_v10, 0 }
 0x335   : > { %1127 = vmatmul.mubr.msk.bf16.vlgmr.msra.gmra.mrb[4].mxu0 %vm383_vm4, %v508_v60  ;;  %1145 = vmatpush3.bf16.msra.mxu1 %v652_v14  ;;  %v844_v60 = vld [vmem:[%s1638_s3 + $0x8] sm:$0xff] }
 0x336   : > { %1131 = vmatpush3.bf16.xpose.msra.mxu0 %v581_v59  ;;  %1136 = vmatprep.mubr.msk.bf16.mxu0 %vm1307_vm0, %v1306_v0  ;;  %v843_v59 = vld [vmem:[%s1638_s3] sm:$0xff] }
 0x337   : > { %1132 = vmatprep.subr.bf16.mxu0 %v1306_v0  ;;  %1150 = vmatprep.subr.bf16.mxu1 %v1306_v0  ;;  %v700_v24 = vpop.permute.xlu1 %699 }
 0x33b   : > { %v704_v30 = vpop.permute.xlu1 %703 }
 0x33c   : > { %v715_v31 = vsel %vm318_vm1, %v704_v30, 0 }
 0x33e   : > { %1133 = vmatpush3.bf16.xpose.msra.mxu0 %v584_v62  ;;  %v847_v62 = vpack.c.bf16 %v844_v60, %v843_v59 }
 0x33f   : > { %1134 = vmatprep.subr.bf16.mxu0 %v1306_v0  ;;  %v698_v32 = vpop.permute.xlu1 %697 }
 0x346   : > { %1135 = vmatpush3.bf16.xpose.msra.mxu0 %v587_v1  ;;  %v848_v1 = vpack.c.bf16 %v846_v63, %v845_v61 }
 0x347   : > { %1160 = vmatprep.subr.bf16.mxu0 %v1306_v0 }
 0x34d   : > { %1137 = vmatmul.mubr.msk.bf16.vlgmr.msra.gmra.mrb[8].mxu0 %vm318_vm1, %v570_v2 }
 0x34e   : > { %1166 = vmatprep.mubr.msk.bf16.mxu0 %vm1307_vm0, %v1306_v0 }
 0x408   : > { %v1524_v5 = vpop.f32.mrb[4].mxu0 }
 0x409   : > { %v1128_v6 = vpop.f32.mrb[5].mxu0 }
 0x40a   : > { %v563_v8 = vpop.f32.mrb[6].mxu0 }
 0x40b   : > { %v1129_v9 = vpop.f32.mrb[7].mxu0 }
 0x420   : > { %v623_v11 = vpop.f32.mrb[8].mxu0 }
 0x421   : > { %v1138_v12 = vpop.f32.mrb[9].mxu0  ;;  %v629_v13 = vsel %vm371_vm2, %v623_v11, -inf }
 0x422   : > { %630 = vmax.xlane.f32.xlu0 %v629_v13  ;;  %v626_v15 = vpop.f32.mrb[10].mxu0 }
 0x423   : > { %v1139_v3 = vpop.f32.mrb[11].mxu0 }
 0x438   : > { %701 = vrot.lane.b32.xlu0 %v1419_v7, %s1310_s29 }
 0x43c   : > { %768 = vrot.lane.b32.xlu0 %v1453_v22, %s1310_s29 }
 0x440   : > { %770 = vrot.lane.b32.xlu0 %v1457_v25, %s1310_s29  ;;  %v709_v25 = vsel %vm318_vm1, %v700_v24, 0 }
 0x444   : > { %772 = vrot.lane.b32.xlu0 %v1461_v27, %s1310_s29  ;;  %s279_s29 = scalar_lea.vmem [#allocation2], %s1036_s28  ;;  %s1248_s28 = scalar_lea.vmem %s1247_s20, 64 }
 0x445   : > { %s925_s12 = sshll.u32 %s279_s29, 4  ;;  %s926_s12 = int_to_ptr.vmem [resolvable:$true] %s925_s12 }
 0x446   : > { %s1242_s18 = scalar_lea.vmem %s926_s12, 32  ;;  %p1249_p0 = scmp.lt.s32.totalorder %s926_s12, %s1247_s20 }
 0x447   : > { %p1243_p11 = scmp.ne.s32.totalorder %s926_s12, %s1242_s18  ;;  %p1250_p1 = scmp.lt.s32.totalorder %s1248_s28, %s1242_s18 }
 0x449   : > { %p1244_p12 = pnand %p1243_p11, %p1388_p5  ;;  %p1251_p2 = por %p1250_p1, %p1249_p0 }
 0x44b   : > { %p1245_p13 = pneg %p1244_p12 }
 0x44d   : > { %p1252_p3 = pnand %p1251_p2, %p1245_p13 }
 0x463   : > { %505 = vadd.xlane.f32.xlu0 %v504_v17 }
 0x4af   : > { %v631_v18 = vpop.xlane.xlu0 %630 }
 0x4b0   : > { %v632_v19 = vsub.f32 %v623_v11, %v631_v18 }
 0x4b2   : > { %v633_v20 = vmul.f32 1.442695, %v632_v19 }
 0x4b3   : > { %v702_v21 = vpop.permute.xlu0 %701 }
 0x4b4   : > { %1230 = vpow2.f32 %v633_v20  ;;  %v712_v29 = vsel %vm318_vm1, %v702_v21, 0 }
 0x4b7   : > { %v769_v23 = vpop.permute.xlu0 %768 }
 0x4b8   : > { %1161 = vmatpush3.bf16.msra.mxu0 %v769_v23 }
 0x4b9   : > { %1162 = vmatprep.subr.bf16.mxu0 %v1306_v0 }
 0x4bb   : > { %v771_v7 = vpop.permute.xlu0 %770 }
 0x4bc   : > { %1163 = vmatpush3.bf16.msra.mxu0 %v771_v7 }
 0x4bd   : > { %1164 = vmatprep.subr.bf16.mxu0 %v1306_v0 }
 0x4be   : > { %v1538_v22 = vpop.eup %1230 }
 0x4bf   : > { %v639_v26 = vpack.c.bf16 %v1538_v22, %v1538_v22  ;;  %v773_v27 = vpop.permute.xlu0 %772  ;;  %v635_v44 = vsel %vm371_vm2, %v1538_v22, 0.0 }
 0x4c0   : > { %v780_v28 = vsel %vm387_vm3, %v773_v27, 0 }
 0x4c1   : > { %1147 = vmatmul.mubr.msk.bf16.vlgmr.msra.gmra.mrb[8].mxu1 %vm383_vm4, %v639_v26  ;;  %1165 = vmatpush3.bf16.msra.mxu0 %v780_v28 }
 0x4c2   : > { %1151 = vmatpush3.bf16.xpose.msra.mxu1 %v709_v25  ;;  %1156 = vmatprep.mubr.msk.bf16.mxu1 %vm1307_vm0, %v1306_v0 }
 0x4c3   : > { %1152 = vmatprep.subr.bf16.mxu1 %v1306_v0  ;;  %1170 = vmatprep.subr.bf16.mxu0 %v1306_v0 }
 0x4ca   : > { %1153 = vmatpush3.bf16.xpose.msra.mxu1 %v712_v29 }
 0x4cb   : > { %1154 = vmatprep.subr.bf16.mxu1 %v1306_v0 }
 0x4d2   : > { %1155 = vmatpush3.bf16.xpose.msra.mxu1 %v715_v31 }
 0x4d9   : > { %1157 = vmatmul.mubr.msk.bf16.vlgmr.msra.gmra.mrb[12].mxu1 %vm318_vm1, %v698_v32 }
 0x4f0   : > { %v506_v54 = vpop.xlane.xlu0 %505 }
 0x594   : > { %v688_v34 = vpop.f32.mrb[8].mxu1 }
 0x595   : > { %v1148_v35 = vpop.f32.mrb[9].mxu1 }
 0x596   : > { %v691_v36 = vpop.f32.mrb[10].mxu1 }
 0x597   : > { %v1149_v37 = vpop.f32.mrb[11].mxu1 }
 0x5ac   : > { %v751_v38 = vpop.f32.mrb[12].mxu1 }
 0x5ad   : > { %v1158_v39 = vpop.f32.mrb[13].mxu1  ;;  %v757_v40 = vsel %vm371_vm2, %v751_v38, -inf }
 0x5ae   : > { %758 = vmax.xlane.f32.xlu1 %v757_v40  ;;  %v754_v41 = vpop.f32.mrb[14].mxu1 }
 0x5af   : > { %v1159_v43 = vpop.f32.mrb[15].mxu1 }
 0x5b2   : > { %636 = vadd.xlane.f32.xlu1 %v635_v44 }
 0x63b   : > { %v759_v45 = vpop.xlane.xlu1 %758 }
 0x63c   : > { %v760_v46 = vsub.f32 %v751_v38, %v759_v45 }
 0x63e   : > { %v761_v47 = vmul.f32 1.442695, %v760_v46 }
 0x63f   : > { %v637_v48 = vpop.xlane.xlu1 %636 }
 0x640   : > { %1232 = vpow2.f32 %v761_v47 }
 0x641   : > { %1234 = vrcp.f32 %v637_v48 }
 0x642   : > { %1236 = vrcp.f32 %v506_v54 }
 0x64a   : > { %v1233_v49 = vpop.eup %1232 }
 0x64b   : > { %v1235_v50 = vpop.eup %1234  ;;  %v763_v51 = vsel %vm371_vm2, %v1233_v49, 0.0  ;;  %v767_v52 = vpack.c.bf16 %v1233_v49, %v1233_v49 }
 0x64c   : > { %764 = vadd.xlane.f32.xlu1 %v763_v51  ;;  %v694_v53 = vmul.f32 %v1235_v50, %v688_v34  ;;  %v1237_v56 = vpop.eup %1236  ;;  %v695_v12 = vmul.f32 %v1235_v50, %v1538_v22 }
 0x64d   : > { %1167 = vmatmul.mubr.msk.bf16.vlgmr.msra.gmra.mrb[12].mxu0 %vm383_vm4, %v767_v52  ;;  %v566_v57 = vmul.f32 %v1237_v56, %v1524_v5  ;;  %v567_v6 = vmul.f32 %v1237_v56, %v1504_v58 }
 0x64e   : > { %830 = vrot.lane.b32.xlu0 %v694_v53, %s1311_s10  ;;  %1174 = vmatprep.mubr.msk.bf16.mxu0 %vm1307_vm0, %v1306_v0  ;;  %s1313_s10 = smov 24  }
 0x64f   : > { %1171 = vmatpush3.bf16.msra.mxu0 %v847_v62 }
 0x650   : > { %379 = vadd.xlane.f32.xlu1 %v378_v55  ;;  %1172 = vmatprep.subr.bf16.mxu0 %v1306_v0 }
 0x653   : > { %1173 = vmatpush3.bf16.msra.mxu0 %v848_v1 }
 0x661   : > { %826 = vrot.lane.b32.xlu1 %v566_v57, %s1312_s11  ;;  %s1052_s11 = sshll.u32 %s1371_s25, 5 }
 0x662   : > { %s1589_s16 = scalar_lea.hbm %s1641_s6, %s1052_s11 }
 0x6c0   : > { %v831_v19 = vpop.permute.xlu0 %830 }
 0x6d9   : > { %v765_v2 = vpop.xlane.xlu1 %764 }
 0x6dd   : > { %v380_v4 = vpop.xlane.xlu1 %379 }
 0x6de   : > { %1238 = vrcp.f32 %v380_v4 }
 0x6df   : > { %1240 = vrcp.f32 %v765_v2 }
 0x6e1   : > { %v827_v17 = vpop.permute.xlu1 %826 }
 0x6e8   : > { %v1239_v5 = vpop.eup %1238 }
 0x6e9   : > { %v432_v8 = vmul.f32 %v1239_v5, %v1474_v33  ;;  %v431_v9 = vmul.f32 %v1239_v5, %v1494_v42  ;;  %v1241_v11 = vpop.eup %1240 }
 0x6ea   : > { %v823_v15 = vmul.f32 %v1241_v11, %v1233_v49 }
 0x6eb   : > { %v568_v13 = vadd.f32 %v567_v6, %v432_v8  ;;  %v837_v18 = vsel %vm318_vm1, %v431_v9, %v827_v17 }
 0x6ec   : > { %v839_v20 = vsel %vm838_vm5, %v837_v18, %v831_v19 }
 0x6ed   : > { %v696_v0 = vadd.f32 %v695_v12, %v568_v13 }
 0x6ef   : > { %v824_v3 = vadd.f32 %v823_v15, %v696_v0 }
 0x6f1   : > { %v902_v16 = vmul.f32 0.25, %v824_v3 }
 0x6f3   : > { %903 = vst.msk [vmem:[%s279_s29] sm:$0x3] %vm371_vm2, %v902_v16 }
 0x720   : > { %v816_v10 = vpop.f32.mrb[12].mxu0 }
 0x721   : > { %v822_v58 = vmul.f32 %v1241_v11, %v816_v10  ;;  %v1168_v14 = vpop.f32.mrb[13].mxu0 }
 0x722   : > { %v819_v33 = vpop.f32.mrb[14].mxu0 }
 0x723   : > { %834 = vrot.lane.b32.xlu1 %v822_v58, %s1313_s10  ;;  %v1169_v42 = vpop.f32.mrb[15].mxu0 }
 0x795   : > { %v835_v21 = vpop.permute.xlu1 %834 }
 0x796   : > { %v841_v23 = vsel %vm840_vm6, %v839_v20, %v835_v21 }
 0x797   : > { %v842_v7 = vpack.c.bf16 %v841_v23, %v841_v23 }
 0x799   : > { %1175 = vmatmul.mubr.msk.bf16.vlgmr.msra.gmra.mrb[16].mxu0 %vm856_vm7, %v842_v7 }
 0x79a   : > { %1255 = shalt.err (!%p1252_p3)
}
 0x79b   : > { %s1256_s25 = scalar_lea.hbm %s1589_s16, 32  ;;  %s1260_s10 = scalar_lea.hbm %s1641_s6, 64 }
 0x79c   : > { %p1257_p4 = scmp.ne.s32.totalorder %s1589_s16, %s1256_s25  ;;  %p1261_p9 = scmp.lt.u32.totalorder %s1589_s16, %s1641_s6 }
 0x79d   : > { %p1262_p10 = scmp.lt.u32.totalorder %s1260_s10, %s1256_s25  ;;  %p1264_p12 = scmp.lt.u32.totalorder %s1256_s25, %s1589_s16 }
 0x79e   : > { %p1258_p7 = pnand %p1257_p4, %p1388_p5 }
 0x79f   : > { %p1263_p11 = por %p1262_p10, %p1261_p9 }
 0x7a0   : > { %p1259_p8 = pneg %p1258_p7 }
 0x7a1   : > { %p1265_p13 = por %p1264_p12, %p1263_p11 }
 0x7a3   : > { %p1266_p0 = pnand %p1265_p13, %p1259_p8 }
 0x7a5   : > { %1269 = shalt.err (!%p1266_p0)
}
 0x7a6   : > { %1179 = dma.vmem_to_hbm [thread:$0]  (%p1388_p5), %s926_s12, 32, %s1589_s16, %s909_s17   ;;  %v1049_v24 = vld [vmem:[%s1639_s4] ss:$0 sm:$0xff]  ;;  %vm900_vm8 = vcmask 254976  }
 0x7a7   : > { %s297_s28 = scalar_lea.vmem %s1640_s5, %s1037_s14 }
 0x86c   : > { %v894_v22 = vpop.f32.mrb[16].mxu0 }
 0x86d   : > { %v895_v25 = vadd.f32 %v1049_v24, %v894_v22  ;;  %v1176_v26 = vpop.f32.mrb[17].mxu0 }
 0x86e   : > { %v897_v27 = vpop.f32.mrb[18].mxu0 }
 0x86f   : > { %901 = vst.msk [vmem:[%s297_s28] sm:$0x3] %vm900_vm8, %v895_v25  ;;  %v1177_v28 = vpop.f32.mrb[19].mxu0 }
 0x870 PF: > { %p1185_p5 = scmp.ge.s32.totalorder %s1304_s24, 2  ;;  %s944_s7 = sand.u32 1, %s1292_s21  }
 0x871   : > { %s945_s9 = scalar_lea.sflag [#allocation3], %s944_s7 }
 0x872   : > { %p1182_p1 = pnand %p1185_p5, %p1392_p6 }
 0x874   : > { %1287 = dma.done.wait (!%p1182_p1), %s945_s9, 32  }
 0x875   : > { %1289 = vsyncadd (!%p1182_p1), %s945_s9, 4294967264  ;;  %p17_p2 = scmp.ge.s32.totalorder %s1375_s27, 4   ;;  %s1644_s21 = smov %s1296_s22 }
 0x876   : > { %s1645_s22 = smov %s1300_s23  ;;  %s1646_s23 = smov %s1386_s30 }
 0x877   : > { %s1647_s24 = smov %s1375_s27  ;;  %19 = sbr.rel (!%p17_p2) target bundleno = 3 (0x3), region = 93 }
 0x87e   :  { %950 = vsyncpa [#allocation3], 1 }
 0x87f   :  { %952 = vsyncpa [#allocation3 + $0x1], 1 }

// kernel: visual_transformer_forward.21
= control target key start
LH: loop header
LB: loop body
LE: loop exit
PB: predicated region body
PF: predicated region fallthrough
CT: control target
= control target key end

     0   :  { %v188_v0 = vmov 0.0   ;;  %vm189_vm0 = vmmov 0   ;;  %vm42_vm1 = vcmask 261120   ;;  %vm130_vm2 = vcmask 785408   ;;  %s297_s1 = inlined_call_operand.vmem [shape: f32[32,96], index: 1, kind: input, shape index: {}]   ;;  %s298_s0 = inlined_call_operand.vmem [shape: f32[68,32], index: 0, kind: input, shape index: {}]   ;;  %s299_s2 = inlined_call_operand.vmem [shape: f32[1,96], index: 2, kind: input, shape index: {}]   ;;  %s300_s3 = inlined_call_operand.vmem [shape: f32[68,96], index: 3, kind: output, shape index: {}]  }
   0x1   :  { %158 = vmatprep.subr.bf16.mxu0 %v188_v0  ;;  %v29_v1 = vld [vmem:[%s297_s1] sm:$0xff]  ;;  %v30_v2 = vld [vmem:[%s297_s1 + $0x8] sm:$0xff]  ;;  %v31_v3 = vld [vmem:[%s297_s1 + $0x10] sm:$0xff]  ;;  %182 = vmatprep.subr.bf16.mxu1 %v188_v0  ;;  %vm139_vm3 = vcmask 781312  }
   0x2   :  { %v33_v4 = vpack.c.bf16 %v30_v2, %v29_v1  ;;  %v32_v5 = vld [vmem:[%s297_s1 + $0x18] sm:$0xff]  ;;  %162 = vmatprep.mubr.msk.bf16.mxu0 %vm189_vm0, %v188_v0  ;;  %174 = vmatprep.mubr.msk.bf16.mxu1 %vm189_vm0, %v188_v0  ;;  %v15_v6 = vld [vmem:[%s298_s0] sm:$0xff]  ;;  %v16_v8 = vld [vmem:[%s298_s0 + $0x8] sm:$0xff] }
   0x3   :  { %v34_v7 = vpack.c.bf16 %v32_v5, %v31_v3  ;;  %v21_v9 = vld [vmem:[%s298_s0 + $0x30] sm:$0xff]  ;;  %v22_v10 = vld [vmem:[%s298_s0 + $0x38] sm:$0xff]  ;;  %v24_v11 = vpack.c.bf16 %v16_v8, %v15_v6  ;;  %v23_v15 = vld [vmem:[%s298_s0 + $0x40] sm:$0xf] }
   0x4   :  { %159 = vmatpush3.bf16.msra.mxu0 %v33_v4  ;;  %184 = vmatpush3.bf16.msra.mxu1 %v33_v4  ;;  %v27_v12 = vpack.c.bf16 %v22_v10, %v21_v9  ;;  %v17_v13 = vld [vmem:[%s298_s0 + $0x10] sm:$0xff]  ;;  %v18_v14 = vld [vmem:[%s298_s0 + $0x18] sm:$0xff]  ;;  %v28_v17 = vpack.c.bf16 %v23_v15, %v23_v15  ;;  %v19_v18 = vld [vmem:[%s298_s0 + $0x20] sm:$0xff] }
   0x5   :  { %160 = vmatprep.subr.bf16.mxu0 %v188_v0  ;;  %183 = vmatprep.subr.bf16.mxu1 %v188_v0  ;;  %v25_v16 = vpack.c.bf16 %v18_v14, %v17_v13  ;;  %v20_v19 = vld [vmem:[%s298_s0 + $0x28] sm:$0xff]  ;;  %v145_v21 = vld [vmem:[%s299_s2] ss:$0 sm:$0xff] }
   0x6   :  { %v26_v20 = vpack.c.bf16 %v20_v19, %v19_v18 }
   0x8   :  { %161 = vmatpush3.bf16.msra.mxu0 %v34_v7  ;;  %185 = vmatpush3.bf16.msra.mxu1 %v34_v7 }
   0xb   :  { %163 = vmatmul.mubr.msk.bf16.vlgmr.msra.gmra.mrb[0].mxu0 %vm42_vm1, %v24_v11  ;;  %175 = vmatmul.mubr.msk.bf16.vlgmr.msra.gmra.mrb[0].mxu1 %vm42_vm1, %v27_v12 }
   0xc   :  { %166 = vmatprep.mubr.msk.bf16.mxu0 %vm189_vm0, %v188_v0  ;;  %178 = vmatprep.mubr.msk.bf16.mxu1 %vm189_vm0, %v188_v0 }
  0x13   :  { %167 = vmatmul.mubr.msk.bf16.gmra.mrb[4].mxu0 %vm42_vm1, %v25_v16  ;;  %179 = vmatmul.mubr.msk.bf16.gmra.mrb[4].mxu1 %vm42_vm1, %v28_v17 }
  0x14   :  { %170 = vmatprep.mubr.msk.bf16.mxu0 %vm189_vm0, %v188_v0 }
  0x1b   :  { %171 = vmatmul.mubr.msk.bf16.gmra.mrb[8].mxu0 %vm42_vm1, %v26_v20 }
  0xde   :  { %v92_v22 = vpop.f32.mrb[0].mxu0  ;;  %v116_v23 = vpop.f32.mrb[0].mxu1 }
  0xdf   :  { %v93_v24 = vadd.f32 %v145_v21, %v92_v22  ;;  %v164_v25 = vpop.f32.mrb[1].mxu0  ;;  %v117_v26 = vadd.f32 %v145_v21, %v116_v23  ;;  %v176_v27 = vpop.f32.mrb[1].mxu1 }
  0xe0   :  { %v95_v28 = vpop.f32.mrb[2].mxu0  ;;  %v119_v29 = vpop.f32.mrb[2].mxu1 }
  0xe1   :  { %131 = vst.msk [vmem:[%s300_s3] sm:$0xff] %vm130_vm2, %v93_v24  ;;  %v96_v30 = vadd.f32 %v145_v21, %v95_v28  ;;  %v165_v31 = vpop.f32.mrb[3].mxu0  ;;  %137 = vst.msk [vmem:[%s300_s3 + $0x30] sm:$0xff] %vm130_vm2, %v117_v26  ;;  %v120_v32 = vadd.f32 %v145_v21, %v119_v29  ;;  %v177_v33 = vpop.f32.mrb[3].mxu1 }
  0xe3   :  { %132 = vst.msk [vmem:[%s300_s3 + $0x8] sm:$0xff] %vm130_vm2, %v96_v30  ;;  %138 = vst.msk [vmem:[%s300_s3 + $0x38] sm:$0xff] %vm130_vm2, %v120_v32 }
  0xe6   :  { %v100_v34 = vpop.f32.mrb[4].mxu0  ;;  %v124_v35 = vpop.f32.mrb[4].mxu1 }
  0xe7   :  { %v101_v36 = vadd.f32 %v145_v21, %v100_v34  ;;  %v168_v37 = vpop.f32.mrb[5].mxu0  ;;  %v125_v38 = vadd.f32 %v145_v21, %v124_v35  ;;  %v180_v39 = vpop.f32.mrb[5].mxu1 }
  0xe8   :  { %v103_v40 = vpop.f32.mrb[6].mxu0  ;;  %v127_v41 = vpop.f32.mrb[6].mxu1 }
  0xe9   :  { %133 = vst.msk [vmem:[%s300_s3 + $0x10] sm:$0xff] %vm130_vm2, %v101_v36  ;;  %v104_v42 = vadd.f32 %v145_v21, %v103_v40  ;;  %v169_v43 = vpop.f32.mrb[7].mxu0  ;;  %v181_v44 = vpop.f32.mrb[7].mxu1 }
  0xea   :  { %140 = vst.msk [vmem:[%s300_s3 + $0x40] sm:$0xf] %vm139_vm3, %v125_v38 }
  0xeb   :  { %134 = vst.msk [vmem:[%s300_s3 + $0x18] sm:$0xff] %vm130_vm2, %v104_v42 }
  0xee   :  { %v108_v45 = vpop.f32.mrb[8].mxu0 }
  0xef   :  { %v109_v46 = vadd.f32 %v145_v21, %v108_v45  ;;  %v172_v47 = vpop.f32.mrb[9].mxu0 }
  0xf0   :  { %v111_v48 = vpop.f32.mrb[10].mxu0 }
  0xf1   :  { %135 = vst.msk [vmem:[%s300_s3 + $0x20] sm:$0xff] %vm130_vm2, %v109_v46  ;;  %v112_v49 = vadd.f32 %v145_v21, %v111_v48  ;;  %v173_v50 = vpop.f32.mrb[11].mxu0 }
  0xf3   :  { %136 = vst.msk [vmem:[%s300_s3 + $0x28] sm:$0xff] %vm130_vm2, %v112_v49 }

// kernel: visual_transformer_forward.22
= control target key start
LH: loop header
LB: loop body
LE: loop exit
PB: predicated region body
PF: predicated region fallthrough
CT: control target
= control target key end

     0   :  { %12 = vsyncpa [#allocation3], 0  ;;  %s2004_s0 = inlined_call_operand.vmem [shape: f32[4,17,32], index: 0, kind: input, shape index: {}]   ;;  %s2005_s1 = inlined_call_operand.vmem [shape: f32[4,17,32], index: 1, kind: input, shape index: {}]   ;;  %s2006_s2 = inlined_call_operand.vmem [shape: f32[4,17,32], index: 2, kind: input, shape index: {}]   ;;  %s2007_s3 = inlined_call_operand.vmem [shape: f32[32,32], index: 3, kind: input, shape index: {}]   ;;  %s2008_s4 = inlined_call_operand.vmem [shape: f32[1,32], index: 4, kind: input, shape index: {}]   ;;  %s2009_s5 = inlined_call_operand.vmem [shape: f32[4,17,32], index: 5, kind: output, shape index: {0}]   ;;  %s2010_s6 = inlined_call_operand.hbm [shape: f32[4,17,17], index: 6, kind: output, shape index: {1}]  }
   0x1   :  { %14 = vsyncpa [#allocation3 + $0x1], 0  ;;  %s1632_s21 = smov 0   ;;  %s1634_s22 = smov 0  }
   0x2   :  { %s1636_s23 = smov 0   ;;  %s1638_s24 = smov 0  }
   0x3 LB: > { %s1653_s25 = sadd.s32 4294967295, %s1586_s24   ;;  %s1265_s26 = sadd.s32 4294967294, %s1586_s24   ;;  %s1586_s24 = sphi %s1638_s24, %s2016_s24   ;;  %s1582_s23 = sphi %s1636_s23, %s2015_s23   ;;  %s1578_s22 = sphi %s1634_s22, %s2014_s22   ;;  %s1574_s21 = sphi %s1632_s21, %s2013_s21  }
   0x4   : > { %s1657_s27 = sadd.s32 1, %s1586_s24   ;;  %s173_s28 = sadd.s32 1, %s1582_s23 }
   0x5   : > { %s170_s29 = ssub.s32 %s1586_s24, %s1657_s27  ;;  %p183_p0 = scmp.ne.s32.totalorder %s1582_s23, %s1578_s22 }
   0x6   : > { %p171_p1 = scmp.eq.s32.totalorder %s170_s29, 0  ;;  %p184_p2 = scmp.eq.s32.totalorder %s1653_s25, 3 }
   0x7   : > { %p189_p3 = scmp.ne.s32.totalorder %s1578_s22, %s1574_s21  ;;  %p190_p4 = scmp.eq.s32.totalorder %s1265_s26, 3 }
   0x8   : > { %s1668_s30 = scalar_select %p171_p1, %s1582_s23, %s173_s28  }
   0x9   : > { %p1670_p5 = por %p184_p2, %p183_p0  ;;  %p1674_p6 = por %p190_p4, %p189_p3 }
   0xa   : > { %p1268_p7 = scmp.ge.s32.totalorder %s1586_s24, 1  ;;  %p238_p8 = scmp.lt.s32.totalorder %s1586_s24, 5 }
   0xc   : > { %p239_p9 = pnand %p1268_p7, %p238_p8 }
   0xd   : > { %p283_p10 = scmp.lt.s32.totalorder (!%p239_p9), %s1653_s25, 3  ;;  %vm322_vm0 = vcmask (!%p239_p9), 64512   ;;  %vm390_vm1 = vcmask (!%p239_p9), 131072   ;;  %vm383_vm2 = vcmask (!%p239_p9), 138240   ;;  %s1588_s17 = smov (!%p239_p9), 120   ;;  %vm423_vm3 = vcmask (!%p239_p9), 1040384  }
   0xe   : > { %242 = sbr.rel (%p239_p9) target bundleno = 2160 (0x870), region = 40  ;;  %v1589_v27 = vmov (!%p239_p9), 0   ;;  %s1590_s26 = smov (!%p239_p9), 112   ;;  %vm1044_vm4 = vcmask (!%p239_p9), 130048   ;;  %vm1048_vm5 = vcmask (!%p239_p9), 195584   ;;  %vm1067_vm6 = vcmask (!%p239_p9), 261120  }
   0xf   : > { %v1729_v28 = vsel (!%p239_p9), %vm423_vm3, 65535, %v1589_v27  ;;  %s1591_s28 = smov (!%p239_p9), 104   ;;  %s1592_s29 = smov (!%p239_p9), 8  }
  0x10   : > { %s280_s11 = sand.u32 (!%p239_p9), 1, %s1578_s22  }
  0x11   : > { %s1411_s12 = smul.u32 (!%p239_p9), 24, %s280_s11 }
  0x15   : > { %s284_s9 = scalar_select %p283_p10, %s1653_s25, 3 }
  0x17   : > { %s1682_s10 = smul.u32 24, %s284_s9  ;;  %s1593_s9 = smov 16  }
  0x19   : > { %s292_s13 = scalar_lea.vmem %s2005_s1, %s1682_s10  ;;  %s287_s16 = scalar_lea.vmem %s2004_s0, %s1682_s10 }
  0x1a   : > { %v310_v0 = vld [vmem:[%s292_s13] sm:$0xff]  ;;  %v311_v1 = vld [vmem:[%s292_s13 + $0x8] sm:$0xff]  ;;  %v312_v2 = vld [vmem:[%s292_s13 + $0x10] sm:$0x1]  ;;  %s297_s20 = scalar_lea.vmem %s2006_s2, %s1682_s10  ;;  %s1915_s13 = scalar_lea.vmem [#allocation2], %s1411_s12 }
  0x1b   : > { %v1692_v3 = vpack.c.bf16 %v311_v1, %v310_v0  ;;  %v1694_v4 = vpack.c.bf16 %v312_v2, %v312_v2  ;;  %v304_v5 = vld [vmem:[%s287_s16] sm:$0xff]  ;;  %v305_v6 = vld [vmem:[%s287_s16 + $0x8] sm:$0xff]  ;;  %v306_v11 = vld [vmem:[%s287_s16 + $0x10] sm:$0x1]  ;;  %s1154_s12 = sshll.u32 %s1915_s13, 4  ;;  %s1949_s12 = int_to_ptr.vmem [resolvable:$true] %s1154_s12 }
  0x1c   : > { %v307_v7 = vmul.f32 0.35355338, %v304_v5  ;;  %v308_v8 = vmul.f32 0.35355338, %v305_v6  ;;  %v309_v13 = vmul.f32 0.35355338, %v306_v11 }
  0x1d   : > { %1403 = vmatprep.subr.msk.bf16.mxu0 %vm322_vm0, %v1692_v3  ;;  %v330_v9 = vsel %vm322_vm0, %v1692_v3, 0  ;;  %v333_v12 = vsel %vm322_vm0, %v1694_v4, 0  ;;  %v313_v22 = vld [vmem:[%s297_s20] sm:$0xff]  ;;  %v314_v23 = vld [vmem:[%s297_s20 + $0x8] sm:$0xff]  ;;  %v315_v25 = vld [vmem:[%s297_s20 + $0x10] sm:$0x1] }
  0x1e   : > { %1332 = vmatpush3.bf16.xpose.msra.mxu0 %v330_v9  ;;  %v1700_v10 = vpack.c.bf16 %v308_v8, %v307_v7  ;;  %v1708_v14 = vpack.c.bf16 %v309_v13, %v309_v13  ;;  %v1723_v24 = vpack.c.bf16 %v314_v23, %v313_v22  ;;  %v1726_v26 = vpack.c.bf16 %v315_v25, %v315_v25  ;;  %s1524_s18 = scalar_lea.vmem %s1949_s12, 384 }
  0x1f   : > { %1404 = vmatprep.subr.msk.bf16.mxu0 %vm322_vm0, %v1694_v4  ;;  %p1525_p11 = scmp.ne.s32.totalorder %s1949_s12, %s1524_s18 }
  0x20   : > { %1335 = vmatprep.mubr.msk.bf16.mxu0 %vm322_vm0, %v1700_v10  ;;  %1339 = vmatprep.subr.bf16.mxu1 %v1723_v24  ;;  %v427_v29 = vand.u32 %v1729_v28, %v1726_v26 }
  0x21   : > { %1340 = vmatpush3.bf16.msra.mxu1 %v1723_v24  ;;  %p1526_p12 = pnand %p1525_p11, %p1670_p5 }
  0x22   : > { %1341 = vmatprep.subr.bf16.mxu1 %v427_v29 }
  0x23   : > { %p1527_p13 = pneg %p1526_p12 }
  0x25   : > { %1342 = vmatpush3.bf16.msra.mxu1 %v427_v29 }
  0x26   : > { %1334 = vmatpush3.bf16.xpose.msra.mxu0 %v333_v12 }
  0x2d   : > { %1336 = vmatmul.mubr.msk.bf16.vlgmr.msra.gmra.mrb[0].mxu0 %vm322_vm0, %v1708_v14 }
 0x100   : > { %v1337_v15 = vpop.f32.mrb[0].mxu0 }
 0x101   : > { %v369_v16 = vpop.f32.mrb[1].mxu0  ;;  %v391_v17 = vsel %vm390_vm1, %v1337_v15, -inf }
 0x102   : > { %392 = vmax.xlane.f32.xlu1 %v391_v17  ;;  %v1338_v18 = vpop.f32.mrb[2].mxu0  ;;  %v384_v19 = vsel %vm383_vm2, %v369_v16, -inf }
 0x103   : > { %385 = vmax.xlane.f32.xlu0 %v384_v19  ;;  %v372_v20 = vpop.f32.mrb[3].mxu0 }
 0x104   : > { %v387_v21 = vsel %vm383_vm2, %v372_v20, -inf }
 0x107   : > { %388 = vmax.xlane.f32.xlu0 %v387_v21 }
 0x113   : > { %494 = vrot.lane.b32.xlu1 %v1692_v3, %s1588_s17 }
 0x117   : > { %488 = vrot.lane.b32.xlu1 %v1700_v10, %s1588_s17 }
 0x11b   : > { %490 = vrot.lane.b32.xlu1 %v1708_v14, %s1588_s17 }
 0x11d   : > { %496 = vrot.lane.b32.xlu0 %v1694_v4, %s1588_s17 }
 0x18f   : > { %v393_v30 = vpop.xlane.xlu1 %392 }
 0x190   : > { %v396_v31 = vsub.f32 %v1337_v15, %v393_v30  ;;  %v386_v32 = vpop.xlane.xlu0 %385 }
 0x191   : > { %v394_v33 = vsub.f32 %v369_v16, %v386_v32 }
 0x192   : > { %v401_v34 = vmul.f32 1.442695, %v396_v31 }
 0x193   : > { %v495_v35 = vpop.permute.xlu1 %494  ;;  %v397_v36 = vmul.f32 1.442695, %v394_v33 }
 0x194   : > { %v389_v37 = vpop.xlane.xlu0 %388  ;;  %1405 = vmatprep.subr.msk.bf16.mxu1 %vm322_vm0, %v495_v35  ;;  %1476 = vpow2.f32 %v401_v34  ;;  %v505_v44 = vsel %vm322_vm0, %v495_v35, 0 }
 0x195   : > { %v395_v38 = vsub.f32 %v372_v20, %v389_v37  ;;  %1478 = vpow2.f32 %v397_v36 }
 0x197   : > { %v399_v39 = vmul.f32 1.442695, %v395_v38  ;;  %v489_v46 = vpop.permute.xlu1 %488 }
 0x198   : > { %v497_v47 = vpop.permute.xlu0 %496 }
 0x199   : > { %1480 = vpow2.f32 %v399_v39  ;;  %v508_v48 = vsel %vm322_vm0, %v497_v47, 0 }
 0x19b   : > { %v491_v49 = vpop.permute.xlu1 %490 }
 0x19e   : > { %v1738_v40 = vpop.eup %1476 }
 0x19f   : > { %v1740_v41 = vpop.eup %1478  ;;  %v416_v45 = vpack.c.bf16 %v1738_v40, %v1738_v40 }
 0x1a3   : > { %v1742_v42 = vpop.eup %1480 }
 0x1a4   : > { %v415_v43 = vpack.c.bf16 %v1742_v42, %v1740_v41 }
 0x1a6   : > { %1343 = vmatprep.mubr.msk.bf16.mxu1 %vm383_vm2, %v415_v43 }
 0x1a7   : > { %1344 = vmatmul.mubr.msk.bf16.vlgmr.msra.gmra.mrb[0].mxu1 %vm383_vm2, %v416_v45 }
 0x1a8   : > { %1348 = vmatpush3.bf16.xpose.msra.mxu1 %v505_v44  ;;  %1351 = vmatprep.mubr.msk.bf16.mxu1 %vm322_vm0, %v489_v46 }
 0x1a9   : > { %1406 = vmatprep.subr.msk.bf16.mxu1 %vm322_vm0, %v497_v47 }
 0x1b0   : > { %1350 = vmatpush3.bf16.xpose.msra.mxu1 %v508_v48 }
 0x1b7   : > { %1352 = vmatmul.mubr.msk.bf16.vlgmr.msra.gmra.mrb[4].mxu1 %vm322_vm0, %v491_v49 }
 0x27a   : > { %v1755_v50 = vpop.f32.mrb[0].mxu1 }
 0x27b   : > { %v1757_v51 = vpop.f32.mrb[1].mxu1 }
 0x27c   : > { %v1346_v52 = vpop.f32.mrb[2].mxu1 }
 0x27d   : > { %v1759_v53 = vpop.f32.mrb[3].mxu1 }
 0x28a   : > { %v1353_v54 = vpop.f32.mrb[4].mxu1 }
 0x28b   : > { %v544_v55 = vpop.f32.mrb[5].mxu1  ;;  %v564_v56 = vsel %vm390_vm1, %v1353_v54, -inf }
 0x28c   : > { %565 = vmax.xlane.f32.xlu0 %v564_v56  ;;  %v1354_v57 = vpop.f32.mrb[6].mxu1  ;;  %v558_v58 = vsel %vm383_vm2, %v544_v55, -inf }
 0x28d   : > { %559 = vmax.xlane.f32.xlu1 %v558_v58  ;;  %v547_v59 = vpop.f32.mrb[7].mxu1 }
 0x28e   : > { %v561_v60 = vsel %vm383_vm2, %v547_v59, -inf }
 0x290   : > { %562 = vmax.xlane.f32.xlu0 %v561_v60 }
 0x29e   : > { %594 = vrot.lane.b32.xlu1 %v1726_v26, %s1588_s17 }
 0x2a2   : > { %667 = vrot.lane.b32.xlu1 %v1692_v3, %s1590_s26 }
 0x2a6   : > { %592 = vrot.lane.b32.xlu0 %v1723_v24, %s1588_s17  ;;  %669 = vrot.lane.b32.xlu1 %v1694_v4, %s1590_s26  ;;  %s1953_s17 = scalar_lea.sflag [#allocation3], %s280_s11 }
 0x2aa   : > { %663 = vrot.lane.b32.xlu0 %v1700_v10, %s1590_s26  ;;  %665 = vrot.lane.b32.xlu1 %v1708_v14, %s1590_s26 }
 0x2ae   : > { %765 = vrot.lane.b32.xlu1 %v1726_v26, %s1590_s26 }
 0x319   : > { %v566_v61 = vpop.xlane.xlu0 %565 }
 0x31a   : > { %v569_v62 = vsub.f32 %v1353_v54, %v566_v61  ;;  %v560_v63 = vpop.xlane.xlu1 %559 }
 0x31b   : > { %v567_v0 = vsub.f32 %v544_v55, %v560_v63 }
 0x31c   : > { %v574_v1 = vmul.f32 1.442695, %v569_v62 }
 0x31d   : > { %v570_v2 = vmul.f32 1.442695, %v567_v0  ;;  %v563_v5 = vpop.xlane.xlu0 %562 }
 0x31e   : > { %v568_v6 = vsub.f32 %v547_v59, %v563_v5  ;;  %v595_v7 = vpop.permute.xlu1 %594  ;;  %1482 = vpow2.f32 %v574_v1 }
 0x31f   : > { %v604_v9 = vand.u32 %v595_v7, %v1729_v28  ;;  %1484 = vpow2.f32 %v570_v2 }
 0x320   : > { %v572_v8 = vmul.f32 1.442695, %v568_v6 }
 0x321   : > { %v593_v11 = vpop.permute.xlu0 %592 }
 0x322   : > { %1486 = vpow2.f32 %v572_v8  ;;  %1355 = vmatprep.subr.bf16.mxu0 %v593_v11  ;;  %v668_v12 = vpop.permute.xlu1 %667 }
 0x323   : > { %1356 = vmatpush3.bf16.msra.mxu0 %v593_v11  ;;  %v678_v18 = vsel %vm322_vm0, %v668_v12, 0 }
 0x324   : > { %1357 = vmatprep.subr.bf16.mxu0 %v604_v9 }
 0x325   : > { %v664_v20 = vpop.permute.xlu0 %663 }
 0x326   : > { %v670_v21 = vpop.permute.xlu1 %669 }
 0x327   : > { %1358 = vmatpush3.bf16.msra.mxu0 %v604_v9  ;;  %v681_v22 = vsel %vm322_vm0, %v670_v21, 0 }
 0x328   : > { %1407 = vmatprep.subr.msk.bf16.mxu0 %vm322_vm0, %v668_v12  ;;  %v1780_v13 = vpop.eup %1482 }
 0x329   : > { %v1782_v15 = vpop.eup %1484  ;;  %v589_v19 = vpack.c.bf16 %v1780_v13, %v1780_v13 }
 0x32a   : > { %v666_v23 = vpop.permute.xlu1 %665 }
 0x32c   : > { %v1784_v16 = vpop.eup %1486 }
 0x32d   : > { %v588_v17 = vpack.c.bf16 %v1784_v16, %v1782_v15 }
 0x32e   : > { %v766_v38 = vpop.permute.xlu1 %765 }
 0x32f   : > { %1359 = vmatprep.mubr.msk.bf16.mxu0 %vm383_vm2, %v588_v17  ;;  %v775_v52 = vand.u32 %v766_v38, %v1729_v28  ;;  %v576_v17 = vsel %vm383_vm2, %v1782_v15, 0.0 }
 0x330   : > { %1360 = vmatmul.mubr.msk.bf16.vlgmr.msra.gmra.mrb[4].mxu0 %vm383_vm2, %v589_v19 }
 0x331   : > { %1364 = vmatpush3.bf16.xpose.msra.mxu0 %v678_v18  ;;  %1367 = vmatprep.mubr.msk.bf16.mxu0 %vm322_vm0, %v664_v20  ;;  %v579_v18 = vsel %vm383_vm2, %v1784_v16, 0.0  ;;  %v582_v20 = vsel %vm390_vm1, %v1780_v13, 0.0 }
 0x332   : > { %1408 = vmatprep.subr.msk.bf16.mxu0 %vm322_vm0, %v670_v21 }
 0x339   : > { %1366 = vmatpush3.bf16.xpose.msra.mxu0 %v681_v22 }
 0x340   : > { %1368 = vmatmul.mubr.msk.bf16.vlgmr.msra.gmra.mrb[8].mxu0 %vm322_vm0, %v666_v23 }
 0x403   : > { %v1797_v25 = vpop.f32.mrb[4].mxu0 }
 0x404   : > { %v1799_v27 = vpop.f32.mrb[5].mxu0 }
 0x405   : > { %v1362_v29 = vpop.f32.mrb[6].mxu0 }
 0x406   : > { %v1801_v30 = vpop.f32.mrb[7].mxu0 }
 0x413   : > { %v1369_v31 = vpop.f32.mrb[8].mxu0 }
 0x414   : > { %v717_v32 = vpop.f32.mrb[9].mxu0  ;;  %v737_v33 = vsel %vm390_vm1, %v1369_v31, -inf }
 0x415   : > { %738 = vmax.xlane.f32.xlu0 %v737_v33  ;;  %v1370_v34 = vpop.f32.mrb[10].mxu0  ;;  %v731_v37 = vsel %vm383_vm2, %v717_v32, -inf }
 0x416   : > { %v720_v35 = vpop.f32.mrb[11].mxu0 }
 0x417   : > { %v734_v36 = vsel %vm383_vm2, %v720_v35, -inf }
 0x418   : > { %735 = vmax.xlane.f32.xlu1 %v734_v36 }
 0x419   : > { %732 = vmax.xlane.f32.xlu0 %v731_v37 }
 0x429   : > { %838 = vrot.lane.b32.xlu1 %v1692_v3, %s1591_s28 }
 0x42d   : > { %834 = vrot.lane.b32.xlu1 %v1700_v10, %s1591_s28 }
 0x42f   : > { %763 = vrot.lane.b32.xlu0 %v1723_v24, %s1590_s26 }
 0x433   : > { %840 = vrot.lane.b32.xlu0 %v1694_v4, %s1591_s28 }
 0x437   : > { %836 = vrot.lane.b32.xlu0 %v1708_v14, %s1591_s28 }
 0x4a2   : > { %v739_v39 = vpop.xlane.xlu0 %738 }
 0x4a3   : > { %v742_v43 = vsub.f32 %v1369_v31, %v739_v39 }
 0x4a5   : > { %v747_v44 = vmul.f32 1.442695, %v742_v43  ;;  %v736_v45 = vpop.xlane.xlu1 %735 }
 0x4a6   : > { %v741_v46 = vsub.f32 %v720_v35, %v736_v45  ;;  %v733_v47 = vpop.xlane.xlu0 %732 }
 0x4a7   : > { %v740_v3 = vsub.f32 %v717_v32, %v733_v47  ;;  %1488 = vpow2.f32 %v747_v44 }
 0x4a8   : > { %v745_v48 = vmul.f32 1.442695, %v741_v46 }
 0x4a9   : > { %v743_v10 = vmul.f32 1.442695, %v740_v3  ;;  %v839_v4 = vpop.permute.xlu1 %838 }
 0x4aa   : > { %1490 = vpow2.f32 %v745_v48  ;;  %v764_v49 = vpop.permute.xlu0 %763  ;;  %v849_v57 = vsel %vm322_vm0, %v839_v4, 0  ;;  %v403_v48 = vsel %vm383_vm2, %v1740_v41, 0.0 }
 0x4ab   : > { %1492 = vpow2.f32 %v743_v10  ;;  %1371 = vmatprep.subr.bf16.mxu1 %v764_v49  ;;  %v406_v10 = vsel %vm383_vm2, %v1742_v42, 0.0 }
 0x4ac   : > { %1372 = vmatpush3.bf16.msra.mxu1 %v764_v49  ;;  %v409_v49 = vsel %vm390_vm1, %v1738_v40, 0.0 }
 0x4ad   : > { %1373 = vmatprep.subr.bf16.mxu1 %v775_v52  ;;  %v835_v59 = vpop.permute.xlu1 %834 }
 0x4ae   : > { %v841_v60 = vpop.permute.xlu0 %840 }
 0x4af   : > { %v852_v61 = vsel %vm322_vm0, %v841_v60, 0 }
 0x4b0   : > { %1374 = vmatpush3.bf16.msra.mxu1 %v775_v52 }
 0x4b1   : > { %1409 = vmatprep.subr.msk.bf16.mxu1 %vm322_vm0, %v839_v4  ;;  %v1818_v14 = vpop.eup %1488 }
 0x4b2   : > { %v762_v58 = vpack.c.bf16 %v1818_v14, %v1818_v14  ;;  %v837_v62 = vpop.permute.xlu0 %836 }
 0x4b4   : > { %v1820_v54 = vpop.eup %1490 }
 0x4b5   : > { %v1822_v55 = vpop.eup %1492 }
 0x4b6   : > { %v761_v56 = vpack.c.bf16 %v1820_v54, %v1822_v55  ;;  %v749_v19 = vsel %vm383_vm2, %v1822_v55, 0.0 }
 0x4b8   : > { %1375 = vmatprep.mubr.msk.bf16.mxu1 %vm383_vm2, %v761_v56 }
 0x4b9   : > { %1376 = vmatmul.mubr.msk.bf16.vlgmr.msra.gmra.mrb[8].mxu1 %vm383_vm2, %v762_v58 }
 0x4ba   : > { %1380 = vmatpush3.bf16.xpose.msra.mxu1 %v849_v57  ;;  %1383 = vmatprep.mubr.msk.bf16.mxu1 %vm322_vm0, %v835_v59 }
 0x4bb   : > { %1410 = vmatprep.subr.msk.bf16.mxu1 %vm322_vm0, %v841_v60 }
 0x4c2   : > { %1382 = vmatpush3.bf16.xpose.msra.mxu1 %v852_v61 }
 0x4c9   : > { %1384 = vmatmul.mubr.msk.bf16.vlgmr.msra.gmra.mrb[12].mxu1 %vm322_vm0, %v837_v62 }
 0x58c   : > { %v1835_v63 = vpop.f32.mrb[8].mxu1 }
 0x58d   : > { %v1837_v0 = vpop.f32.mrb[9].mxu1 }
 0x58e   : > { %v1378_v1 = vpop.f32.mrb[10].mxu1 }
 0x58f   : > { %v1839_v2 = vpop.f32.mrb[11].mxu1 }
 0x59c   : > { %v1385_v5 = vpop.f32.mrb[12].mxu1 }
 0x59d   : > { %v888_v6 = vpop.f32.mrb[13].mxu1  ;;  %v908_v7 = vsel %vm390_vm1, %v1385_v5, -inf }
 0x59e   : > { %909 = vmax.xlane.f32.xlu0 %v908_v7  ;;  %v1386_v8 = vpop.f32.mrb[14].mxu1  ;;  %v902_v9 = vsel %vm383_vm2, %v888_v6, -inf }
 0x59f   : > { %903 = vmax.xlane.f32.xlu1 %v902_v9  ;;  %v891_v11 = vpop.f32.mrb[15].mxu1 }
 0x5a0   : > { %v905_v12 = vsel %vm383_vm2, %v891_v11, -inf }
 0x5a2   : > { %906 = vmax.xlane.f32.xlu0 %v905_v12 }
 0x5b0   : > { %936 = vrot.lane.b32.xlu1 %v1726_v26, %s1591_s28  ;;  %v755_v26 = vsel %vm390_vm1, %v1818_v14, 0.0 }
 0x5b8   : > { %934 = vrot.lane.b32.xlu0 %v1723_v24, %s1591_s28  ;;  %v752_v24 = vsel %vm383_vm2, %v1820_v54, 0.0  ;;  %s1594_s28 = smov 24  }
 0x5d4   : > { %577 = vadd.xlane.f32.xlu1 %v576_v17 }
 0x5d7   : > { %580 = vadd.xlane.f32.xlu0 %v579_v18 }
 0x5d8   : > { %750 = vadd.xlane.f32.xlu1 %v749_v19 }
 0x5db   : > { %583 = vadd.xlane.f32.xlu0 %v582_v20 }
 0x5dc   : > { %756 = vadd.xlane.f32.xlu1 %v755_v26 }
 0x5df   : > { %753 = vadd.xlane.f32.xlu0 %v752_v24 }
 0x62b   : > { %v910_v21 = vpop.xlane.xlu0 %909 }
 0x62c   : > { %v913_v22 = vsub.f32 %v1385_v5, %v910_v21  ;;  %v904_v23 = vpop.xlane.xlu1 %903 }
 0x62d   : > { %v911_v29 = vsub.f32 %v888_v6, %v904_v23 }
 0x62e   : > { %v918_v31 = vmul.f32 1.442695, %v913_v22 }
 0x62f   : > { %v914_v32 = vmul.f32 1.442695, %v911_v29  ;;  %v907_v33 = vpop.xlane.xlu0 %906 }
 0x630   : > { %v912_v34 = vsub.f32 %v891_v11, %v907_v33  ;;  %v937_v35 = vpop.permute.xlu1 %936 }
 0x631   : > { %1494 = vpow2.f32 %v914_v32  ;;  %v946_v37 = vand.u32 %v937_v35, %v1729_v28 }
 0x632   : > { %v916_v36 = vmul.f32 1.442695, %v912_v34  ;;  %1496 = vpow2.f32 %v918_v31 }
 0x633   : > { %v935_v38 = vpop.permute.xlu0 %934 }
 0x634   : > { %1498 = vpow2.f32 %v916_v36  ;;  %1387 = vmatprep.subr.bf16.mxu0 %v935_v38 }
 0x635   : > { %1388 = vmatpush3.bf16.msra.mxu0 %v935_v38 }
 0x636   : > { %1389 = vmatprep.subr.bf16.mxu0 %v946_v37 }
 0x639   : > { %1390 = vmatpush3.bf16.msra.mxu0 %v946_v37 }
 0x63b   : > { %v1861_v39 = vpop.eup %1494 }
 0x63c   : > { %v920_v43 = vsel %vm383_vm2, %v1861_v39, 0.0  ;;  %v1865_v44 = vpop.eup %1496 }
 0x63d   : > { %921 = vadd.xlane.f32.xlu0 %v920_v43  ;;  %v926_v47 = vsel %vm390_vm1, %v1865_v44, 0.0  ;;  %v933_v3 = vpack.c.bf16 %v1865_v44, %v1865_v44 }
 0x63e   : > { %v1867_v45 = vpop.eup %1498 }
 0x63f   : > { %v923_v28 = vsel %vm383_vm2, %v1867_v45, 0.0  ;;  %v932_v46 = vpack.c.bf16 %v1867_v45, %v1861_v39 }
 0x640   : > { %924 = vadd.xlane.f32.xlu1 %v923_v28 }
 0x641   : > { %927 = vadd.xlane.f32.xlu0 %v926_v47  ;;  %1391 = vmatprep.mubr.msk.bf16.mxu0 %vm383_vm2, %v932_v46 }
 0x642   : > { %1392 = vmatmul.mubr.msk.bf16.vlgmr.msra.gmra.mrb[12].mxu0 %vm383_vm2, %v933_v3 }
 0x644   : > { %404 = vadd.xlane.f32.xlu1 %v403_v48 }
 0x645   : > { %407 = vadd.xlane.f32.xlu0 %v406_v10 }
 0x648   : > { %410 = vadd.xlane.f32.xlu1 %v409_v49  ;;  %v1057_v49 = vld [vmem:[%s2007_s3 + $0x18] sm:$0xff] }
 0x661   : > { %v578_v52 = vpop.xlane.xlu1 %577 }
 0x662   : > { %1500 = vrcp.f32 %v578_v52 }
 0x664   : > { %v581_v4 = vpop.xlane.xlu0 %580 }
 0x665   : > { %1502 = vrcp.f32 %v581_v4  ;;  %v751_v56 = vpop.xlane.xlu1 %750 }
 0x668   : > { %v584_v57 = vpop.xlane.xlu0 %583 }
 0x669   : > { %1504 = vrcp.f32 %v584_v57  ;;  %v757_v60 = vpop.xlane.xlu1 %756 }
 0x66a   : > { %1506 = vrcp.f32 %v751_v56 }
 0x66c   : > { %v754_v58 = vpop.xlane.xlu0 %753  ;;  %v1501_v59 = vpop.eup %1500 }
 0x66d   : > { %1508 = vrcp.f32 %v754_v58  ;;  %v654_v62 = vmul.f32 %v1501_v59, %v1799_v27  ;;  %v657_v21 = vmul.f32 %v1501_v59, %v1782_v15 }
 0x66e   : > { %1510 = vrcp.f32 %v757_v60 }
 0x66f   : > { %v1503_v61 = vpop.eup %1502 }
 0x670   : > { %v655_v1 = vmul.f32 %v1503_v61, %v1801_v30  ;;  %v658_v29 = vmul.f32 %v1503_v61, %v1784_v16 }
 0x672   : > { %v1461_v5 = vpack.i.bf16 %v655_v1, %v654_v62 }
 0x673   : > { %v1505_v6 = vpop.eup %1504 }
 0x674   : > { %1462 = vrot.lane.b32.xlu0 %v1461_v5, %s1592_s29  ;;  %v656_v7 = vmul.f32 %v1505_v6, %v1797_v25  ;;  %v1507_v8 = vpop.eup %1506  ;;  %v659_v15 = vmul.f32 %v1505_v6, %v1780_v13 }
 0x675   : > { %v825_v11 = vmul.f32 %v1507_v8, %v1837_v0  ;;  %v828_v34 = vmul.f32 %v1507_v8, %v1822_v55 }
 0x676   : > { %1012 = vrot.lane.b32.xlu1 %v656_v7, %s1592_s29 }
 0x677   : > { %v1509_v9 = vpop.eup %1508 }
 0x678   : > { %v826_v12 = vmul.f32 %v1509_v9, %v1839_v2  ;;  %v1511_v27 = vpop.eup %1510 }
 0x679   : > { %v827_v30 = vmul.f32 %v1511_v27, %v1835_v63  ;;  %v830_v28 = vmul.f32 %v1511_v27, %v1818_v14  ;;  %v1055_v14 = vld [vmem:[%s2007_s3 + $0x8] sm:$0xff] }
 0x67a   : > { %v1466_v17 = vpack.i.bf16 %v826_v12, %v825_v11 }
 0x67c   : > { %1467 = vrot.lane.b32.xlu1 %v1466_v17, %s1593_s9 }
 0x680   : > { %1024 = vrot.lane.b32.xlu1 %v827_v30, %s1593_s9  ;;  %s1413_s9 = smul.u32 384, %s1653_s25  ;;  %s1595_s25 = smov [#allocation2]  }
 0x682   : > { %s1947_s16 = scalar_lea.hbm %s2010_s6, %s1413_s9 }
 0x6ca   : > { %v922_v18 = vpop.xlane.xlu0 %921 }
 0x6cd   : > { %v925_v19 = vpop.xlane.xlu1 %924 }
 0x6ce   : > { %v928_v20 = vpop.xlane.xlu0 %927 }
 0x6d1   : > { %v405_v25 = vpop.xlane.xlu1 %404 }
 0x6d2   : > { %1512 = vrcp.f32 %v405_v25  ;;  %v408_v26 = vpop.xlane.xlu0 %407 }
 0x6d3   : > { %1514 = vrcp.f32 %v408_v26 }
 0x6d4   : > { %1516 = vrcp.f32 %v922_v18 }
 0x6d5   : > { %1518 = vrcp.f32 %v925_v19  ;;  %v411_v0 = vpop.xlane.xlu1 %410 }
 0x6d6   : > { %1520 = vrcp.f32 %v411_v0 }
 0x6d7   : > { %1522 = vrcp.f32 %v928_v20 }
 0x6dc   : > { %v1513_v2 = vpop.eup %1512 }
 0x6dd   : > { %v1515_v24 = vpop.eup %1514  ;;  %v480_v63 = vmul.f32 %v1513_v2, %v1740_v41  ;;  %v1896_v22 = vmul.f32 %v1513_v2, %v1757_v51  ;;  %v829_v41 = vmul.f32 %v1509_v9, %v1820_v54 }
 0x6de   : > { %v1517_v23 = vpop.eup %1516  ;;  %v481_v31 = vmul.f32 %v1515_v24, %v1742_v42  ;;  %v1902_v32 = vmul.f32 %v1515_v24, %v1759_v53 }
 0x6df   : > { %v1519_v33 = vpop.eup %1518  ;;  %v660_v35 = vadd.f32 %v657_v21, %v480_v63  ;;  %v999_v37 = vmul.f32 %v1517_v23, %v1861_v39 }
 0x6e0   : > { %v1521_v36 = vpop.eup %1520  ;;  %v661_v51 = vadd.f32 %v658_v29, %v481_v31  ;;  %v1000_v43 = vmul.f32 %v1519_v33, %v1867_v45  ;;  %v1056_v45 = vld [vmem:[%s2007_s3 + $0x10] sm:$0xff] }
 0x6e1   : > { %v831_v16 = vadd.f32 %v828_v34, %v660_v35  ;;  %v482_v42 = vmul.f32 %v1521_v36, %v1738_v40  ;;  %v479_v53 = vmul.f32 %v1521_v36, %v1755_v50  ;;  %v1523_v38 = vpop.eup %1522  ;;  %v1054_v50 = vld [vmem:[%s2007_s3] sm:$0xff]  ;;  %v1059_v52 = vpack.c.bf16 %v1057_v49, %v1056_v45 }
 0x6e2   : > { %v832_v55 = vadd.f32 %v829_v41, %v661_v51  ;;  %v1001_v54 = vmul.f32 %v1523_v38, %v1865_v44  ;;  %v1058_v44 = vpack.c.bf16 %v1055_v14, %v1054_v50 }
 0x6e3   : > { %v1002_v46 = vadd.f32 %v999_v37, %v831_v16  ;;  %v662_v13 = vadd.f32 %v659_v15, %v482_v42 }
 0x6e4   : > { %v1003_v47 = vadd.f32 %v1000_v43, %v832_v55  ;;  %1395 = vmatprep.subr.bf16.mxu0 %v1058_v44 }
 0x6e5   : > { %v1126_v3 = vmul.f32 0.25, %v1002_v46  ;;  %v833_v48 = vadd.f32 %v830_v28, %v662_v13  ;;  %1396 = vmatpush3.bf16.msra.mxu0 %v1058_v44 }
 0x6e6   : > { %v1127_v10 = vmul.f32 0.25, %v1003_v47  ;;  %1397 = vmatprep.subr.bf16.mxu0 %v1059_v52  ;;  %v1463_v6 = vpop.permute.xlu0 %1462 }
 0x6e7   : > { %v1004_v39 = vadd.f32 %v1001_v54, %v833_v48  ;;  %1129 = vst.msk [vmem:[%s1915_s13] sm:$0xff] %vm383_vm2, %v1126_v3  ;;  %v1465_v8 = vunpack.i.h.bf16 %v1463_v6  ;;  %v1464_v9 = vunpack.i.l.bf16 %v1463_v6 }
 0x6e8   : > { %1130 = vst.msk [vmem:[%s1915_s13 + $0x8] sm:$0xff] %vm383_vm2, %v1127_v10  ;;  %v1013_v1 = vpop.permute.xlu1 %1012 }
 0x6e9   : > { %v1128_v40 = vmul.f32 0.25, %v1004_v39  ;;  %1398 = vmatpush3.bf16.msra.mxu0 %v1059_v52  ;;  %v1042_v27 = vsel %vm322_vm0, %v1902_v32, %v1465_v8  ;;  %v1043_v30 = vsel %vm322_vm0, %v479_v53, %v1013_v1  ;;  %v1041_v19 = vsel %vm322_vm0, %v1896_v22, %v1464_v9 }
 0x6eb   : > { %1131 = vst.msk [vmem:[%s1915_s13 + $0x10] sm:$0x1] %vm390_vm1, %v1128_v40  ;;  %s1528_s13 = sshll.u32 %s1595_s25, 4  ;;  %s1529_s13 = int_to_ptr.vmem [resolvable:$false] %s1528_s13 }
 0x6ec   : > { %s1530_s19 = scalar_lea.vmem %s1529_s13, 768  ;;  %p1531_p0 = scmp.lt.s32.totalorder %s1949_s12, %s1529_s13 }
 0x6ed   : > { %p1532_p1 = scmp.lt.s32.totalorder %s1530_s19, %s1524_s18 }
 0x6ee   : > { %v1468_v5 = vpop.permute.xlu1 %1467 }
 0x6ef   : > { %v1470_v11 = vunpack.i.h.bf16 %v1468_v5  ;;  %v1469_v12 = vunpack.i.l.bf16 %v1468_v5  ;;  %p1533_p2 = por %p1532_p1, %p1531_p0 }
 0x6f1   : > { %v1045_v0 = vsel %vm1044_vm4, %v1041_v19, %v1469_v12  ;;  %v1046_v2 = vsel %vm1044_vm4, %v1042_v27, %v1470_v11  ;;  %p1534_p3 = pnand %p1533_p2, %p1527_p13 }
 0x6f2   : > { %v1025_v7 = vpop.permute.xlu1 %1024 }
 0x6f3   : > { %v1047_v20 = vsel %vm1044_vm4, %v1043_v30, %v1025_v7 }
 0x715   : > { %v1393_v4 = vpop.f32.mrb[12].mxu0 }
 0x716   : > { %v998_v56 = vmul.f32 %v1523_v38, %v1393_v4  ;;  %v982_v57 = vpop.f32.mrb[13].mxu0 }
 0x717   : > { %v996_v58 = vmul.f32 %v1517_v23, %v982_v57  ;;  %v1394_v59 = vpop.f32.mrb[14].mxu0 }
 0x718   : > { %v985_v60 = vpop.f32.mrb[15].mxu0  ;;  %1036 = vrot.lane.b32.xlu1 %v998_v56, %s1594_s28 }
 0x719   : > { %v997_v61 = vmul.f32 %v1519_v33, %v985_v60 }
 0x71b   : > { %v1471_v62 = vpack.i.bf16 %v997_v61, %v996_v58 }
 0x71d   : > { %1472 = vrot.lane.b32.xlu0 %v1471_v62, %s1594_s28 }
 0x78a   : > { %v1037_v17 = vpop.permute.xlu1 %1036 }
 0x78b   : > { %v1051_v24 = vsel %vm1048_vm5, %v1047_v20, %v1037_v17 }
 0x78c   : > { %v1053_v29 = vpack.c.bf16 %v1051_v24, %v1051_v24 }
 0x78f   : > { %v1473_v18 = vpop.permute.xlu0 %1472 }
 0x790   : > { %v1475_v25 = vunpack.i.h.bf16 %v1473_v18  ;;  %v1474_v26 = vunpack.i.l.bf16 %v1473_v18 }
 0x792   : > { %v1049_v21 = vsel %vm1048_vm5, %v1045_v0, %v1474_v26  ;;  %v1050_v63 = vsel %vm1048_vm5, %v1046_v2, %v1475_v25 }
 0x793   : > { %v1052_v23 = vpack.c.bf16 %v1050_v63, %v1049_v21 }
 0x795   : > { %1399 = vmatprep.mubr.msk.bf16.mxu0 %vm1067_vm6, %v1052_v23 }
 0x796   : > { %1400 = vmatmul.mubr.msk.bf16.vlgmr.msra.gmra.mrb[16].mxu0 %vm1067_vm6, %v1053_v29 }
 0x797   : > { %1537 = shalt.err (!%p1534_p3)
}
 0x798   : > { %s1538_s11 = scalar_lea.hbm %s1947_s16, 384  ;;  %s1542_s28 = scalar_lea.hbm %s2010_s6, 1536 }
 0x799   : > { %p1539_p4 = scmp.ne.s32.totalorder %s1947_s16, %s1538_s11  ;;  %p1543_p9 = scmp.lt.u32.totalorder %s1947_s16, %s2010_s6 }
 0x79a   : > { %p1544_p10 = scmp.lt.u32.totalorder %s1542_s28, %s1538_s11  ;;  %p1546_p12 = scmp.lt.u32.totalorder %s1538_s11, %s1947_s16 }
 0x79b   : > { %p1540_p7 = pnand %p1539_p4, %p1670_p5 }
 0x79c   : > { %p1545_p11 = por %p1544_p10, %p1543_p9 }
 0x79d   : > { %p1541_p8 = pneg %p1540_p7 }
 0x79e   : > { %p1547_p13 = por %p1546_p12, %p1545_p11 }
 0x7a0   : > { %p1548_p0 = pnand %p1547_p13, %p1541_p8 }
 0x7a2   : > { %1551 = shalt.err (!%p1548_p0)
}
 0x7a3   : > { %s1596_s15 = smov 128   ;;  %v1289_v22 = vld [vmem:[%s2008_s4] ss:$0 sm:$0xff]  ;;  %s302_s11 = scalar_lea.vmem %s2009_s5, %s1682_s10  ;;  %vm1124_vm7 = vcmask 253952  }
 0x7a4   : > { %1414 = dma.vmem_to_hbm [thread:$0]  (%p1670_p5), %s1949_s12, 384, %s1947_s16, %s1953_s17, %s1596_s15, %s1596_s15, %s1592_s29  }
 0x869   : > { %v1401_v31 = vpop.f32.mrb[16].mxu0 }
 0x86a   : > { %v1117_v32 = vadd.f32 %v1401_v31, %v1289_v22  ;;  %v1108_v33 = vpop.f32.mrb[17].mxu0 }
 0x86b   : > { %v1109_v34 = vadd.f32 %v1289_v22, %v1108_v33  ;;  %v1402_v35 = vpop.f32.mrb[18].mxu0 }
 0x86c   : > { %1125 = vst.msk [vmem:[%s302_s11 + $0x10] sm:$0x1] %vm1124_vm7, %v1117_v32  ;;  %v1111_v36 = vpop.f32.mrb[19].mxu0 }
 0x86d   : > { %1122 = vst.msk [vmem:[%s302_s11] sm:$0xff] %vm1067_vm6, %v1109_v34  ;;  %v1112_v15 = vadd.f32 %v1289_v22, %v1111_v36 }
 0x86f   : > { %1123 = vst.msk [vmem:[%s302_s11 + $0x8] sm:$0xff] %vm1067_vm6, %v1112_v15 }
 0x870 PF: > { %p1420_p5 = scmp.ge.s32.totalorder %s1586_s24, 2  ;;  %s1177_s7 = sand.u32 1, %s1574_s21  }
 0x871   : > { %s1178_s10 = scalar_lea.sflag [#allocation3], %s1177_s7 }
 0x872   : > { %p1417_p1 = pnand %p1420_p5, %p1674_p6 }
 0x874   : > { %1569 = dma.done.wait (!%p1417_p1), %s1178_s10, 384  }
 0x875   : > { %1571 = vsyncadd (!%p1417_p1), %s1178_s10, 4294966912  ;;  %p17_p2 = scmp.ge.s32.totalorder %s1657_s27, 6   ;;  %s2013_s21 = smov %s1578_s22 }
 0x876   : > { %s2014_s22 = smov %s1582_s23  ;;  %s2015_s23 = smov %s1668_s30 }
 0x877   : > { %s2016_s24 = smov %s1657_s27  ;;  %19 = sbr.rel (!%p17_p2) target bundleno = 3 (0x3), region = 93 }
 0x87e   :  { %1183 = vsyncpa [#allocation3], 1 }
 0x87f   :  { %1185 = vsyncpa [#allocation3 + $0x1], 1 }

// kernel: visual_transformer_forward.27
= control target key start
LH: loop header
LB: loop body
LE: loop exit
PB: predicated region body
PF: predicated region fallthrough
CT: control target
= control target key end

     0   :  { %v479_v0 = vmov 0.0   ;;  %vm480_vm0 = vmmov 0   ;;  %vm48_vm1 = vcmask 261120   ;;  %s710_s1 = inlined_call_operand.vmem [shape: f32[32,128], index: 1, kind: input, shape index: {}]   ;;  %s711_s0 = inlined_call_operand.vmem [shape: f32[72,32], index: 0, kind: input, shape index: {}]   ;;  %s712_s3 = inlined_call_operand.vmem [shape: f32[128,32], index: 3, kind: input, shape index: {}]   ;;  %s713_s2 = inlined_call_operand.vmem [shape: f32[1,128], index: 2, kind: input, shape index: {}]   ;;  %s714_s4 = inlined_call_operand.vmem [shape: f32[1,32], index: 4, kind: input, shape index: {}]   ;;  %s715_s5 = inlined_call_operand.vmem [shape: f32[72,32], index: 5, kind: output, shape index: {}]  }
   0x1   :  { %365 = vmatprep.subr.bf16.mxu0 %v479_v0  ;;  %v35_v1 = vld [vmem:[%s710_s1] sm:$0xff]  ;;  %v36_v2 = vld [vmem:[%s710_s1 + $0x8] sm:$0xff]  ;;  %v37_v3 = vld [vmem:[%s710_s1 + $0x10] sm:$0xff]  ;;  %369 = vmatprep.mubr.msk.bf16.mxu0 %vm480_vm0, %v479_v0 }
   0x2   :  { %v39_v4 = vpack.c.bf16 %v36_v2, %v35_v1  ;;  %v38_v5 = vld [vmem:[%s710_s1 + $0x18] sm:$0xff]  ;;  %425 = vmatprep.subr.bf16.mxu1 %v479_v0  ;;  %409 = vmatprep.mubr.msk.bf16.mxu1 %vm480_vm0, %v479_v0  ;;  %v21_v7 = vld [vmem:[%s711_s0] sm:$0xff]  ;;  %v22_v8 = vld [vmem:[%s711_s0 + $0x8] sm:$0xff] }
   0x3   :  { %v40_v6 = vpack.c.bf16 %v38_v5, %v37_v3  ;;  %v30_v9 = vpack.c.bf16 %v22_v8, %v21_v7  ;;  %v23_v10 = vld [vmem:[%s711_s0 + $0x10] sm:$0xff]  ;;  %v24_v11 = vld [vmem:[%s711_s0 + $0x18] sm:$0xff]  ;;  %v25_v13 = vld [vmem:[%s711_s0 + $0x20] sm:$0xff] }
   0x4   :  { %366 = vmatpush3.bf16.msra.mxu0 %v39_v4  ;;  %v31_v12 = vpack.c.bf16 %v24_v11, %v23_v10  ;;  %v26_v14 = vld [vmem:[%s711_s0 + $0x28] sm:$0xff]  ;;  %v27_v16 = vld [vmem:[%s711_s0 + $0x30] sm:$0xff]  ;;  %v28_v17 = vld [vmem:[%s711_s0 + $0x38] sm:$0xff] }
   0x5   :  { %367 = vmatprep.subr.bf16.mxu0 %v479_v0  ;;  %v32_v15 = vpack.c.bf16 %v26_v14, %v25_v13  ;;  %v33_v18 = vpack.c.bf16 %v28_v17, %v27_v16  ;;  %v29_v19 = vld [vmem:[%s711_s0 + $0x40] sm:$0xff]  ;;  %v214_v22 = vld [vmem:[%s712_s3 + $0x8] sm:$0xff]  ;;  %v215_v24 = vld [vmem:[%s712_s3 + $0x10] sm:$0xff] }
   0x6   :  { %v34_v20 = vpack.c.bf16 %v29_v19, %v29_v19  ;;  %v213_v21 = vld [vmem:[%s712_s3] sm:$0xff]  ;;  %v216_v25 = vld [vmem:[%s712_s3 + $0x18] sm:$0xff]  ;;  %v218_v28 = vld [vmem:[%s712_s3 + $0x28] sm:$0xff] }
   0x7   :  { %v229_v23 = vpack.c.bf16 %v214_v22, %v213_v21  ;;  %v230_v26 = vpack.c.bf16 %v216_v25, %v215_v24  ;;  %v217_v27 = vld [vmem:[%s712_s3 + $0x20] sm:$0xff]  ;;  %v219_v30 = vld [vmem:[%s712_s3 + $0x30] sm:$0xff]  ;;  %v220_v31 = vld [vmem:[%s712_s3 + $0x38] sm:$0xff] }
   0x8   :  { %368 = vmatpush3.bf16.msra.mxu0 %v40_v6  ;;  %v231_v29 = vpack.c.bf16 %v218_v28, %v217_v27  ;;  %v232_v32 = vpack.c.bf16 %v220_v31, %v219_v30  ;;  %v221_v33 = vld [vmem:[%s712_s3 + $0x40] sm:$0xff]  ;;  %v222_v34 = vld [vmem:[%s712_s3 + $0x48] sm:$0xff]  ;;  %v223_v36 = vld [vmem:[%s712_s3 + $0x50] sm:$0xff] }
   0x9   :  { %389 = vmatprep.subr.bf16.mxu0 %v479_v0  ;;  %433 = vmatpush3.bf16.msra.mxu1 %v229_v23  ;;  %v233_v35 = vpack.c.bf16 %v222_v34, %v221_v33  ;;  %v224_v37 = vld [vmem:[%s712_s3 + $0x58] sm:$0xff]  ;;  %v225_v39 = vld [vmem:[%s712_s3 + $0x60] sm:$0xff]  ;;  %v226_v40 = vld [vmem:[%s712_s3 + $0x68] sm:$0xff] }
   0xa   :  { %426 = vmatprep.subr.bf16.mxu1 %v479_v0  ;;  %v234_v38 = vpack.c.bf16 %v224_v37, %v223_v36  ;;  %v235_v41 = vpack.c.bf16 %v226_v40, %v225_v39  ;;  %v227_v42 = vld [vmem:[%s712_s3 + $0x70] sm:$0xff]  ;;  %v228_v43 = vld [vmem:[%s712_s3 + $0x78] sm:$0xff]  ;;  %v638_v45 = vld [vmem:[%s713_s2] ss:$0 sm:$0xff] }
   0xb   :  { %370 = vmatmul.mubr.msk.bf16.vlgmr.msra.gmra.mrb[0].mxu0 %vm48_vm1, %v30_v9  ;;  %v236_v44 = vpack.c.bf16 %v228_v43, %v227_v42 }
   0xc   :  { %373 = vmatprep.mubr.msk.bf16.mxu0 %vm480_vm0, %v479_v0  ;;  %390 = vmatpush3.bf16.msra.mxu0 %v229_v23 }
   0xd   :  { %391 = vmatprep.subr.bf16.mxu0 %v479_v0  ;;  %434 = vmatpush3.bf16.msra.mxu1 %v230_v26 }
   0xe   :  { %427 = vmatprep.subr.bf16.mxu1 %v479_v0 }
  0x10   :  { %392 = vmatpush3.bf16.msra.mxu0 %v230_v26 }
  0x11   :  { %393 = vmatprep.subr.bf16.mxu0 %v479_v0  ;;  %435 = vmatpush3.bf16.msra.mxu1 %v231_v29 }
  0x12   :  { %428 = vmatprep.subr.bf16.mxu1 %v479_v0 }
  0x13   :  { %374 = vmatmul.mubr.msk.bf16.gmra.mrb[4].mxu0 %vm48_vm1, %v31_v12 }
  0x14   :  { %377 = vmatprep.mubr.msk.bf16.mxu0 %vm480_vm0, %v479_v0  ;;  %394 = vmatpush3.bf16.msra.mxu0 %v231_v29 }
  0x15   :  { %395 = vmatprep.subr.bf16.mxu0 %v479_v0  ;;  %436 = vmatpush3.bf16.msra.mxu1 %v232_v32 }
  0x16   :  { %429 = vmatprep.subr.bf16.mxu1 %v479_v0 }
  0x18   :  { %396 = vmatpush3.bf16.msra.mxu0 %v232_v32 }
  0x19   :  { %397 = vmatprep.subr.bf16.mxu0 %v479_v0  ;;  %437 = vmatpush3.bf16.msra.mxu1 %v233_v35 }
  0x1a   :  { %430 = vmatprep.subr.bf16.mxu1 %v479_v0 }
  0x1b   :  { %378 = vmatmul.mubr.msk.bf16.gmra.mrb[8].mxu0 %vm48_vm1, %v32_v15 }
  0x1c   :  { %381 = vmatprep.mubr.msk.bf16.mxu0 %vm480_vm0, %v479_v0  ;;  %398 = vmatpush3.bf16.msra.mxu0 %v233_v35 }
  0x1d   :  { %399 = vmatprep.subr.bf16.mxu0 %v479_v0  ;;  %438 = vmatpush3.bf16.msra.mxu1 %v234_v38 }
  0x1e   :  { %431 = vmatprep.subr.bf16.mxu1 %v479_v0 }
  0x20   :  { %400 = vmatpush3.bf16.msra.mxu0 %v234_v38 }
  0x21   :  { %401 = vmatprep.subr.bf16.mxu0 %v479_v0  ;;  %439 = vmatpush3.bf16.msra.mxu1 %v235_v41 }
  0x22   :  { %432 = vmatprep.subr.bf16.mxu1 %v479_v0 }
  0x23   :  { %382 = vmatmul.mubr.msk.bf16.gmra.mrb[12].mxu0 %vm48_vm1, %v33_v18 }
  0x24   :  { %385 = vmatprep.mubr.msk.bf16.mxu0 %vm480_vm0, %v479_v0  ;;  %402 = vmatpush3.bf16.msra.mxu0 %v235_v41 }
  0x25   :  { %403 = vmatprep.subr.bf16.mxu0 %v479_v0  ;;  %440 = vmatpush3.bf16.msra.mxu1 %v236_v44 }
  0x28   :  { %404 = vmatpush3.bf16.msra.mxu0 %v236_v44 }
  0x2b   :  { %386 = vmatmul.mubr.msk.bf16.gmra.mrb[16].mxu0 %vm48_vm1, %v34_v20 }
  0x2c   :  { %405 = vmatprep.mubr.msk.bf16.mxu0 %vm480_vm0, %v479_v0 }
  0xde   :  { %v98_v46 = vpop.f32.mrb[0].mxu0 }
  0xdf   :  { %v99_v47 = vadd.f32 %v638_v45, %v98_v46  ;;  %v371_v48 = vpop.f32.mrb[1].mxu0 }
  0xe0   :  { %v101_v49 = vpop.f32.mrb[2].mxu0 }
  0xe1   :  { %v335_v50 = vmul.f32 -1.702, %v99_v47  ;;  %v102_v51 = vadd.f32 %v638_v45, %v101_v49  ;;  %v372_v52 = vpop.f32.mrb[3].mxu0 }
  0xe3   :  { %v154_v53 = vmul.f32 1.442695, %v335_v50  ;;  %v336_v54 = vmul.f32 -1.702, %v102_v51 }
  0xe5   :  { %443 = vpow2.f32 %v154_v53  ;;  %v156_v55 = vmul.f32 1.442695, %v336_v54 }
  0xe6   :  { %v106_v56 = vpop.f32.mrb[4].mxu0 }
  0xe7   :  { %445 = vpow2.f32 %v156_v55  ;;  %v643_v57 = vadd.f32 %v638_v45, %v106_v56  ;;  %v375_v58 = vpop.f32.mrb[5].mxu0 }
  0xe8   :  { %v109_v59 = vpop.f32.mrb[6].mxu0 }
  0xe9   :  { %v337_v60 = vmul.f32 -1.702, %v643_v57  ;;  %v647_v61 = vadd.f32 %v638_v45, %v109_v59  ;;  %v376_v62 = vpop.f32.mrb[7].mxu0 }
  0xeb   :  { %v158_v63 = vmul.f32 1.442695, %v337_v60  ;;  %v338_v1 = vmul.f32 -1.702, %v647_v61 }
  0xed   :  { %447 = vpow2.f32 %v158_v63  ;;  %v160_v2 = vmul.f32 1.442695, %v338_v1 }
  0xee   :  { %v114_v3 = vpop.f32.mrb[8].mxu0 }
  0xef   :  { %v444_v4 = vpop.eup %443  ;;  %449 = vpow2.f32 %v160_v2  ;;  %v651_v5 = vadd.f32 %v638_v45, %v114_v3  ;;  %v379_v6 = vpop.f32.mrb[9].mxu0 }
  0xf0   :  { %v172_v7 = vadd.f32 1.0, %v444_v4  ;;  %v117_v8 = vpop.f32.mrb[10].mxu0 }
  0xf1   :  { %v446_v9 = vpop.eup %445  ;;  %v339_v10 = vmul.f32 -1.702, %v651_v5  ;;  %v655_v11 = vadd.f32 %v638_v45, %v117_v8  ;;  %v380_v12 = vpop.f32.mrb[11].mxu0  ;;  %v344_v8 = vld [vmem:[%s714_s4] ss:$0 sm:$0xff] }
  0xf2   :  { %451 = vrcp.f32 %v172_v7  ;;  %v173_v13 = vadd.f32 1.0, %v446_v9 }
  0xf3   :  { %v162_v14 = vmul.f32 1.442695, %v339_v10  ;;  %v340_v15 = vmul.f32 -1.702, %v655_v11 }
  0xf4   :  { %453 = vrcp.f32 %v173_v13 }
  0xf5   :  { %455 = vpow2.f32 %v162_v14  ;;  %v164_v16 = vmul.f32 1.442695, %v340_v15 }
  0xf6   :  { %v122_v17 = vpop.f32.mrb[12].mxu0 }
  0xf7   :  { %v448_v18 = vpop.eup %447  ;;  %457 = vpow2.f32 %v164_v16  ;;  %v123_v19 = vadd.f32 %v638_v45, %v122_v17  ;;  %v383_v20 = vpop.f32.mrb[13].mxu0 }
  0xf8   :  { %v174_v21 = vadd.f32 1.0, %v448_v18  ;;  %v125_v22 = vpop.f32.mrb[14].mxu0 }
  0xf9   :  { %v450_v23 = vpop.eup %449  ;;  %v341_v24 = vmul.f32 -1.702, %v123_v19  ;;  %v126_v25 = vadd.f32 %v638_v45, %v125_v22  ;;  %v384_v26 = vpop.f32.mrb[15].mxu0 }
  0xfa   :  { %459 = vrcp.f32 %v174_v21  ;;  %v175_v27 = vadd.f32 1.0, %v450_v23 }
  0xfb   :  { %v166_v28 = vmul.f32 1.442695, %v341_v24  ;;  %v342_v29 = vmul.f32 -1.702, %v126_v25 }
  0xfc   :  { %v452_v30 = vpop.eup %451  ;;  %461 = vrcp.f32 %v175_v27 }
  0xfd   :  { %463 = vpow2.f32 %v166_v28  ;;  %v168_v31 = vmul.f32 1.442695, %v342_v29  ;;  %v199_v35 = vmul.f32 %v452_v30, %v99_v47 }
  0xfe   :  { %v454_v32 = vpop.eup %453  ;;  %v130_v33 = vpop.f32.mrb[16].mxu0 }
  0xff   :  { %v456_v34 = vpop.eup %455  ;;  %v200_v36 = vmul.f32 %v454_v32, %v102_v51  ;;  %465 = vpow2.f32 %v168_v31  ;;  %v131_v37 = vadd.f32 %v638_v45, %v130_v33  ;;  %v387_v38 = vpop.f32.mrb[17].mxu0 }
 0x100   :  { %v176_v39 = vadd.f32 1.0, %v456_v34  ;;  %v133_v40 = vpop.f32.mrb[18].mxu0 }
 0x101   :  { %v458_v41 = vpop.eup %457  ;;  %v208_v42 = vpack.c.bf16 %v200_v36, %v199_v35  ;;  %v343_v43 = vmul.f32 -1.702, %v131_v37  ;;  %v388_v44 = vpop.f32.mrb[19].mxu0 }
 0x102   :  { %467 = vrcp.f32 %v176_v39  ;;  %v177_v46 = vadd.f32 1.0, %v458_v41 }
 0x103   :  { %v170_v48 = vmul.f32 1.442695, %v343_v43  ;;  %406 = vmatmul.mubr.bf16.vlgmr.msra.gmra.mrb[20].mxu0 %v208_v42 }
 0x104   :  { %v460_v49 = vpop.eup %459  ;;  %469 = vrcp.f32 %v177_v46 }
 0x105   :  { %471 = vpow2.f32 %v170_v48  ;;  %v201_v51 = vmul.f32 %v460_v49, %v643_v57 }
 0x106   :  { %v462_v50 = vpop.eup %461 }
 0x107   :  { %v464_v47 = vpop.eup %463  ;;  %v202_v45 = vmul.f32 %v462_v50, %v647_v61 }
 0x108   :  { %v178_v52 = vadd.f32 1.0, %v464_v47 }
 0x109   :  { %v466_v53 = vpop.eup %465  ;;  %v209_v54 = vpack.c.bf16 %v202_v45, %v201_v51 }
 0x10a   :  { %473 = vrcp.f32 %v178_v52  ;;  %v179_v55 = vadd.f32 1.0, %v466_v53 }
 0x10b   :  { %410 = vmatmul.mubr.bf16.vlgmr.msra.gmra.mrb[0].mxu1 %v209_v54 }
 0x10c   :  { %v468_v56 = vpop.eup %467  ;;  %475 = vrcp.f32 %v179_v55  ;;  %413 = vmatprep.mubr.msk.bf16.mxu1 %vm480_vm0, %v479_v0 }
 0x10d   :  { %v203_v60 = vmul.f32 %v468_v56, %v651_v5 }
 0x10e   :  { %v470_v58 = vpop.eup %469 }
 0x10f   :  { %v472_v59 = vpop.eup %471  ;;  %v204_v62 = vmul.f32 %v470_v58, %v655_v11 }
 0x110   :  { %v180_v57 = vadd.f32 1.0, %v472_v59 }
 0x111   :  { %v210_v63 = vpack.c.bf16 %v204_v62, %v203_v60 }
 0x112   :  { %477 = vrcp.f32 %v180_v57 }
 0x113   :  { %414 = vmatmul.mubr.bf16.gmra.mrb[4].mxu1 %v210_v63 }
 0x114   :  { %v474_v61 = vpop.eup %473  ;;  %417 = vmatprep.mubr.msk.bf16.mxu1 %vm480_vm0, %v479_v0 }
 0x115   :  { %v205_v2 = vmul.f32 %v474_v61, %v123_v19 }
 0x116   :  { %v476_v1 = vpop.eup %475 }
 0x117   :  { %v206_v3 = vmul.f32 %v476_v1, %v126_v25 }
 0x119   :  { %v211_v4 = vpack.c.bf16 %v206_v3, %v205_v2 }
 0x11b   :  { %418 = vmatmul.mubr.bf16.gmra.mrb[8].mxu1 %v211_v4 }
 0x11c   :  { %v478_v6 = vpop.eup %477  ;;  %421 = vmatprep.mubr.msk.bf16.mxu1 %vm480_vm0, %v479_v0 }
 0x11d   :  { %v207_v5 = vmul.f32 %v478_v6, %v131_v37 }
 0x11f   :  { %v212_v7 = vpack.c.bf16 %v207_v5, %v207_v5 }
 0x123   :  { %422 = vmatmul.mubr.bf16.gmra.mrb[12].mxu1 %v212_v7 }
 0x1d6   :  { %v278_v9 = vpop.f32.mrb[20].mxu0 }
 0x1d7   :  { %v279_v10 = vadd.f32 %v344_v8, %v278_v9  ;;  %v407_v11 = vpop.f32.mrb[21].mxu0 }
 0x1d8   :  { %v281_v12 = vpop.f32.mrb[22].mxu0 }
 0x1d9   :  { %316 = vst.msk [vmem:[%s715_s5] sm:$0xff] %vm48_vm1, %v279_v10  ;;  %v282_v13 = vadd.f32 %v344_v8, %v281_v12  ;;  %v408_v14 = vpop.f32.mrb[23].mxu0 }
 0x1db   :  { %317 = vst.msk [vmem:[%s715_s5 + $0x8] sm:$0xff] %vm48_vm1, %v282_v13 }
 0x1de   :  { %v286_v0 = vpop.f32.mrb[0].mxu1 }
 0x1df   :  { %v287_v15 = vadd.f32 %v344_v8, %v286_v0  ;;  %v411_v16 = vpop.f32.mrb[1].mxu1 }
 0x1e0   :  { %v289_v17 = vpop.f32.mrb[2].mxu1 }
 0x1e1   :  { %318 = vst.msk [vmem:[%s715_s5 + $0x10] sm:$0xff] %vm48_vm1, %v287_v15  ;;  %v290_v18 = vadd.f32 %v344_v8, %v289_v17  ;;  %v412_v19 = vpop.f32.mrb[3].mxu1 }
 0x1e3   :  { %319 = vst.msk [vmem:[%s715_s5 + $0x18] sm:$0xff] %vm48_vm1, %v290_v18 }
 0x1e6   :  { %v294_v20 = vpop.f32.mrb[4].mxu1 }
 0x1e7   :  { %v295_v21 = vadd.f32 %v344_v8, %v294_v20  ;;  %v415_v22 = vpop.f32.mrb[5].mxu1 }
 0x1e8   :  { %v297_v23 = vpop.f32.mrb[6].mxu1 }
 0x1e9   :  { %320 = vst.msk [vmem:[%s715_s5 + $0x20] sm:$0xff] %vm48_vm1, %v295_v21  ;;  %v298_v24 = vadd.f32 %v344_v8, %v297_v23  ;;  %v416_v25 = vpop.f32.mrb[7].mxu1 }
 0x1eb   :  { %321 = vst.msk [vmem:[%s715_s5 + $0x28] sm:$0xff] %vm48_vm1, %v298_v24 }
 0x1ee   :  { %v302_v26 = vpop.f32.mrb[8].mxu1 }
 0x1ef   :  { %v303_v27 = vadd.f32 %v344_v8, %v302_v26  ;;  %v419_v28 = vpop.f32.mrb[9].mxu1 }
 0x1f0   :  { %v305_v29 = vpop.f32.mrb[10].mxu1 }
 0x1f1   :  { %322 = vst.msk [vmem:[%s715_s5 + $0x30] sm:$0xff] %vm48_vm1, %v303_v27  ;;  %v306_v30 = vadd.f32 %v344_v8, %v305_v29  ;;  %v420_v31 = vpop.f32.mrb[11].mxu1 }
 0x1f3   :  { %323 = vst.msk [vmem:[%s715_s5 + $0x38] sm:$0xff] %vm48_vm1, %v306_v30 }
 0x1f6   :  { %v310_v32 = vpop.f32.mrb[12].mxu1 }
 0x1f7   :  { %v311_v33 = vadd.f32 %v344_v8, %v310_v32  ;;  %v423_v34 = vpop.f32.mrb[13].mxu1 }
 0x1f8   :  { %v313_v35 = vpop.f32.mrb[14].mxu1 }
 0x1f9   :  { %324 = vst.msk [vmem:[%s715_s5 + $0x40] sm:$0xff] %vm48_vm1, %v311_v33  ;;  %v424_v36 = vpop.f32.mrb[15].mxu1 }

</bundles_post_ra>
